<compile_context>
chip_gen: v6e
topology: v6e:2x2x1
jax: 0.10.0
libtpu: 0.0.40
codegen_flags: <defaults>
</compile_context>

<pallas_src>
import jax
import jax.numpy as jnp
from jax.experimental import pallas as pl
from jax.experimental.pallas import tpu as pltpu


def relu_conv1x1_kernel(w_ref, x_ref, o_ref):
    # w_ref: (Cout, tci) bf16 weight slice
    # x_ref: (tci, M)    bf16 activation slice
    # o_ref: (Cout, M)   f32 output tile, resident across the reduction grid
    k = pl.program_id(0)

    @pl.when(k == 0)
    def _():
        o_ref[...] = jnp.zeros_like(o_ref)

    # Fused ReLU (VPU, hidden under the MXU); 0.0 is weakly typed so x stays bf16.
    x = jnp.maximum(x_ref[...], 0.0)
    o_ref[...] += jnp.dot(w_ref[...], x, preferred_element_type=jnp.float32)


def relu_conv1x1(x_nchw, weight_oi, *, tci=256):
    """x_nchw: (N, Cin, H, W) f32; weight_oi: (Cout, Cin) f32 -> (N, Cout, H, W) f32."""
    N, Cin, H, W = x_nchw.shape
    Cout = weight_oi.shape[0]
    M = H * W

    # TODO(synk): kernel assumes N == 1 (as in the module); batch > 1 would need
    # a batched grid axis (the NCHW -> (Cin, N*M) flatten is not contiguous).
    assert N == 1
    assert Cin % tci == 0 and Cout % 8 == 0

    # Free, contiguous reshape + bf16 cast (accumulation stays f32 in-kernel).
    x_cm = x_nchw.reshape(Cin, M).astype(jnp.bfloat16)
    w_bf = weight_oi.astype(jnp.bfloat16)

    kt = Cin // tci
    cost = pl.CostEstimate(
        flops=2 * Cout * Cin * M,
        transcendentals=0,
        bytes_accessed=x_cm.size * 2 + w_bf.size * 2 + Cout * M * 4,
    )

    out_cm = pl.pallas_call(
        relu_conv1x1_kernel,
        out_shape=jax.ShapeDtypeStruct((Cout, M), jnp.float32),
        grid_spec=pl.GridSpec(
            grid=(kt,),
            in_specs=[
                # Weight slice (Cout, tci) per contraction step.
                pl.BlockSpec((Cout, tci), lambda k: (0, k)),
                # Activation slice (tci, M): streamed over the grid so the DMA
                # for step k+1 overlaps the MXU on step k.
                pl.BlockSpec((tci, M), lambda k: (k, 0)),
            ],
            # Output block index constant across the reduction axis -> block
            # stays resident in VMEM and acts as the f32 accumulator; last dim
            # equals the full extent (784) so the non-128-multiple lane width
            # is legal (lightly masked tail stores only).
            out_specs=pl.BlockSpec((Cout, M), lambda k: (0, 0)),
        ),
        compiler_params=pltpu.CompilerParams(
            dimension_semantics=("arbitrary",)),
        cost_estimate=cost,
    )(w_bf, x_cm)

    # Free, contiguous reshape back to NCHW.
    return out_cm.reshape(N, Cout, H, W)


if __name__ == "__main__":
    key = jax.random.PRNGKey(0)
    kx, kw = jax.random.split(key)

    # Shapes implied by the module: x79 = randn([1, 512, 28, 28]);
    # Conv2d(512, 256, kernel_size=1, bias=False) -> weight (256, 512, 1, 1).
    x = jax.random.normal(kx, (1, 512, 28, 28), dtype=jnp.float32)
    w4d = jax.random.normal(kw, (256, 512, 1, 1), dtype=jnp.float32) * 0.02
    w = w4d.reshape(256, 512)

    out = relu_conv1x1(x, w)
    out = jax.block_until_ready(out)
    assert out.shape == (1, 256, 28, 28)

    # Reference 1: same numerics path (bf16 inputs, f32 accumulation).
    x_relu = jnp.maximum(x, 0.0)
    ref_bf = jnp.dot(
        w.astype(jnp.bfloat16),
        x_relu.reshape(512, 28 * 28).astype(jnp.bfloat16),
        preferred_element_type=jnp.float32,
    ).reshape(1, 256, 28, 28)
    assert jnp.allclose(out, ref_bf, atol=2e-3, rtol=2e-3)

    # Reference 2: the original f32 module semantics (looser tolerance since
    # the kernel uses bf16 inputs).
    ref_f32 = jnp.einsum("nchw,oc->nohw", x_relu, w)
    assert jnp.allclose(out, ref_f32, atol=5e-2, rtol=5e-2)

    print("KERNEL_OK")
</pallas_src>

<mosaic_0001>
module attributes {stable_mosaic.version = 11 : i64} {
  func.func @relu_conv1x1_kernel(%arg0: i32, %arg1: memref<256x256xbf16, #tpu.memory_space<vmem>>, %arg2: memref<256x784xbf16, #tpu.memory_space<vmem>>, %arg3: memref<256x784xf32, #tpu.memory_space<vmem>>) attributes {dimension_semantics = [#tpu.dimension_semantics<arbitrary>], iteration_bounds = array<i64: 2>, scalar_prefetch = 0 : i64, scratch_operands = 0 : i64, tpu.core_type = #tpu.core_type<tc>, window_params = [{transform_indices = @transform_0, window_bounds = array<i64: 256, 256>}, {transform_indices = @transform_1, window_bounds = array<i64: 256, 784>}, {pipeline_mode = #tpu.pipeline_mode<synchronous>, transform_indices = @transform_2, window_bounds = array<i64: 256, 784>}]} {
    %c0_i32 = arith.constant 0 : i32
    %0 = arith.cmpi eq, %arg0, %c0_i32 : i32
    %1 = arith.extui %0 : i1 to i32
    %c0_i32_0 = arith.constant 0 : i32
    %2 = arith.cmpi ne, %1, %c0_i32_0 : i32
    scf.if %2 {
      %cst_9 = arith.constant 0.000000e+00 : f32
      %11 = vector.broadcast %cst_9 : f32 to vector<256x784xf32>
      %c0_10 = arith.constant 0 : index
      %c0_11 = arith.constant 0 : index
      %12 = vector.load %arg3[%c0_10, %c0_11] : memref<256x784xf32, #tpu.memory_space<vmem>>, vector<256x784xf32>
      tpu.vector_store %arg3[%c0_10, %c0_11], %11 {strides = array<i32>} : memref<256x784xf32, #tpu.memory_space<vmem>>, vector<256x784xf32>,
    } else {
    }
    %c0 = arith.constant 0 : index
    %c0_1 = arith.constant 0 : index
    %3 = vector.load %arg2[%c0, %c0_1] : memref<256x784xbf16, #tpu.memory_space<vmem>>, vector<256x784xbf16>
    %cst = arith.constant 0.000000e+00 : bf16
    %4 = vector.broadcast %cst : bf16 to vector<256x784xbf16>
    %5 = arith.maximumf %3, %4 : vector<256x784xbf16>
    %c0_2 = arith.constant 0 : index
    %c0_3 = arith.constant 0 : index
    %6 = vector.load %arg3[%c0_2, %c0_3] : memref<256x784xf32, #tpu.memory_space<vmem>>, vector<256x784xf32>
    %c0_4 = arith.constant 0 : index
    %c0_5 = arith.constant 0 : index
    %7 = vector.load %arg1[%c0_4, %c0_5] : memref<256x256xbf16, #tpu.memory_space<vmem>>, vector<256x256xbf16>
    %cst_6 = arith.constant dense<0.000000e+00> : vector<256x784xf32>
    %8 = tpu.matmul %7, %5, %cst_6 {dimension_numbers = #tpu.dot_dimension_numbers<[1], [0], [0], [1], [0, 0, 1, 1], [], []>} : vector<256x256xbf16>, vector<256x784xbf16>, vector<256x784xf32> -> vector<256x784xf32>
    %9 = arith.addf %6, %8 : vector<256x784xf32>
    %c0_7 = arith.constant 0 : index
    %c0_8 = arith.constant 0 : index
    %10 = vector.load %arg3[%c0_7, %c0_8] : memref<256x784xf32, #tpu.memory_space<vmem>>, vector<256x784xf32>
    tpu.vector_store %arg3[%c0_7, %c0_8], %9 {strides = array<i32>} : memref<256x784xf32, #tpu.memory_space<vmem>>, vector<256x784xf32>,
    return
  }
  func.func @transform_0(%arg0: i32) -> (i32, i32) {
    %c0_i32 = arith.constant 0 : i32
    %c0_i32_0 = arith.constant 0 : i32
    return %c0_i32, %arg0 : i32, i32
  }
  func.func @transform_1(%arg0: i32) -> (i32, i32) {
    %c0_i32 = arith.constant 0 : i32
    %c0_i32_0 = arith.constant 0 : i32
    return %arg0, %c0_i32 : i32, i32
  }
  func.func @transform_2(%arg0: i32) -> (i32, i32) {
    %c0_i32 = arith.constant 0 : i32
    %c0_i32_0 = arith.constant 0 : i32
    %c0_i32_1 = arith.constant 0 : i32
    return %c0_i32, %c0_i32_0 : i32, i32
  }
}

</mosaic_0001>

<bundles_post_ra>
// kernel: tpu_custom_call.1
= control target key start
LH: loop header
LB: loop body
LE: loop exit
PB: predicated region body
PF: predicated region fallthrough
CT: control target
= control target key end

     0   :  { %s3414_s9 = smov 0   ;;  %s3416_s10 = smov 0   ;;  %s6352_s0 = inlined_call_operand.vmem [shape: bf16[256,512], index: 0, kind: input, shape index: {}]   ;;  %s6353_s1 = inlined_call_operand.vmem [shape: bf16[512,784], index: 1, kind: input, shape index: {}]   ;;  %s6354_s2 = inlined_call_operand.vmem [shape: f32[256,784], index: 2, kind: output, shape index: {}]  }
   0x1   :  { %s3418_s11 = smov 0  }
   0x2 LB: > { %s3028_s12 = sadd.s32 4294967295, %s3395_s11   ;;  %s3431_s13 = sadd.s32 1, %s3395_s11   ;;  %s3395_s11 = sphi %s3418_s11, %s6357_s11   ;;  %s3391_s10 = sphi %s3416_s10, %s6356_s10   ;;  %s3387_s9 = sphi %s3414_s9, %s6355_s9  }
   0x3   : > { %s16_s14 = ssub.s32 %s3395_s11, %s3431_s13  ;;  %s19_s15 = sadd.s32 1, %s3391_s10 }
   0x4   : > { %p17_p0 = scmp.eq.s32.totalorder %s16_s14, 0  ;;  %p26_p1 = scmp.ne.s32.totalorder %s3391_s10, %s3387_s9 }
   0x5   : > { %p27_p2 = scmp.eq.s32.totalorder %s3395_s11, 0  ;;  %p3030_p4 = scmp.ge.s32.totalorder %s3395_s11, 2 }
   0x6   : > { %s3440_s16 = scalar_select %p17_p0, %s3391_s10, %s19_s15  }
   0x7   : > { %p28_p3 = por %p27_p2, %p26_p1  ;;  %99 = sbr.rel (%p3030_p4) target bundleno = 32 (0x20), region = 16 }
   0xc   : > { %102 = sbr.rel (!%p28_p3) target bundleno = 32 (0x20), region = 20  ;;  %s104_s17 = sand.u32 (%p28_p3), 1, %s3391_s10  }
   0xd   : > { %s3185_s18 = sshll.u32 (%p28_p3), %s3395_s11, 3  ;;  %s3031_s19 = sshll.u32 (%p28_p3), %s104_s17, 8 }
   0xe   : > { %s3448_s22 = scalar_lea.vmem (%p28_p3), %s6352_s0, %s3185_s18  ;;  %s3453_s23 = scalar_lea.vmem (%p28_p3), [#allocation2], %s3031_s19 }
   0xf   : > { %v200_v0 = vld [vmem:[%s3448_s22] sm:$0xff] (%p28_p3)  ;;  %v202_v1 = vld [vmem:[%s3448_s22 + $0x10] sm:$0xff] (%p28_p3) }
  0x10   : > { %v204_v2 = vld [vmem:[%s3448_s22 + $0x20] sm:$0xff] (%p28_p3)  ;;  %201 = vst [vmem:[%s3453_s23] sm:$0xff] (%p28_p3), %v200_v0  ;;  %203 = vst [vmem:[%s3453_s23 + $0x8] sm:$0xff] (%p28_p3), %v202_v1  ;;  %v206_v3 = vld [vmem:[%s3448_s22 + $0x30] sm:$0xff] (%p28_p3) }
  0x11   : > { %205 = vst [vmem:[%s3453_s23 + $0x10] sm:$0xff] %v204_v2  ;;  %v208_v4 = vld [vmem:[%s3448_s22 + $0x40] sm:$0xff]  ;;  %v210_v5 = vld [vmem:[%s3448_s22 + $0x50] sm:$0xff]  ;;  %207 = vst [vmem:[%s3453_s23 + $0x18] sm:$0xff] %v206_v3 }
  0x12   : > { %209 = vst [vmem:[%s3453_s23 + $0x20] sm:$0xff] %v208_v4  ;;  %211 = vst [vmem:[%s3453_s23 + $0x28] sm:$0xff] %v210_v5  ;;  %v212_v6 = vld [vmem:[%s3448_s22 + $0x60] sm:$0xff]  ;;  %v214_v7 = vld [vmem:[%s3448_s22 + $0x70] sm:$0xff] }
  0x13   : > { %v216_v8 = vld [vmem:[%s3448_s22 + $0x80] sm:$0xff]  ;;  %213 = vst [vmem:[%s3453_s23 + $0x30] sm:$0xff] %v212_v6  ;;  %215 = vst [vmem:[%s3453_s23 + $0x38] sm:$0xff] %v214_v7  ;;  %v218_v9 = vld [vmem:[%s3448_s22 + $0x90] sm:$0xff] }
  0x14   : > { %217 = vst [vmem:[%s3453_s23 + $0x40] sm:$0xff] %v216_v8  ;;  %v220_v10 = vld [vmem:[%s3448_s22 + $0xa0] sm:$0xff]  ;;  %v222_v11 = vld [vmem:[%s3448_s22 + $0xb0] sm:$0xff]  ;;  %219 = vst [vmem:[%s3453_s23 + $0x48] sm:$0xff] %v218_v9 }
  0x15   : > { %221 = vst [vmem:[%s3453_s23 + $0x50] sm:$0xff] %v220_v10  ;;  %223 = vst [vmem:[%s3453_s23 + $0x58] sm:$0xff] %v222_v11  ;;  %v224_v12 = vld [vmem:[%s3448_s22 + $0xc0] sm:$0xff]  ;;  %v226_v13 = vld [vmem:[%s3448_s22 + $0xd0] sm:$0xff] }
  0x16   : > { %v228_v14 = vld [vmem:[%s3448_s22 + $0xe0] sm:$0xff]  ;;  %225 = vst [vmem:[%s3453_s23 + $0x60] sm:$0xff] %v224_v12  ;;  %227 = vst [vmem:[%s3453_s23 + $0x68] sm:$0xff] %v226_v13  ;;  %v230_v15 = vld [vmem:[%s3448_s22 + $0xf0] sm:$0xff] }
  0x17   : > { %229 = vst [vmem:[%s3453_s23 + $0x70] sm:$0xff] %v228_v14  ;;  %v232_v16 = vld [vmem:[%s3448_s22 + $0x100] sm:$0xff]  ;;  %v234_v17 = vld [vmem:[%s3448_s22 + $0x110] sm:$0xff]  ;;  %231 = vst [vmem:[%s3453_s23 + $0x78] sm:$0xff] %v230_v15 }
  0x18   : > { %233 = vst [vmem:[%s3453_s23 + $0x80] sm:$0xff] %v232_v16  ;;  %235 = vst [vmem:[%s3453_s23 + $0x88] sm:$0xff] %v234_v17  ;;  %v236_v18 = vld [vmem:[%s3448_s22 + $0x120] sm:$0xff]  ;;  %v238_v19 = vld [vmem:[%s3448_s22 + $0x130] sm:$0xff] }
  0x19   : > { %v240_v20 = vld [vmem:[%s3448_s22 + $0x140] sm:$0xff]  ;;  %237 = vst [vmem:[%s3453_s23 + $0x90] sm:$0xff] %v236_v18  ;;  %239 = vst [vmem:[%s3453_s23 + $0x98] sm:$0xff] %v238_v19  ;;  %v242_v21 = vld [vmem:[%s3448_s22 + $0x150] sm:$0xff] }
  0x1a   : > { %241 = vst [vmem:[%s3453_s23 + $0xa0] sm:$0xff] %v240_v20  ;;  %v244_v22 = vld [vmem:[%s3448_s22 + $0x160] sm:$0xff]  ;;  %v246_v23 = vld [vmem:[%s3448_s22 + $0x170] sm:$0xff]  ;;  %243 = vst [vmem:[%s3453_s23 + $0xa8] sm:$0xff] %v242_v21 }
  0x1b   : > { %245 = vst [vmem:[%s3453_s23 + $0xb0] sm:$0xff] %v244_v22  ;;  %247 = vst [vmem:[%s3453_s23 + $0xb8] sm:$0xff] %v246_v23  ;;  %v248_v24 = vld [vmem:[%s3448_s22 + $0x180] sm:$0xff]  ;;  %v250_v25 = vld [vmem:[%s3448_s22 + $0x190] sm:$0xff] }
  0x1c   : > { %v252_v26 = vld [vmem:[%s3448_s22 + $0x1a0] sm:$0xff]  ;;  %249 = vst [vmem:[%s3453_s23 + $0xc0] sm:$0xff] %v248_v24  ;;  %251 = vst [vmem:[%s3453_s23 + $0xc8] sm:$0xff] %v250_v25  ;;  %v254_v27 = vld [vmem:[%s3448_s22 + $0x1b0] sm:$0xff] }
  0x1d   : > { %253 = vst [vmem:[%s3453_s23 + $0xd0] sm:$0xff] %v252_v26  ;;  %v256_v28 = vld [vmem:[%s3448_s22 + $0x1c0] sm:$0xff]  ;;  %v258_v29 = vld [vmem:[%s3448_s22 + $0x1d0] sm:$0xff]  ;;  %255 = vst [vmem:[%s3453_s23 + $0xd8] sm:$0xff] %v254_v27 }
  0x1e   : > { %257 = vst [vmem:[%s3453_s23 + $0xe0] sm:$0xff] %v256_v28  ;;  %259 = vst [vmem:[%s3453_s23 + $0xe8] sm:$0xff] %v258_v29  ;;  %v260_v30 = vld [vmem:[%s3448_s22 + $0x1e0] sm:$0xff]  ;;  %v262_v31 = vld [vmem:[%s3448_s22 + $0x1f0] sm:$0xff] }
  0x1f   : > { %261 = vst [vmem:[%s3453_s23 + $0xf0] sm:$0xff] %v260_v30  ;;  %263 = vst [vmem:[%s3453_s23 + $0xf8] sm:$0xff] %v262_v31 }
  0x20 PF: > { %p3034_p5 = scmp.ge.s32.totalorder %s3395_s11, 1  ;;  %p278_p6 = scmp.lt.s32.totalorder %s3395_s11, 3 }
  0x22   : > { %p279_p7 = pnand %p3034_p5, %p278_p6 }
  0x23   : > { %s285_s24 = sand.u32 (!%p279_p7), 1, %s3387_s9   ;;  %s3036_s25 = sshll.u32 (!%p279_p7), %s3028_s12, 5 }
  0x24   : > { %282 = sbr.rel (%p279_p7) target bundleno = 681 (0x2a9), region = 62  ;;  %s3035_s26 = sshll.u32 (!%p279_p7), %s285_s24, 8 }
  0x25   : > { %p309_p8 = scmp.lt.s32.totalorder (!%p279_p7), %s3036_s25, 63  ;;  %s3526_s3 = scalar_lea.vmem (!%p279_p7), [#allocation2], %s3035_s26 }
  0x26   : > { %p3038_p9 = scmp.ne.s32.totalorder (!%p279_p7), %s3028_s12, 0 }
  0x29   : > { %s6359_s25 = smov (!%p309_p8, %s3036_s25), 63  ;;  %319 = sbr.rel (%p3038_p9) target bundleno = 159 (0x9f), region = 70 }
  0x2a   : > { %s3298_s27 = smul.u32 28, %s6359_s25 }
  0x2c   : > { %s3524_s30 = scalar_lea.vmem %s6353_s1, %s3298_s27 }
  0x2e   : > { %vm326_vm0 = vcmask 130048   ;;  %v3397_v32 = vmov 0.0  }
  0x2f   : > { %320 = vst [vmem:[%s6354_s2] sm:$0xff] %v3397_v32  ;;  %321 = vst [vmem:[%s6354_s2 + $0x8] sm:$0xff] %v3397_v32 }
  0x30   : > { %322 = vst [vmem:[%s6354_s2 + $0x10] sm:$0xff] %v3397_v32  ;;  %323 = vst [vmem:[%s6354_s2 + $0x18] sm:$0xff] %v3397_v32 }
  0x31   : > { %324 = vst [vmem:[%s6354_s2 + $0x20] sm:$0xff] %v3397_v32  ;;  %325 = vst [vmem:[%s6354_s2 + $0x28] sm:$0xff] %v3397_v32 }
  0x32   : > { %328 = vst [vmem:[%s6354_s2 + $0x38] sm:$0xff] %v3397_v32  ;;  %329 = vst [vmem:[%s6354_s2 + $0x40] sm:$0xff] %v3397_v32 }
  0x33   : > { %330 = vst [vmem:[%s6354_s2 + $0x48] sm:$0xff] %v3397_v32  ;;  %331 = vst [vmem:[%s6354_s2 + $0x50] sm:$0xff] %v3397_v32 }
  0x34   : > { %332 = vst [vmem:[%s6354_s2 + $0x58] sm:$0xff] %v3397_v32  ;;  %333 = vst [vmem:[%s6354_s2 + $0x60] sm:$0xff] %v3397_v32 }
  0x35   : > { %335 = vst [vmem:[%s6354_s2 + $0x70] sm:$0xff] %v3397_v32  ;;  %336 = vst [vmem:[%s6354_s2 + $0x78] sm:$0xff] %v3397_v32 }
  0x36   : > { %337 = vst [vmem:[%s6354_s2 + $0x80] sm:$0xff] %v3397_v32  ;;  %338 = vst [vmem:[%s6354_s2 + $0x88] sm:$0xff] %v3397_v32 }
  0x37   : > { %339 = vst [vmem:[%s6354_s2 + $0x90] sm:$0xff] %v3397_v32  ;;  %340 = vst [vmem:[%s6354_s2 + $0x98] sm:$0xff] %v3397_v32 }
  0x38   : > { %342 = vst [vmem:[%s6354_s2 + $0xa8] sm:$0xff] %v3397_v32  ;;  %343 = vst [vmem:[%s6354_s2 + $0xb0] sm:$0xff] %v3397_v32 }
  0x39   : > { %344 = vst [vmem:[%s6354_s2 + $0xb8] sm:$0xff] %v3397_v32  ;;  %345 = vst [vmem:[%s6354_s2 + $0xc0] sm:$0xff] %v3397_v32 }
  0x3a   : > { %346 = vst [vmem:[%s6354_s2 + $0xc8] sm:$0xff] %v3397_v32  ;;  %347 = vst [vmem:[%s6354_s2 + $0xd0] sm:$0xff] %v3397_v32 }
  0x3b   : > { %349 = vst [vmem:[%s6354_s2 + $0xe0] sm:$0xff] %v3397_v32  ;;  %350 = vst [vmem:[%s6354_s2 + $0xe8] sm:$0xff] %v3397_v32 }
  0x3c   : > { %351 = vst [vmem:[%s6354_s2 + $0xf0] sm:$0xff] %v3397_v32  ;;  %352 = vst [vmem:[%s6354_s2 + $0xf8] sm:$0xff] %v3397_v32 }
  0x3d   : > { %353 = vst [vmem:[%s6354_s2 + $0x100] sm:$0xff] %v3397_v32  ;;  %354 = vst [vmem:[%s6354_s2 + $0x108] sm:$0xff] %v3397_v32 }
  0x3e   : > { %356 = vst [vmem:[%s6354_s2 + $0x118] sm:$0xff] %v3397_v32  ;;  %357 = vst [vmem:[%s6354_s2 + $0x120] sm:$0xff] %v3397_v32 }
  0x3f   : > { %358 = vst [vmem:[%s6354_s2 + $0x128] sm:$0xff] %v3397_v32  ;;  %359 = vst [vmem:[%s6354_s2 + $0x130] sm:$0xff] %v3397_v32 }
  0x40   : > { %360 = vst [vmem:[%s6354_s2 + $0x138] sm:$0xff] %v3397_v32  ;;  %361 = vst [vmem:[%s6354_s2 + $0x140] sm:$0xff] %v3397_v32 }
  0x41   : > { %363 = vst [vmem:[%s6354_s2 + $0x150] sm:$0xff] %v3397_v32  ;;  %364 = vst [vmem:[%s6354_s2 + $0x158] sm:$0xff] %v3397_v32 }
  0x42   : > { %365 = vst [vmem:[%s6354_s2 + $0x160] sm:$0xff] %v3397_v32  ;;  %366 = vst [vmem:[%s6354_s2 + $0x168] sm:$0xff] %v3397_v32 }
  0x43   : > { %367 = vst [vmem:[%s6354_s2 + $0x170] sm:$0xff] %v3397_v32  ;;  %368 = vst [vmem:[%s6354_s2 + $0x178] sm:$0xff] %v3397_v32 }
  0x44   : > { %370 = vst [vmem:[%s6354_s2 + $0x188] sm:$0xff] %v3397_v32  ;;  %371 = vst [vmem:[%s6354_s2 + $0x190] sm:$0xff] %v3397_v32 }
  0x45   : > { %372 = vst [vmem:[%s6354_s2 + $0x198] sm:$0xff] %v3397_v32  ;;  %373 = vst [vmem:[%s6354_s2 + $0x1a0] sm:$0xff] %v3397_v32 }
  0x46   : > { %374 = vst [vmem:[%s6354_s2 + $0x1a8] sm:$0xff] %v3397_v32  ;;  %375 = vst [vmem:[%s6354_s2 + $0x1b0] sm:$0xff] %v3397_v32 }
  0x47   : > { %377 = vst [vmem:[%s6354_s2 + $0x1c0] sm:$0xff] %v3397_v32  ;;  %378 = vst [vmem:[%s6354_s2 + $0x1c8] sm:$0xff] %v3397_v32 }
  0x48   : > { %379 = vst [vmem:[%s6354_s2 + $0x1d0] sm:$0xff] %v3397_v32  ;;  %380 = vst [vmem:[%s6354_s2 + $0x1d8] sm:$0xff] %v3397_v32 }
  0x49   : > { %381 = vst [vmem:[%s6354_s2 + $0x1e0] sm:$0xff] %v3397_v32  ;;  %382 = vst [vmem:[%s6354_s2 + $0x1e8] sm:$0xff] %v3397_v32 }
  0x4a   : > { %384 = vst [vmem:[%s6354_s2 + $0x1f8] sm:$0xff] %v3397_v32  ;;  %385 = vst [vmem:[%s6354_s2 + $0x200] sm:$0xff] %v3397_v32 }
  0x4b   : > { %386 = vst [vmem:[%s6354_s2 + $0x208] sm:$0xff] %v3397_v32  ;;  %387 = vst [vmem:[%s6354_s2 + $0x210] sm:$0xff] %v3397_v32 }
  0x4c   : > { %388 = vst [vmem:[%s6354_s2 + $0x218] sm:$0xff] %v3397_v32  ;;  %389 = vst [vmem:[%s6354_s2 + $0x220] sm:$0xff] %v3397_v32 }
  0x4d   : > { %391 = vst [vmem:[%s6354_s2 + $0x230] sm:$0xff] %v3397_v32  ;;  %392 = vst [vmem:[%s6354_s2 + $0x238] sm:$0xff] %v3397_v32 }
  0x4e   : > { %393 = vst [vmem:[%s6354_s2 + $0x240] sm:$0xff] %v3397_v32  ;;  %394 = vst [vmem:[%s6354_s2 + $0x248] sm:$0xff] %v3397_v32 }
  0x4f   : > { %395 = vst [vmem:[%s6354_s2 + $0x250] sm:$0xff] %v3397_v32  ;;  %396 = vst [vmem:[%s6354_s2 + $0x258] sm:$0xff] %v3397_v32 }
  0x50   : > { %398 = vst [vmem:[%s6354_s2 + $0x268] sm:$0xff] %v3397_v32  ;;  %399 = vst [vmem:[%s6354_s2 + $0x270] sm:$0xff] %v3397_v32 }
  0x51   : > { %400 = vst [vmem:[%s6354_s2 + $0x278] sm:$0xff] %v3397_v32  ;;  %401 = vst [vmem:[%s6354_s2 + $0x280] sm:$0xff] %v3397_v32 }
  0x52   : > { %402 = vst [vmem:[%s6354_s2 + $0x288] sm:$0xff] %v3397_v32  ;;  %403 = vst [vmem:[%s6354_s2 + $0x290] sm:$0xff] %v3397_v32 }
  0x53   : > { %405 = vst [vmem:[%s6354_s2 + $0x2a0] sm:$0xff] %v3397_v32  ;;  %406 = vst [vmem:[%s6354_s2 + $0x2a8] sm:$0xff] %v3397_v32 }
  0x54   : > { %407 = vst [vmem:[%s6354_s2 + $0x2b0] sm:$0xff] %v3397_v32  ;;  %408 = vst [vmem:[%s6354_s2 + $0x2b8] sm:$0xff] %v3397_v32 }
  0x55   : > { %409 = vst [vmem:[%s6354_s2 + $0x2c0] sm:$0xff] %v3397_v32  ;;  %410 = vst [vmem:[%s6354_s2 + $0x2c8] sm:$0xff] %v3397_v32 }
  0x56   : > { %412 = vst [vmem:[%s6354_s2 + $0x2d8] sm:$0xff] %v3397_v32  ;;  %413 = vst [vmem:[%s6354_s2 + $0x2e0] sm:$0xff] %v3397_v32 }
  0x57   : > { %414 = vst [vmem:[%s6354_s2 + $0x2e8] sm:$0xff] %v3397_v32  ;;  %415 = vst [vmem:[%s6354_s2 + $0x2f0] sm:$0xff] %v3397_v32 }
  0x58   : > { %416 = vst [vmem:[%s6354_s2 + $0x2f8] sm:$0xff] %v3397_v32  ;;  %417 = vst [vmem:[%s6354_s2 + $0x300] sm:$0xff] %v3397_v32 }
  0x59   : > { %419 = vst [vmem:[%s6354_s2 + $0x310] sm:$0xff] %v3397_v32  ;;  %420 = vst [vmem:[%s6354_s2 + $0x318] sm:$0xff] %v3397_v32 }
  0x5a   : > { %421 = vst [vmem:[%s6354_s2 + $0x320] sm:$0xff] %v3397_v32  ;;  %422 = vst [vmem:[%s6354_s2 + $0x328] sm:$0xff] %v3397_v32 }
  0x5b   : > { %423 = vst [vmem:[%s6354_s2 + $0x330] sm:$0xff] %v3397_v32  ;;  %424 = vst [vmem:[%s6354_s2 + $0x338] sm:$0xff] %v3397_v32 }
  0x5c   : > { %426 = vst [vmem:[%s6354_s2 + $0x348] sm:$0xff] %v3397_v32  ;;  %427 = vst [vmem:[%s6354_s2 + $0x350] sm:$0xff] %v3397_v32 }
  0x5d   : > { %428 = vst [vmem:[%s6354_s2 + $0x358] sm:$0xff] %v3397_v32  ;;  %429 = vst [vmem:[%s6354_s2 + $0x360] sm:$0xff] %v3397_v32 }
  0x5e   : > { %430 = vst [vmem:[%s6354_s2 + $0x368] sm:$0xff] %v3397_v32  ;;  %431 = vst [vmem:[%s6354_s2 + $0x370] sm:$0xff] %v3397_v32 }
  0x5f   : > { %433 = vst [vmem:[%s6354_s2 + $0x380] sm:$0xff] %v3397_v32  ;;  %434 = vst [vmem:[%s6354_s2 + $0x388] sm:$0xff] %v3397_v32 }
  0x60   : > { %435 = vst [vmem:[%s6354_s2 + $0x390] sm:$0xff] %v3397_v32  ;;  %436 = vst [vmem:[%s6354_s2 + $0x398] sm:$0xff] %v3397_v32 }
  0x61   : > { %437 = vst [vmem:[%s6354_s2 + $0x3a0] sm:$0xff] %v3397_v32  ;;  %438 = vst [vmem:[%s6354_s2 + $0x3a8] sm:$0xff] %v3397_v32 }
  0x62   : > { %440 = vst [vmem:[%s6354_s2 + $0x3b8] sm:$0xff] %v3397_v32  ;;  %441 = vst [vmem:[%s6354_s2 + $0x3c0] sm:$0xff] %v3397_v32 }
  0x63   : > { %442 = vst [vmem:[%s6354_s2 + $0x3c8] sm:$0xff] %v3397_v32  ;;  %443 = vst [vmem:[%s6354_s2 + $0x3d0] sm:$0xff] %v3397_v32 }
  0x64   : > { %444 = vst [vmem:[%s6354_s2 + $0x3d8] sm:$0xff] %v3397_v32  ;;  %445 = vst [vmem:[%s6354_s2 + $0x3e0] sm:$0xff] %v3397_v32 }
  0x65   : > { %447 = vst [vmem:[%s6354_s2 + $0x3f0] sm:$0xff] %v3397_v32  ;;  %448 = vst [vmem:[%s6354_s2 + $0x3f8] sm:$0xff] %v3397_v32 }
  0x66   : > { %449 = vst [vmem:[%s6354_s2 + $0x400] sm:$0xff] %v3397_v32  ;;  %450 = vst [vmem:[%s6354_s2 + $0x408] sm:$0xff] %v3397_v32 }
  0x67   : > { %451 = vst [vmem:[%s6354_s2 + $0x410] sm:$0xff] %v3397_v32  ;;  %452 = vst [vmem:[%s6354_s2 + $0x418] sm:$0xff] %v3397_v32 }
  0x68   : > { %454 = vst [vmem:[%s6354_s2 + $0x428] sm:$0xff] %v3397_v32  ;;  %455 = vst [vmem:[%s6354_s2 + $0x430] sm:$0xff] %v3397_v32 }
  0x69   : > { %456 = vst [vmem:[%s6354_s2 + $0x438] sm:$0xff] %v3397_v32  ;;  %457 = vst [vmem:[%s6354_s2 + $0x440] sm:$0xff] %v3397_v32 }
  0x6a   : > { %458 = vst [vmem:[%s6354_s2 + $0x448] sm:$0xff] %v3397_v32  ;;  %459 = vst [vmem:[%s6354_s2 + $0x450] sm:$0xff] %v3397_v32 }
  0x6b   : > { %461 = vst [vmem:[%s6354_s2 + $0x460] sm:$0xff] %v3397_v32  ;;  %462 = vst [vmem:[%s6354_s2 + $0x468] sm:$0xff] %v3397_v32 }
  0x6c   : > { %463 = vst [vmem:[%s6354_s2 + $0x470] sm:$0xff] %v3397_v32  ;;  %464 = vst [vmem:[%s6354_s2 + $0x478] sm:$0xff] %v3397_v32 }
  0x6d   : > { %465 = vst [vmem:[%s6354_s2 + $0x480] sm:$0xff] %v3397_v32  ;;  %466 = vst [vmem:[%s6354_s2 + $0x488] sm:$0xff] %v3397_v32 }
  0x6e   : > { %468 = vst [vmem:[%s6354_s2 + $0x498] sm:$0xff] %v3397_v32  ;;  %469 = vst [vmem:[%s6354_s2 + $0x4a0] sm:$0xff] %v3397_v32 }
  0x6f   : > { %470 = vst [vmem:[%s6354_s2 + $0x4a8] sm:$0xff] %v3397_v32  ;;  %471 = vst [vmem:[%s6354_s2 + $0x4b0] sm:$0xff] %v3397_v32 }
  0x70   : > { %472 = vst [vmem:[%s6354_s2 + $0x4b8] sm:$0xff] %v3397_v32  ;;  %473 = vst [vmem:[%s6354_s2 + $0x4c0] sm:$0xff] %v3397_v32 }
  0x71   : > { %475 = vst [vmem:[%s6354_s2 + $0x4d0] sm:$0xff] %v3397_v32  ;;  %476 = vst [vmem:[%s6354_s2 + $0x4d8] sm:$0xff] %v3397_v32 }
  0x72   : > { %477 = vst [vmem:[%s6354_s2 + $0x4e0] sm:$0xff] %v3397_v32  ;;  %478 = vst [vmem:[%s6354_s2 + $0x4e8] sm:$0xff] %v3397_v32 }
  0x73   : > { %479 = vst [vmem:[%s6354_s2 + $0x4f0] sm:$0xff] %v3397_v32  ;;  %480 = vst [vmem:[%s6354_s2 + $0x4f8] sm:$0xff] %v3397_v32 }
  0x74   : > { %482 = vst [vmem:[%s6354_s2 + $0x508] sm:$0xff] %v3397_v32  ;;  %483 = vst [vmem:[%s6354_s2 + $0x510] sm:$0xff] %v3397_v32 }
  0x75   : > { %484 = vst [vmem:[%s6354_s2 + $0x518] sm:$0xff] %v3397_v32  ;;  %485 = vst [vmem:[%s6354_s2 + $0x520] sm:$0xff] %v3397_v32 }
  0x76   : > { %486 = vst [vmem:[%s6354_s2 + $0x528] sm:$0xff] %v3397_v32  ;;  %487 = vst [vmem:[%s6354_s2 + $0x530] sm:$0xff] %v3397_v32 }
  0x77   : > { %489 = vst [vmem:[%s6354_s2 + $0x540] sm:$0xff] %v3397_v32  ;;  %490 = vst [vmem:[%s6354_s2 + $0x548] sm:$0xff] %v3397_v32 }
  0x78   : > { %491 = vst [vmem:[%s6354_s2 + $0x550] sm:$0xff] %v3397_v32  ;;  %492 = vst [vmem:[%s6354_s2 + $0x558] sm:$0xff] %v3397_v32 }
  0x79   : > { %493 = vst [vmem:[%s6354_s2 + $0x560] sm:$0xff] %v3397_v32  ;;  %494 = vst [vmem:[%s6354_s2 + $0x568] sm:$0xff] %v3397_v32 }
  0x7a   : > { %496 = vst [vmem:[%s6354_s2 + $0x578] sm:$0xff] %v3397_v32  ;;  %497 = vst [vmem:[%s6354_s2 + $0x580] sm:$0xff] %v3397_v32 }
  0x7b   : > { %498 = vst [vmem:[%s6354_s2 + $0x588] sm:$0xff] %v3397_v32  ;;  %499 = vst [vmem:[%s6354_s2 + $0x590] sm:$0xff] %v3397_v32 }
  0x7c   : > { %500 = vst [vmem:[%s6354_s2 + $0x598] sm:$0xff] %v3397_v32  ;;  %501 = vst [vmem:[%s6354_s2 + $0x5a0] sm:$0xff] %v3397_v32 }
  0x7d   : > { %503 = vst [vmem:[%s6354_s2 + $0x5b0] sm:$0xff] %v3397_v32  ;;  %504 = vst [vmem:[%s6354_s2 + $0x5b8] sm:$0xff] %v3397_v32 }
  0x7e   : > { %505 = vst [vmem:[%s6354_s2 + $0x5c0] sm:$0xff] %v3397_v32  ;;  %506 = vst [vmem:[%s6354_s2 + $0x5c8] sm:$0xff] %v3397_v32 }
  0x7f   : > { %507 = vst [vmem:[%s6354_s2 + $0x5d0] sm:$0xff] %v3397_v32  ;;  %508 = vst [vmem:[%s6354_s2 + $0x5d8] sm:$0xff] %v3397_v32 }
  0x80   : > { %510 = vst [vmem:[%s6354_s2 + $0x5e8] sm:$0xff] %v3397_v32  ;;  %511 = vst [vmem:[%s6354_s2 + $0x5f0] sm:$0xff] %v3397_v32 }
  0x81   : > { %512 = vst [vmem:[%s6354_s2 + $0x5f8] sm:$0xff] %v3397_v32  ;;  %513 = vst [vmem:[%s6354_s2 + $0x600] sm:$0xff] %v3397_v32 }
  0x82   : > { %514 = vst [vmem:[%s6354_s2 + $0x608] sm:$0xff] %v3397_v32  ;;  %515 = vst [vmem:[%s6354_s2 + $0x610] sm:$0xff] %v3397_v32 }
  0x83   : > { %517 = vst [vmem:[%s6354_s2 + $0x620] sm:$0xff] %v3397_v32  ;;  %518 = vst [vmem:[%s6354_s2 + $0x628] sm:$0xff] %v3397_v32 }
  0x84   : > { %519 = vst [vmem:[%s6354_s2 + $0x630] sm:$0xff] %v3397_v32  ;;  %520 = vst [vmem:[%s6354_s2 + $0x638] sm:$0xff] %v3397_v32 }
  0x85   : > { %521 = vst [vmem:[%s6354_s2 + $0x640] sm:$0xff] %v3397_v32  ;;  %522 = vst [vmem:[%s6354_s2 + $0x648] sm:$0xff] %v3397_v32 }
  0x86   : > { %524 = vst [vmem:[%s6354_s2 + $0x658] sm:$0xff] %v3397_v32  ;;  %525 = vst [vmem:[%s6354_s2 + $0x660] sm:$0xff] %v3397_v32 }
  0x87   : > { %526 = vst [vmem:[%s6354_s2 + $0x668] sm:$0xff] %v3397_v32  ;;  %527 = vst [vmem:[%s6354_s2 + $0x670] sm:$0xff] %v3397_v32 }
  0x88   : > { %528 = vst [vmem:[%s6354_s2 + $0x678] sm:$0xff] %v3397_v32  ;;  %529 = vst [vmem:[%s6354_s2 + $0x680] sm:$0xff] %v3397_v32 }
  0x89   : > { %531 = vst [vmem:[%s6354_s2 + $0x690] sm:$0xff] %v3397_v32  ;;  %532 = vst [vmem:[%s6354_s2 + $0x698] sm:$0xff] %v3397_v32 }
  0x8a   : > { %533 = vst [vmem:[%s6354_s2 + $0x6a0] sm:$0xff] %v3397_v32  ;;  %534 = vst [vmem:[%s6354_s2 + $0x6a8] sm:$0xff] %v3397_v32 }
  0x8b   : > { %535 = vst [vmem:[%s6354_s2 + $0x6b0] sm:$0xff] %v3397_v32  ;;  %536 = vst [vmem:[%s6354_s2 + $0x6b8] sm:$0xff] %v3397_v32 }
  0x8c   : > { %538 = vst [vmem:[%s6354_s2 + $0x6c8] sm:$0xff] %v3397_v32  ;;  %539 = vst [vmem:[%s6354_s2 + $0x6d0] sm:$0xff] %v3397_v32 }
  0x8d   : > { %540 = vst [vmem:[%s6354_s2 + $0x6d8] sm:$0xff] %v3397_v32  ;;  %541 = vst [vmem:[%s6354_s2 + $0x6e0] sm:$0xff] %v3397_v32 }
  0x8e   : > { %542 = vst [vmem:[%s6354_s2 + $0x6e8] sm:$0xff] %v3397_v32  ;;  %543 = vst [vmem:[%s6354_s2 + $0x6f0] sm:$0xff] %v3397_v32 }
  0x8f   : > { %327 = vst.msk [vmem:[%s6354_s2 + $0x30] sm:$0xff] %vm326_vm0, %v3397_v32  ;;  %334 = vst.msk [vmem:[%s6354_s2 + $0x68] sm:$0xff] %vm326_vm0, %v3397_v32 }
  0x90   : > { %341 = vst.msk [vmem:[%s6354_s2 + $0xa0] sm:$0xff] %vm326_vm0, %v3397_v32  ;;  %348 = vst.msk [vmem:[%s6354_s2 + $0xd8] sm:$0xff] %vm326_vm0, %v3397_v32 }
  0x91   : > { %355 = vst.msk [vmem:[%s6354_s2 + $0x110] sm:$0xff] %vm326_vm0, %v3397_v32  ;;  %362 = vst.msk [vmem:[%s6354_s2 + $0x148] sm:$0xff] %vm326_vm0, %v3397_v32 }
  0x92   : > { %369 = vst.msk [vmem:[%s6354_s2 + $0x180] sm:$0xff] %vm326_vm0, %v3397_v32  ;;  %376 = vst.msk [vmem:[%s6354_s2 + $0x1b8] sm:$0xff] %vm326_vm0, %v3397_v32 }
  0x93   : > { %383 = vst.msk [vmem:[%s6354_s2 + $0x1f0] sm:$0xff] %vm326_vm0, %v3397_v32  ;;  %390 = vst.msk [vmem:[%s6354_s2 + $0x228] sm:$0xff] %vm326_vm0, %v3397_v32 }
  0x94   : > { %397 = vst.msk [vmem:[%s6354_s2 + $0x260] sm:$0xff] %vm326_vm0, %v3397_v32  ;;  %404 = vst.msk [vmem:[%s6354_s2 + $0x298] sm:$0xff] %vm326_vm0, %v3397_v32 }
  0x95   : > { %411 = vst.msk [vmem:[%s6354_s2 + $0x2d0] sm:$0xff] %vm326_vm0, %v3397_v32  ;;  %418 = vst.msk [vmem:[%s6354_s2 + $0x308] sm:$0xff] %vm326_vm0, %v3397_v32 }
  0x96   : > { %425 = vst.msk [vmem:[%s6354_s2 + $0x340] sm:$0xff] %vm326_vm0, %v3397_v32  ;;  %432 = vst.msk [vmem:[%s6354_s2 + $0x378] sm:$0xff] %vm326_vm0, %v3397_v32 }
  0x97   : > { %439 = vst.msk [vmem:[%s6354_s2 + $0x3b0] sm:$0xff] %vm326_vm0, %v3397_v32  ;;  %446 = vst.msk [vmem:[%s6354_s2 + $0x3e8] sm:$0xff] %vm326_vm0, %v3397_v32 }
  0x98   : > { %453 = vst.msk [vmem:[%s6354_s2 + $0x420] sm:$0xff] %vm326_vm0, %v3397_v32  ;;  %460 = vst.msk [vmem:[%s6354_s2 + $0x458] sm:$0xff] %vm326_vm0, %v3397_v32 }
  0x99   : > { %467 = vst.msk [vmem:[%s6354_s2 + $0x490] sm:$0xff] %vm326_vm0, %v3397_v32  ;;  %474 = vst.msk [vmem:[%s6354_s2 + $0x4c8] sm:$0xff] %vm326_vm0, %v3397_v32 }
  0x9a   : > { %481 = vst.msk [vmem:[%s6354_s2 + $0x500] sm:$0xff] %vm326_vm0, %v3397_v32  ;;  %488 = vst.msk [vmem:[%s6354_s2 + $0x538] sm:$0xff] %vm326_vm0, %v3397_v32 }
  0x9b   : > { %495 = vst.msk [vmem:[%s6354_s2 + $0x570] sm:$0xff] %vm326_vm0, %v3397_v32  ;;  %502 = vst.msk [vmem:[%s6354_s2 + $0x5a8] sm:$0xff] %vm326_vm0, %v3397_v32 }
  0x9c   : > { %509 = vst.msk [vmem:[%s6354_s2 + $0x5e0] sm:$0xff] %vm326_vm0, %v3397_v32  ;;  %516 = vst.msk [vmem:[%s6354_s2 + $0x618] sm:$0xff] %vm326_vm0, %v3397_v32 }
  0x9d   : > { %523 = vst.msk [vmem:[%s6354_s2 + $0x650] sm:$0xff] %vm326_vm0, %v3397_v32  ;;  %530 = vst.msk [vmem:[%s6354_s2 + $0x688] sm:$0xff] %vm326_vm0, %v3397_v32 }
  0x9e   : > { %537 = vst.msk [vmem:[%s6354_s2 + $0x6c0] sm:$0xff] %vm326_vm0, %v3397_v32  ;;  %544 = vst.msk [vmem:[%s6354_s2 + $0x6f8] sm:$0xff] %vm326_vm0, %v3397_v32 }
  0x9f PF: > { %v601_v33 = vld [vmem:[%s3524_s30 + $0x188] sm:$0xff]  ;;  %v602_v35 = vld [vmem:[%s3524_s30 + $0x190] sm:$0xff]  ;;  %v3398_v36 = vmov 0   ;;  %v594_v46 = vld [vmem:[%s3524_s30 + $0x158] sm:$0xff]  ;;  %vm2763_vm1 = vcmask 130048  }
  0xa0   : > { %v605_v34 = vld [vmem:[%s3524_s30 + $0x1a4] sm:$0xff]  ;;  %v729_v37 = vmax.bf16 %v3398_v36, %v601_v33  ;;  %v606_v39 = vld [vmem:[%s3524_s30 + $0x1ac] sm:$0xff]  ;;  %v730_v40 = vmax.bf16 %v3398_v36, %v602_v35  ;;  %v598_v47 = vld [vmem:[%s3524_s30 + $0x174] sm:$0xff]  ;;  %v722_v51 = vmax.bf16 %v3398_v36, %v594_v46 }
  0xa1   : > { %v733_v38 = vmax.bf16 %v3398_v36, %v605_v34  ;;  %v593_v41 = vld [vmem:[%s3524_s30 + $0x150] sm:$0xff]  ;;  %v734_v43 = vmax.bf16 %v3398_v36, %v606_v39  ;;  %v585_v48 = vld [vmem:[%s3524_s30 + $0x118] sm:$0xff]  ;;  %v726_v52 = vmax.bf16 %v3398_v36, %v598_v47  ;;  %v586_v54 = vld [vmem:[%s3524_s30 + $0x120] sm:$0xff] }
  0xa2   : > { %v597_v42 = vld [vmem:[%s3524_s30 + $0x16c] sm:$0xff]  ;;  %v721_v44 = vmax.bf16 %v3398_v36, %v593_v41  ;;  %v589_v53 = vld [vmem:[%s3524_s30 + $0x134] sm:$0xff]  ;;  %v590_v55 = vld [vmem:[%s3524_s30 + $0x13c] sm:$0xff]  ;;  %v713_v63 = vmax.bf16 %v3398_v36, %v585_v48  ;;  %v714_v4 = vmax.bf16 %v3398_v36, %v586_v54 }
  0xa3   : > { %v725_v45 = vmax.bf16 %v3398_v36, %v597_v42  ;;  %v3121_v49 = vcombine.high %v729_v37, %v733_v38  ;;  %v3120_v50 = vcombine.low %v729_v37, %v733_v38  ;;  %v3123_v56 = vcombine.high %v730_v40, %v734_v43  ;;  %v577_v59 = vld [vmem:[%s3524_s30 + $0xe0] sm:$0xff]  ;;  %v578_v1 = vld [vmem:[%s3524_s30 + $0xe8] sm:$0xff]  ;;  %v570_v14 = vld [vmem:[%s3524_s30 + $0xb0] sm:$0xff] }
  0xa4   : > { %v3122_v57 = vcombine.low %v730_v40, %v734_v43  ;;  %v581_v60 = vld [vmem:[%s3524_s30 + $0xfc] sm:$0xff]  ;;  %v3116_v61 = vcombine.high %v722_v51, %v726_v52  ;;  %v717_v0 = vmax.bf16 %v3398_v36, %v589_v53  ;;  %v582_v2 = vld [vmem:[%s3524_s30 + $0x104] sm:$0xff]  ;;  %v3115_v3 = vcombine.low %v722_v51, %v726_v52  ;;  %v574_v15 = vld [vmem:[%s3524_s30 + $0xcc] sm:$0xff] }
  0xa5   : > { %v3114_v58 = vcombine.high %v721_v44, %v725_v45  ;;  %1793 = vmatprep.subr.bf16.mxu0 %v3121_v49  ;;  %v3113_v62 = vcombine.low %v721_v44, %v725_v45  ;;  %1986 = vmatprep.subr.bf16.mxu1 %v3123_v56  ;;  %v718_v5 = vmax.bf16 %v3398_v36, %v590_v55  ;;  %v569_v12 = vld [vmem:[%s3524_s30 + $0xa8] sm:$0xff]  ;;  %v561_v24 = vld [vmem:[%s3524_s30 + $0x70] sm:$0xff]  ;;  %v562_v26 = vld [vmem:[%s3524_s30 + $0x78] sm:$0xff] }
  0xa6   : > { %1794 = vmatpush1.bf16.msra.mxu0 %v3120_v50  ;;  %1987 = vmatpush1.bf16.msra.mxu1 %v3122_v57  ;;  %v3107_v6 = vcombine.high %v713_v63, %v717_v0  ;;  %v705_v7 = vmax.bf16 %v3398_v36, %v577_v59  ;;  %v709_v8 = vmax.bf16 %v3398_v36, %v581_v60  ;;  %v573_v13 = vld [vmem:[%s3524_s30 + $0xc4] sm:$0xff]  ;;  %v565_v25 = vld [vmem:[%s3524_s30 + $0x8c] sm:$0xff]  ;;  %v566_v27 = vld [vmem:[%s3524_s30 + $0x94] sm:$0xff] }
  0xa7   : > { %1795 = vmatprep.subr.bf16.mxu0 %v3114_v58  ;;  %1988 = vmatprep.subr.bf16.mxu1 %v3116_v61  ;;  %v3109_v9 = vcombine.high %v714_v4, %v718_v5  ;;  %v706_v10 = vmax.bf16 %v3398_v36, %v578_v1  ;;  %v710_v11 = vmax.bf16 %v3398_v36, %v582_v2  ;;  %v553_v37 = vld [vmem:[%s3524_s30 + $0x38] sm:$0xff]  ;;  %v554_v39 = vld [vmem:[%s3524_s30 + $0x40] sm:$0xff]  ;;  %v546_v51 = vld [vmem:[%s3524_s30 + $0x8] sm:$0xff] }
  0xa8   : > { %v3106_v16 = vcombine.low %v713_v63, %v717_v0  ;;  %v3108_v17 = vcombine.low %v714_v4, %v718_v5  ;;  %v3100_v18 = vcombine.high %v705_v7, %v709_v8  ;;  %v697_v19 = vmax.bf16 %v3398_v36, %v569_v12  ;;  %v557_v38 = vld [vmem:[%s3524_s30 + $0x54] sm:$0xff]  ;;  %v558_v40 = vld [vmem:[%s3524_s30 + $0x5c] sm:$0xff]  ;;  %v550_v52 = vld [vmem:[%s3524_s30 + $0x24] sm:$0xff] }
  0xa9   : > { %v701_v20 = vmax.bf16 %v3398_v36, %v573_v13  ;;  %v3102_v21 = vcombine.high %v706_v10, %v710_v11  ;;  %v698_v22 = vmax.bf16 %v3398_v36, %v570_v14  ;;  %v702_v23 = vmax.bf16 %v3398_v36, %v574_v15  ;;  %v545_v46 = vld [vmem:[%s3524_s30] sm:$0xff]  ;;  %v666_v0 = vld [vmem:[%s3524_s30 + $0x350] sm:$0xff]  ;;  %v658_v12 = vld [vmem:[%s3524_s30 + $0x318] sm:$0xff] }
  0xaa   : > { %1796 = vmatpush1.bf16.msra.mxu0 %v3113_v62  ;;  %1989 = vmatpush1.bf16.msra.mxu1 %v3115_v3  ;;  %v3099_v28 = vcombine.low %v705_v7, %v709_v8  ;;  %v3101_v29 = vcombine.low %v706_v10, %v710_v11  ;;  %v689_v31 = vmax.bf16 %v3398_v36, %v561_v24  ;;  %v549_v50 = vld [vmem:[%s3524_s30 + $0x1c] sm:$0xff]  ;;  %v4520_v55 = vld [vmem:[%s3526_s3 + $0x4] ss:$8 sps:$4 sm:$0xff]   ;;  %v657_v10 = vld [vmem:[%s3524_s30 + $0x310] sm:$0xff] }
  0xab   : > { %1797 = vmatprep.subr.bf16.mxu0 %v3107_v6  ;;  %1990 = vmatprep.subr.bf16.mxu1 %v3109_v9  ;;  %v3093_v30 = vcombine.high %v697_v19, %v701_v20  ;;  %v693_v32 = vmax.bf16 %v3398_v36, %v565_v25  ;;  %v3095_v33 = vcombine.high %v698_v22, %v702_v23  ;;  %v665_v62 = vld [vmem:[%s3524_s30 + $0x348] sm:$0xff]  ;;  %v662_v13 = vld [vmem:[%s3524_s30 + $0x334] sm:$0xff]  ;;  %v650_v24 = vld [vmem:[%s3524_s30 + $0x2e0] sm:$0xff] }
  0xac   : > { %v690_v34 = vmax.bf16 %v3398_v36, %v562_v26  ;;  %v694_v35 = vmax.bf16 %v3398_v36, %v566_v27  ;;  %v3092_v41 = vcombine.low %v697_v19, %v701_v20  ;;  %v3094_v42 = vcombine.low %v698_v22, %v702_v23  ;;  %v669_v63 = vld [vmem:[%s3524_s30 + $0x364] sm:$0xff]  ;;  %v670_v1 = vld [vmem:[%s3524_s30 + $0x36c] sm:$0xff]  ;;  %1825 = vmatprep.mubr.bf16.mxu0 %v4520_v55  ;;  %v649_v19 = vld [vmem:[%s3524_s30 + $0x2d8] sm:$0xff] }
  0xad   : > { %v3086_v43 = vcombine.high %v689_v31, %v693_v32  ;;  %v681_v44 = vmax.bf16 %v3398_v36, %v553_v37  ;;  %v685_v45 = vmax.bf16 %v3398_v36, %v557_v38  ;;  %v682_v48 = vmax.bf16 %v3398_v36, %v554_v39  ;;  %v661_v11 = vld [vmem:[%s3524_s30 + $0x32c] sm:$0xff]  ;;  %2018 = vmatprep.mubr.bf16.mxu1 %v4520_v55  ;;  %v653_v23 = vld [vmem:[%s3524_s30 + $0x2f4] sm:$0xff]  ;;  %v654_v25 = vld [vmem:[%s3524_s30 + $0x2fc] sm:$0xff] }
  0xae   : > { %1798 = vmatpush1.bf16.msra.mxu0 %v3106_v16  ;;  %1991 = vmatpush1.bf16.msra.mxu1 %v3108_v17  ;;  %v3088_v47 = vcombine.high %v690_v34, %v694_v35  ;;  %v686_v49 = vmax.bf16 %v3398_v36, %v558_v40  ;;  %v3085_v53 = vcombine.low %v689_v31, %v693_v32  ;;  %v641_v31 = vld [vmem:[%s3524_s30 + $0x2a0] sm:$0xff]  ;;  %v642_v37 = vld [vmem:[%s3524_s30 + $0x2a8] sm:$0xff] }
  0xaf   : > { %1799 = vmatprep.subr.bf16.mxu0 %v3100_v18  ;;  %1992 = vmatprep.subr.bf16.mxu1 %v3102_v21  ;;  %v673_v54 = vmax.bf16 %v3398_v36, %v545_v46  ;;  %v3087_v56 = vcombine.low %v690_v34, %v694_v35  ;;  %v3079_v57 = vcombine.high %v681_v44, %v685_v45  ;;  %v645_v35 = vld [vmem:[%s3524_s30 + $0x2bc] sm:$0xff]  ;;  %v646_v38 = vld [vmem:[%s3524_s30 + $0x2c4] sm:$0xff] }
  0xb0   : > { %v677_v58 = vmax.bf16 %v3398_v36, %v549_v50  ;;  %v3081_v59 = vcombine.high %v682_v48, %v686_v49  ;;  %v674_v60 = vmax.bf16 %v3398_v36, %v546_v51  ;;  %v678_v61 = vmax.bf16 %v3398_v36, %v550_v52  ;;  %v638_v50 = vld [vmem:[%s3524_s30 + $0x28c] sm:$0xff] }
  0xb1   : > { %v3078_v2 = vcombine.low %v681_v44, %v685_v45  ;;  %v3080_v3 = vcombine.low %v682_v48, %v686_v49  ;;  %v793_v5 = vmax.bf16 %v3398_v36, %v665_v62  ;;  %v797_v6 = vmax.bf16 %v3398_v36, %v669_v63  ;;  %v637_v48 = vld [vmem:[%s3524_s30 + $0x284] sm:$0xff]  ;;  %v634_v49 = vld [vmem:[%s3524_s30 + $0x270] sm:$0xff]  ;;  %v626_v62 = vld [vmem:[%s3524_s30 + $0x238] sm:$0xff] }
  0xb2   : > { %1800 = vmatpush1.bf16.msra.mxu0 %v3099_v28  ;;  %1993 = vmatpush1.bf16.msra.mxu1 %v3101_v29  ;;  %v3072_v4 = vcombine.high %v673_v54, %v677_v58  ;;  %v3074_v7 = vcombine.high %v674_v60, %v678_v61  ;;  %v794_v8 = vmax.bf16 %v3398_v36, %v666_v0  ;;  %v630_v63 = vld [vmem:[%s3524_s30 + $0x254] sm:$0xff] }
  0xb3   : > { %1801 = vmatprep.subr.bf16.mxu0 %v3093_v30  ;;  %1994 = vmatprep.subr.bf16.mxu1 %v3095_v33  ;;  %v798_v9 = vmax.bf16 %v3398_v36, %v670_v1  ;;  %v3071_v14 = vcombine.low %v673_v54, %v677_v58  ;;  %v3073_v15 = vcombine.low %v674_v60, %v678_v61  ;;  %v625_v60 = vld [vmem:[%s3524_s30 + $0x230] sm:$0xff] }
  0xb4   : > { %v3177_v16 = vcombine.high %v793_v5, %v797_v6  ;;  %v785_v17 = vmax.bf16 %v3398_v36, %v657_v10  ;;  %v789_v18 = vmax.bf16 %v3398_v36, %v661_v11  ;;  %v786_v21 = vmax.bf16 %v3398_v36, %v658_v12  ;;  %v629_v61 = vld [vmem:[%s3524_s30 + $0x24c] sm:$0xff]  ;;  %v618_v10 = vld [vmem:[%s3524_s30 + $0x200] sm:$0xff] }
  0xb5   : > { %v3179_v20 = vcombine.high %v794_v8, %v798_v9  ;;  %v790_v22 = vmax.bf16 %v3398_v36, %v662_v13  ;;  %v3176_v26 = vcombine.low %v793_v5, %v797_v6  ;;  %v3178_v27 = vcombine.low %v794_v8, %v798_v9  ;;  %v617_v5 = vld [vmem:[%s3524_s30 + $0x1f8] sm:$0xff] }
  0xb6   : > { %1802 = vmatpush1.bf16.msra.mxu0 %v3092_v41  ;;  %1995 = vmatpush1.bf16.msra.mxu1 %v3094_v42  ;;  %v3170_v28 = vcombine.high %v785_v17, %v789_v18  ;;  %v777_v29 = vmax.bf16 %v3398_v36, %v649_v19  ;;  %v781_v30 = vmax.bf16 %v3398_v36, %v653_v23  ;;  %v621_v9 = vld [vmem:[%s3524_s30 + $0x214] sm:$0xff]  ;;  %v622_v11 = vld [vmem:[%s3524_s30 + $0x21c] sm:$0xff]  ;;  %v614_v23 = vld [vmem:[%s3524_s30 + $0x1e4] sm:$0xff] }
  0xb7   : > { %1803 = vmatprep.subr.bf16.mxu0 %v3086_v43  ;;  %1996 = vmatprep.subr.bf16.mxu1 %v3088_v47  ;;  %v3172_v32 = vcombine.high %v786_v21, %v790_v22  ;;  %v778_v33 = vmax.bf16 %v3398_v36, %v650_v24  ;;  %v782_v34 = vmax.bf16 %v3398_v36, %v654_v25  ;;  %v633_v47 = vld [vmem:[%s3524_s30 + $0x268] sm:$0xff] }
  0xb8   : > { %v3169_v39 = vcombine.low %v785_v17, %v789_v18  ;;  %v769_v40 = vmax.bf16 %v3398_v36, %v641_v31  ;;  %v3171_v41 = vcombine.low %v786_v21, %v790_v22  ;;  %v3163_v42 = vcombine.high %v777_v29, %v781_v30  ;;  %v613_v21 = vld [vmem:[%s3524_s30 + $0x1dc] sm:$0xff]  ;;  %v610_v22 = vld [vmem:[%s3524_s30 + $0x1c8] sm:$0xff] }
  0xb9   : > { %v773_v43 = vmax.bf16 %v3398_v36, %v645_v35  ;;  %v3165_v44 = vcombine.high %v778_v33, %v782_v34  ;;  %v770_v45 = vmax.bf16 %v3398_v36, %v642_v37  ;;  %v774_v46 = vmax.bf16 %v3398_v36, %v646_v38  ;;  %v672_v35 = vld [vmem:[%s3524_s30 + $0x37c] sm:$0xf] }
  0xba   : > { %1804 = vmatpush1.bf16.msra.mxu0 %v3085_v53  ;;  %1997 = vmatpush1.bf16.msra.mxu1 %v3087_v56  ;;  %v3162_v51 = vcombine.low %v777_v29, %v781_v30  ;;  %v3164_v52 = vcombine.low %v778_v33, %v782_v34  ;;  %v761_v54 = vmax.bf16 %v3398_v36, %v633_v47  ;;  %v607_v33 = vld [vmem:[%s3524_s30 + $0x1b4] sm:$0xff]  ;;  %v668_v34 = vld [vmem:[%s3524_s30 + $0x360] sm:$0xf] }
  0xbb   : > { %1805 = vmatprep.subr.bf16.mxu0 %v3079_v57  ;;  %1998 = vmatprep.subr.bf16.mxu1 %v3081_v59  ;;  %v3156_v53 = vcombine.high %v769_v40, %v773_v43  ;;  %v765_v56 = vmax.bf16 %v3398_v36, %v637_v48  ;;  %v3158_v57 = vcombine.high %v770_v45, %v774_v46  ;;  %v595_v47 = vld [vmem:[%s3524_s30 + $0x160] sm:$0xff] }
  0xbc   : > { %v762_v58 = vmax.bf16 %v3398_v36, %v634_v49  ;;  %v766_v59 = vmax.bf16 %v3398_v36, %v638_v50  ;;  %v3155_v0 = vcombine.low %v769_v40, %v773_v43  ;;  %v3157_v1 = vcombine.low %v770_v45, %v774_v46  ;;  %v604_v40 = vld [vmem:[%s3524_s30 + $0x1a0] sm:$0xf]  ;;  %v660_v49 = vld [vmem:[%s3524_s30 + $0x328] sm:$0xf] }
  0xbd   : > { %v758_v8 = vmax.bf16 %v3398_v36, %v630_v63  ;;  %v3148_v12 = vcombine.low %v761_v54, %v765_v56  ;;  %v746_v18 = vmax.bf16 %v3398_v36, %v618_v10  ;;  %v750_v19 = vmax.bf16 %v3398_v36, %v622_v11  ;;  %v599_v48 = vld [vmem:[%s3524_s30 + $0x17c] sm:$0xff]  ;;  %v591_v63 = vld [vmem:[%s3524_s30 + $0x144] sm:$0xff] }
  0xbe   : > { %1806 = vmatpush1.bf16.msra.mxu0 %v3078_v2  ;;  %1999 = vmatpush1.bf16.msra.mxu1 %v3080_v3  ;;  %v3149_v2 = vcombine.high %v761_v54, %v765_v56  ;;  %v753_v3 = vmax.bf16 %v3398_v36, %v625_v60  ;;  %v3151_v6 = vcombine.high %v762_v58, %v766_v59 }
  0xbf   : > { %1807 = vmatprep.subr.bf16.mxu0 %v3072_v4  ;;  %2000 = vmatprep.subr.bf16.mxu1 %v3074_v7  ;;  %v757_v4 = vmax.bf16 %v3398_v36, %v629_v61  ;;  %v754_v7 = vmax.bf16 %v3398_v36, %v626_v62  ;;  %v3150_v13 = vcombine.low %v762_v58, %v766_v59  ;;  %v600_v61 = vld [vmem:[%s3524_s30 + $0x184] sm:$0xf]  ;;  %v587_v62 = vld [vmem:[%s3524_s30 + $0x128] sm:$0xff] }
  0xc0   : > { %v3137_v29 = vcombine.high %v746_v18, %v750_v19  ;;  %v738_v30 = vmax.bf16 %v3398_v36, %v610_v22  ;;  %v742_v31 = vmax.bf16 %v3398_v36, %v614_v23  ;;  %v3136_v38 = vcombine.low %v746_v18, %v750_v19  ;;  %v588_v18 = vld [vmem:[%s3524_s30 + $0x130] sm:$0xf]  ;;  %v592_v19 = vld [vmem:[%s3524_s30 + $0x14c] sm:$0xf]  ;;  %v644_v22 = vld [vmem:[%s3524_s30 + $0x2b8] sm:$0xf] }
  0xc1   : > { %v3144_v17 = vcombine.high %v754_v7, %v758_v8  ;;  %v3141_v24 = vcombine.low %v753_v3, %v757_v4  ;;  %v3143_v25 = vcombine.low %v754_v7, %v758_v8  ;;  %v735_v43 = vmax.bf16 %v3398_v36, %v607_v33  ;;  %v4622_v8 = vld [vmem:[%s3526_s3 + $0x14] ss:$8 sps:$4 sm:$0xff]  }
  0xc2   : > { %1808 = vmatpush1.bf16.msra.mxu0 %v3071_v14  ;;  %2001 = vmatpush1.bf16.msra.mxu1 %v3073_v15  ;;  %v3142_v14 = vcombine.high %v753_v3, %v757_v4  ;;  %v745_v15 = vmax.bf16 %v3398_v36, %v617_v5  ;;  %v796_v45 = vmax.bf16 %v3398_v36, %v668_v34  ;;  %v652_v3 = vld [vmem:[%s3524_s30 + $0x2f0] sm:$0xf]  ;;  %v656_v4 = vld [vmem:[%s3524_s30 + $0x30c] sm:$0xf]  ;;  %v648_v23 = vld [vmem:[%s3524_s30 + $0x2d4] sm:$0xf] }
  0xc3   : > { %1809 = vmatprep.subr.bf16.mxu0 %v3177_v16  ;;  %2002 = vmatprep.subr.bf16.mxu1 %v3179_v20  ;;  %v749_v16 = vmax.bf16 %v3398_v36, %v621_v9  ;;  %v609_v20 = vld [vmem:[%s3524_s30 + $0x1c0] sm:$0xff]  ;;  %v800_v46 = vmax.bf16 %v3398_v36, %v672_v35  ;;  %v3129_v54 = vcombine.low %v738_v30, %v742_v31  ;;  %v580_v35 = vld [vmem:[%s3524_s30 + $0xf8] sm:$0xf] }
  0xc4   : > { %v723_v59 = vmax.bf16 %v3398_v36, %v595_v47  ;;  %v727_v60 = vmax.bf16 %v3398_v36, %v599_v48  ;;  %v728_v9 = vmax.bf16 %v3398_v36, %v600_v61  ;;  %v4626_v10 = vmax.bf16 %v3398_v36, %v587_v62  ;;  %v567_v47 = vld [vmem:[%s3524_s30 + $0x9c] sm:$0xff] }
  0xc5   : > { %v3134_v37 = vcombine.low %v745_v15, %v749_v16  ;;  %v3182_v58 = vcombine.low %v796_v45, %v800_v46  ;;  %v4629_v11 = vmax.bf16 %v3398_v36, %v591_v63  ;;  %v772_v33 = vmax.bf16 %v3398_v36, %v644_v22  ;;  %v563_v46 = vld [vmem:[%s3524_s30 + $0x80] sm:$0xff]  ;;  %v555_v63 = vld [vmem:[%s3524_s30 + $0x48] sm:$0xff] }
  0xc6   : > { %1810 = vmatpush2.bf16.msra.mxu0 %v3176_v26  ;;  %2003 = vmatpush2.bf16.msra.mxu1 %v3178_v27  ;;  %v3135_v26 = vcombine.high %v745_v15, %v749_v16  ;;  %v737_v27 = vmax.bf16 %v3398_v36, %v609_v20  ;;  %v780_v15 = vmax.bf16 %v3398_v36, %v652_v3 }
  0xc7   : > { %1811 = vmatprep.subr.bf16.mxu0 %v3170_v28  ;;  %2004 = vmatprep.subr.bf16.mxu1 %v3172_v32  ;;  %v741_v28 = vmax.bf16 %v3398_v36, %v613_v21  ;;  %v603_v32 = vld [vmem:[%s3524_s30 + $0x198] sm:$0xff]  ;;  %v784_v16 = vmax.bf16 %v3398_v36, %v656_v4  ;;  %v3117_v20 = vcombine.low %v723_v59, %v727_v60  ;;  %v4704_v4 = vld [vmem:[%s3526_s3 + $0x20] ss:$8 sps:$4 sm:$0xff]  }
  0xc8   : > { %v776_v34 = vmax.bf16 %v3398_v36, %v648_v23  ;;  %v708_v48 = vmax.bf16 %v3398_v36, %v580_v35  ;;  %v695_v61 = vmax.bf16 %v3398_v36, %v567_v47  ;;  %v667_v35 = vld [vmem:[%s3524_s30 + $0x358] sm:$0xff]  ;;  %v552_v47 = vld [vmem:[%s3524_s30 + $0x34] sm:$0xf] }
  0xc9   : > { %v3127_v50 = vcombine.low %v737_v27, %v741_v28 }
  0xca   : > { %1812 = vmatpush2.bf16.msra.mxu0 %v3169_v39  ;;  %2005 = vmatpush2.bf16.msra.mxu1 %v3171_v41  ;;  %v3128_v39 = vcombine.high %v737_v27, %v741_v28  ;;  %v608_v41 = vld [vmem:[%s3524_s30 + $0x1bc] sm:$0xf]  ;;  %v3168_v27 = vcombine.low %v780_v15, %v784_v16  ;;  %v716_v28 = vmax.bf16 %v3398_v36, %v588_v18  ;;  %v547_v18 = vld [vmem:[%s3524_s30 + $0x10] sm:$0xff] }
  0xcb   : > { %1813 = vmatprep.subr.bf16.mxu0 %v3163_v42  ;;  %2006 = vmatprep.subr.bf16.mxu1 %v3165_v44  ;;  %v731_v42 = vmax.bf16 %v3398_v36, %v603_v32  ;;  %v3130_v44 = vcombine.high %v738_v30, %v742_v31  ;;  %v571_v30 = vld [vmem:[%s3524_s30 + $0xb8] sm:$0xff]  ;;  %v683_v16 = vmax.bf16 %v3398_v36, %v555_v63 }
  0xcc   : > { %v575_v31 = vld [vmem:[%s3524_s30 + $0xd4] sm:$0xff] }
  0xcd   : > { %v3125_v56 = vcombine.high %v731_v42, %v735_v43  ;;  %v4656_v32 = vld [vmem:[%s3526_s3 + $0x10] ss:$8 sps:$4 sm:$0xff]  }
  0xce   : > { %1814 = vmatpush2.bf16.msra.mxu0 %v3162_v51  ;;  %2007 = vmatpush2.bf16.msra.mxu1 %v3164_v52  ;;  %v732_v51 = vmax.bf16 %v3398_v36, %v604_v40  ;;  %v736_v52 = vmax.bf16 %v3398_v36, %v608_v41  ;;  %v640_v40 = vld [vmem:[%s3524_s30 + $0x29c] sm:$0xf]  ;;  %v3110_v41 = vcombine.low %v4626_v10, %v4629_v11 }
  0xcf   : > { %1815 = vmatprep.subr.bf16.mxu0 %v3156_v53  ;;  %2008 = vmatprep.subr.bf16.mxu1 %v3158_v57  ;;  %v664_v53 = vld [vmem:[%s3524_s30 + $0x344] sm:$0xf]  ;;  %v596_v57 = vld [vmem:[%s3524_s30 + $0x168] sm:$0xf] }
  0xd0   : > { %v3126_v5 = vcombine.low %v732_v51, %v736_v52  ;;  %v724_v7 = vmax.bf16 %v3398_v36, %v596_v57  ;;  %v768_v52 = vmax.bf16 %v3398_v36, %v640_v40  ;;  %v628_v57 = vld [vmem:[%s3524_s30 + $0x248] sm:$0xf] }
  0xd2   : > { %1816 = vmatpush2.bf16.msra.mxu0 %v3155_v0  ;;  %2009 = vmatpush2.bf16.msra.mxu1 %v3157_v1  ;;  %v4614_v0 = vld [vmem:[%s3526_s3] ss:$8 sps:$4 sm:$0xff]   ;;  %v788_v1 = vmax.bf16 %v3398_v36, %v660_v49 }
  0xd3   : > { %1817 = vmatprep.subr.bf16.mxu0 %v3149_v2  ;;  %2010 = vmatprep.subr.bf16.mxu1 %v3151_v6  ;;  %v792_v2 = vmax.bf16 %v3398_v36, %v664_v53  ;;  %v3124_v6 = vcombine.low %v731_v42, %v735_v43  ;;  %v4670_v42 = vmax.bf16 %v3398_v36, %v571_v30  ;;  %v572_v53 = vld [vmem:[%s3524_s30 + $0xc0] sm:$0xf]  ;;  %v616_v30 = vld [vmem:[%s3524_s30 + $0x1f4] sm:$0xf] }
  0xd4   : > { %v4673_v43 = vmax.bf16 %v3398_v36, %v575_v31 }
  0xd6   : > { %1818 = vmatpush2.bf16.msra.mxu0 %v3148_v12  ;;  %2011 = vmatpush2.bf16.msra.mxu1 %v3150_v13  ;;  %v579_v12 = vld [vmem:[%s3524_s30 + $0xf0] sm:$0xff]  ;;  %v3118_v13 = vcombine.high %v723_v59, %v727_v60  ;;  %v3097_v59 = vcombine.high %v4670_v42, %v4673_v43  ;;  %v4696_v60 = vmax.bf16 %v3398_v36, %v563_v46  ;;  %v548_v46 = vld [vmem:[%s3524_s30 + $0x18] sm:$0xf] }
  0xd7   : > { %1819 = vmatprep.subr.bf16.mxu0 %v3142_v14  ;;  %2012 = vmatprep.subr.bf16.mxu1 %v3144_v17  ;;  %v583_v14 = vld [vmem:[%s3524_s30 + $0x10c] sm:$0xff]  ;;  %v3175_v17 = vcombine.low %v788_v1, %v792_v2  ;;  %v4640_v21 = vmax.bf16 %v3398_v36, %v579_v12  ;;  %v559_v1 = vld [vmem:[%s3524_s30 + $0x64] sm:$0xff]  ;;  %v700_v2 = vmax.bf16 %v3398_v36, %v572_v53 }
  0xd8   : > { %v620_v12 = vld [vmem:[%s3524_s30 + $0x210] sm:$0xf]  ;;  %v3090_v15 = vcombine.high %v4696_v60, %v695_v61  ;;  %v659_v53 = vld [vmem:[%s3524_s30 + $0x320] sm:$0xff] }
  0xda   : > { %1820 = vmatpush2.bf16.msra.mxu0 %v3141_v24  ;;  %2013 = vmatpush2.bf16.msra.mxu1 %v3143_v25  ;;  %v3119_v24 = vcombine.low %v724_v7, %v728_v9  ;;  %v3111_v25 = vcombine.high %v4626_v10, %v4629_v11  ;;  %v564_v9 = vld [vmem:[%s3524_s30 + $0x88] sm:$0xf]  ;;  %v568_v10 = vld [vmem:[%s3524_s30 + $0xa4] sm:$0xf]  ;;  %v4711_v11 = vld [vmem:[%s3526_s3 + $0x34] ss:$8 sps:$4 sm:$0xff]  }
  0xdb   : > { %1821 = vmatprep.subr.bf16.mxu0 %v3135_v26  ;;  %2014 = vmatprep.subr.bf16.mxu1 %v3137_v29  ;;  %v4648_v26 = vmax.bf16 %v3398_v36, %v583_v14  ;;  %v720_v29 = vmax.bf16 %v3398_v36, %v592_v19  ;;  %v3096_v14 = vcombine.low %v4670_v42, %v4673_v43  ;;  %v551_v19 = vld [vmem:[%s3524_s30 + $0x2c] sm:$0xff] }
  0xdc   : > { %v696_v22 = vmax.bf16 %v3398_v36, %v568_v10  ;;  %v4742_v42 = vld [vmem:[%s3526_s3 + $0x30] ss:$8 sps:$4 sm:$0xff]  }
  0xdd   : > { %v3112_v45 = vcombine.low %v716_v28, %v720_v29  ;;  %v3089_v28 = vcombine.low %v4696_v60, %v695_v61  ;;  %v612_v29 = vld [vmem:[%s3524_s30 + $0x1d8] sm:$0xf]  ;;  %v787_v61 = vmax.bf16 %v3398_v36, %v659_v53  ;;  %v4821_v53 = vld [vmem:[%s3526_s3 + $0x84] ss:$8 sps:$4 sm:$0xff]  }
  0xde   : > { %1822 = vmatpush2.bf16.msra.mxu0 %v3134_v37  ;;  %2015 = vmatpush2.bf16.msra.mxu1 %v3136_v38  ;;  %v584_v37 = vld [vmem:[%s3524_s30 + $0x114] sm:$0xf]  ;;  %v4663_v38 = vld [vmem:[%s3526_s3 + $0x24] ss:$8 sps:$4 sm:$0xff]  }
  0xdf   : > { %1823 = vmatprep.subr.bf16.mxu0 %v3128_v39  ;;  %2016 = vmatprep.subr.bf16.mxu1 %v3130_v44  ;;  %v636_v39 = vld [vmem:[%s3524_s30 + $0x280] sm:$0xf]  ;;  %v3104_v44 = vcombine.high %v4640_v21, %v4648_v26  ;;  %v712_v49 = vmax.bf16 %v3398_v36, %v584_v37  ;;  %v671_v37 = vld [vmem:[%s3524_s30 + $0x374] sm:$0xff] }
  0xe0   : > { %v764_v51 = vmax.bf16 %v3398_v36, %v636_v39 }
  0xe1   : > { %v3105_v62 = vcombine.low %v708_v48, %v712_v49  ;;  %v4749_v48 = vld [vmem:[%s3526_s3 + $0x44] ss:$8 sps:$4 sm:$0xff]  }
  0xe2   : > { %1824 = vmatpush2.bf16.msra.mxu0 %v3127_v50  ;;  %2017 = vmatpush2.bf16.msra.mxu1 %v3129_v54  ;;  %v3161_v50 = vcombine.low %v772_v33, %v776_v34  ;;  %v576_v54 = vld [vmem:[%s3524_s30 + $0xdc] sm:$0xf]  ;;  %v675_v33 = vmax.bf16 %v3398_v36, %v547_v18  ;;  %v679_v34 = vmax.bf16 %v3398_v36, %v551_v19  ;;  %v4782_v19 = vld [vmem:[%s3526_s3 + $0x50] ss:$8 sps:$4 sm:$0xff]  }
  0xe3   : > { %2179 = vmatprep.subr.bf16.mxu0 %v3125_v56  ;;  %3186 = vmatprep.subr.bf16.mxu1 %v3182_v58  ;;  %v3103_v56 = vcombine.low %v4640_v21, %v4648_v26  ;;  %v632_v58 = vld [vmem:[%s3524_s30 + $0x264] sm:$0xf]  ;;  %v704_v3 = vmax.bf16 %v3398_v36, %v576_v54  ;;  %v692_v21 = vmax.bf16 %v3398_v36, %v564_v9  ;;  %v556_v26 = vld [vmem:[%s3524_s30 + $0x50] sm:$0xf] }
  0xe4   : > { %v760_v7 = vmax.bf16 %v3398_v36, %v632_v58  ;;  %v684_v40 = vmax.bf16 %v3398_v36, %v556_v26  ;;  %v663_v58 = vld [vmem:[%s3524_s30 + $0x33c] sm:$0xff]  ;;  %v3075_v60 = vcombine.low %v675_v33, %v679_v34 }
  0xe5   : > { %1826 = vmatmul.mubr.bf16.vlgmr.msra.gmra.mxu0 %v4614_v0  ;;  %2019 = vmatmul.mubr.bf16.vlgmr.msra.gmra.mxu1 %v4614_v0  ;;  %v3091_v39 = vcombine.low %v692_v21, %v696_v22  ;;  %v791_v63 = vmax.bf16 %v3398_v36, %v663_v58  ;;  %v639_v21 = vld [vmem:[%s3524_s30 + $0x294] sm:$0xff]  ;;  %v4787_v22 = vld [vmem:[%s3526_s3 + $0x64] ss:$8 sps:$4 sm:$0xff]  }
  0xe6   : > { %2180 = vmatpush1.bf16.msra.mxu0 %v3124_v6  ;;  %3187 = vmatpush3.bf16.msra.mxu1 %v3126_v5  ;;  %v3154_v5 = vcombine.low %v764_v51, %v768_v52  ;;  %v756_v6 = vmax.bf16 %v3398_v36, %v628_v57  ;;  %v795_v51 = vmax.bf16 %v3398_v36, %v667_v35  ;;  %v619_v35 = vld [vmem:[%s3524_s30 + $0x208] sm:$0xff]  ;;  %v4831_v58 = vld [vmem:[%s3526_s3 + $0x94] ss:$8 sps:$4 sm:$0xff]  }
  0xe7   : > { %1835 = vmatprep.mubr.bf16.mxu0 %v4622_v8  ;;  %2028 = vmatprep.mubr.bf16.mxu1 %v4622_v8  ;;  %v799_v52 = vmax.bf16 %v3398_v36, %v671_v37  ;;  %v680_v57 = vmax.bf16 %v3398_v36, %v552_v47  ;;  %v3174_v9 = vcombine.high %v787_v61, %v791_v63  ;;  %v623_v37 = vld [vmem:[%s3524_s30 + $0x224] sm:$0xff] }
  0xe8   : > { %2181 = vmatprep.subr.bf16.mxu0 %v3118_v13  ;;  %3188 = vmatprep.subr.bf16.mxu1 %v3175_v17  ;;  %v624_v13 = vld [vmem:[%s3524_s30 + $0x22c] sm:$0xf]  ;;  %v687_v17 = vmax.bf16 %v3398_v36, %v559_v1  ;;  %v3147_v23 = vcombine.low %v756_v6, %v760_v7  ;;  %v4769_v6 = vld [vmem:[%s3526_s3 + $0x54] ss:$8 sps:$4 sm:$0xff]   ;;  %v767_v26 = vmax.bf16 %v3398_v36, %v639_v21 }
  0xe9   : > { %v3180_v7 = vcombine.low %v795_v51, %v799_v52  ;;  %v811_v21 = vld [vmem:[%s6354_s2 + $0x50] sm:$0xff] }
  0xea   : > { %2182 = vmatpush1.bf16.msra.mxu0 %v3117_v20  ;;  %3189 = vmatpush3.bf16.msra.mxu1 %v3119_v24  ;;  %v3098_v20 = vcombine.low %v700_v2, %v704_v3  ;;  %v748_v24 = vmax.bf16 %v3398_v36, %v620_v12  ;;  %v3083_v31 = vcombine.high %v683_v16, %v687_v17  ;;  %v4764_v2 = vld [vmem:[%s3526_s3 + $0x40] ss:$8 sps:$4 sm:$0xff]  }
  0xeb   : > { %2183 = vmatprep.subr.bf16.mxu0 %v3111_v25  ;;  %3190 = vmatprep.subr.bf16.mxu1 %v3168_v27  ;;  %v752_v25 = vmax.bf16 %v3398_v36, %v624_v13  ;;  %v560_v27 = vld [vmem:[%s3524_s30 + $0x6c] sm:$0xf]  ;;  %v3082_v49 = vcombine.low %v683_v16, %v687_v17  ;;  %v643_v13 = vld [vmem:[%s3524_s30 + $0x2b0] sm:$0xff] }
  0xec   : > { %v651_v3 = vld [vmem:[%s3524_s30 + $0x2e8] sm:$0xff]  ;;  %v771_v17 = vmax.bf16 %v3398_v36, %v643_v13  ;;  %v4898_v13 = vld [vmem:[%s3526_s3 + $0xf0] ss:$8 sps:$4 sm:$0xff]  }
  0xed   : > { %1836 = vmatmul.mubr.bf16.gmra.mxu0 %v4656_v32  ;;  %2029 = vmatmul.mubr.bf16.gmra.mxu1 %v4656_v32  ;;  %v3140_v43 = vcombine.low %v748_v24, %v752_v25  ;;  %v779_v10 = vmax.bf16 %v3398_v36, %v651_v3  ;;  %v4868_v3 = vld [vmem:[%s3526_s3 + $0xc0] ss:$8 sps:$4 sm:$0xff]  }
  0xee   : > { %1845 = vmatprep.mubr.bf16.mxu0 %v4663_v38  ;;  %2038 = vmatprep.mubr.bf16.mxu1 %v4663_v38 }
  0xef   : > { %2184 = vmatpush1.bf16.msra.mxu0 %v3110_v41  ;;  %3191 = vmatpush3.bf16.msra.mxu1 %v3112_v45  ;;  %v688_v41 = vmax.bf16 %v3398_v36, %v560_v27  ;;  %v744_v45 = vmax.bf16 %v3398_v36, %v616_v30  ;;  %v627_v27 = vld [vmem:[%s3524_s30 + $0x240] sm:$0xff] }
  0xf0   : > { %2185 = vmatprep.subr.bf16.mxu0 %v3104_v44  ;;  %3192 = vmatprep.subr.bf16.mxu1 %v3161_v50  ;;  %v740_v44 = vmax.bf16 %v3398_v36, %v612_v29  ;;  %v3076_v50 = vcombine.high %v675_v33, %v679_v34  ;;  %v4800_v34 = vld [vmem:[%s3526_s3 + $0x60] ss:$8 sps:$4 sm:$0xff]  }
  0xf1   : > { %v3084_v54 = vcombine.low %v684_v40, %v688_v41 }
  0xf3   : > { %2186 = vmatpush1.bf16.msra.mxu0 %v3103_v56  ;;  %3193 = vmatpush3.bf16.msra.mxu1 %v3105_v62  ;;  %v676_v56 = vmax.bf16 %v3398_v36, %v548_v46  ;;  %v3181_v62 = vcombine.high %v795_v51, %v799_v52  ;;  %v615_v46 = vld [vmem:[%s3524_s30 + $0x1ec] sm:$0xff] }
  0xf4   : > { %2187 = vmatprep.subr.bf16.mxu0 %v3097_v59  ;;  %3194 = vmatprep.subr.bf16.mxu1 %v3154_v5  ;;  %v3133_v59 = vcombine.low %v740_v44, %v744_v45  ;;  %v655_v5 = vld [vmem:[%s3524_s30 + $0x304] sm:$0xff]  ;;  %v751_v44 = vmax.bf16 %v3398_v36, %v623_v37  ;;  %v611_v45 = vld [vmem:[%s3524_s30 + $0x1d0] sm:$0xff]  ;;  %v743_v51 = vmax.bf16 %v3398_v36, %v615_v46 }
  0xf5   : > { %1846 = vmatmul.mubr.bf16.gmra.mxu0 %v4704_v4  ;;  %2039 = vmatmul.mubr.bf16.gmra.mxu1 %v4704_v4  ;;  %v3077_v1 = vcombine.low %v676_v56, %v680_v57  ;;  %v783_v12 = vmax.bf16 %v3398_v36, %v655_v5  ;;  %v4818_v52 = vld [vmem:[%s3526_s3 + $0x70] ss:$8 sps:$4 sm:$0xff]   ;;  %v4828_v57 = vld [vmem:[%s3526_s3 + $0x80] ss:$8 sps:$4 sm:$0xff]   ;;  %v4871_v5 = vld [vmem:[%s3526_s3 + $0xd4] ss:$8 sps:$4 sm:$0xff]  }
  0xf6   : > { %1855 = vmatprep.mubr.bf16.mxu0 %v4711_v11  ;;  %2048 = vmatprep.mubr.bf16.mxu1 %v4711_v11  ;;  %v823_v46 = vld [vmem:[%s6354_s2 + $0xb0] sm:$0xff] }
  0xf7   : > { %2188 = vmatpush1.bf16.msra.mxu0 %v3096_v14  ;;  %3195 = vmatpush3.bf16.msra.mxu1 %v3098_v20  ;;  %v647_v14 = vld [vmem:[%s3524_s30 + $0x2cc] sm:$0xff]  ;;  %v3167_v16 = vcombine.high %v779_v10, %v783_v12  ;;  %v635_v20 = vld [vmem:[%s3524_s30 + $0x278] sm:$0xff] }
  0xf8   : > { %2189 = vmatprep.subr.bf16.mxu0 %v3090_v15  ;;  %3196 = vmatprep.subr.bf16.mxu1 %v3147_v23  ;;  %v3173_v15 = vcombine.low %v787_v61, %v791_v63  ;;  %v775_v18 = vmax.bf16 %v3398_v36, %v647_v14  ;;  %v3166_v23 = vcombine.low %v779_v10, %v783_v12  ;;  %v4848_v61 = vld [vmem:[%s3526_s3 + $0xa0] ss:$8 sps:$4 sm:$0xff]   ;;  %v4858_v63 = vld [vmem:[%s3526_s3 + $0xb0] ss:$8 sps:$4 sm:$0xff]   ;;  %v4891_v12 = vld [vmem:[%s3526_s3 + $0xf4] ss:$8 sps:$4 sm:$0xff]  }
  0xf9   : > { %v763_v25 = vmax.bf16 %v3398_v36, %v635_v20  ;;  %v4888_v10 = vld [vmem:[%s3526_s3 + $0xe0] ss:$8 sps:$4 sm:$0xff]  }
  0xfa   : > { %v3160_v24 = vcombine.high %v771_v17, %v775_v18  ;;  %v3159_v29 = vcombine.low %v771_v17, %v775_v18  ;;  %v809_v18 = vld [vmem:[%s6354_s2 + $0x40] sm:$0xff] }
  0xfb   : > { %2190 = vmatpush1.bf16.msra.mxu0 %v3089_v28  ;;  %3197 = vmatpush3.bf16.msra.mxu1 %v3091_v39  ;;  %v631_v28 = vld [vmem:[%s3524_s30 + $0x25c] sm:$0xff]  ;;  %v3153_v30 = vcombine.high %v763_v25, %v767_v26  ;;  %v3152_v40 = vcombine.low %v763_v25, %v767_v26 }
  0xfc   : > { %2191 = vmatprep.subr.bf16.mxu0 %v3083_v31  ;;  %3198 = vmatprep.subr.bf16.mxu1 %v3140_v43  ;;  %v755_v31 = vmax.bf16 %v3398_v36, %v627_v27  ;;  %v759_v33 = vmax.bf16 %v3398_v36, %v631_v28  ;;  %v4805_v39 = vld [vmem:[%s3526_s3 + $0x74] ss:$8 sps:$4 sm:$0xff]   ;;  %v747_v43 = vmax.bf16 %v3398_v36, %v619_v35  ;;  %v817_v27 = vld [vmem:[%s6354_s2 + $0x80] sm:$0xff] }
  0xfd   : > { %1856 = vmatmul.mubr.bf16.gmra.mxu0 %v4742_v42  ;;  %2049 = vmatmul.mubr.bf16.gmra.mxu1 %v4742_v42 }
  0xfe   : > { %1865 = vmatprep.mubr.bf16.mxu0 %v4749_v48  ;;  %2058 = vmatprep.mubr.bf16.mxu1 %v4749_v48  ;;  %v3146_v41 = vcombine.high %v755_v31, %v759_v33  ;;  %v3145_v47 = vcombine.low %v755_v31, %v759_v33 }
  0xff   : > { %2192 = vmatpush1.bf16.msra.mxu0 %v3082_v49  ;;  %3199 = vmatpush3.bf16.msra.mxu1 %v3084_v54  ;;  %v3139_v49 = vcombine.high %v747_v43, %v751_v44  ;;  %v3138_v54 = vcombine.low %v747_v43, %v751_v44  ;;  %v824_v43 = vld [vmem:[%s6354_s2 + $0xb8] sm:$0xff] }
 0x100   : > { %2193 = vmatprep.subr.bf16.mxu0 %v3076_v50  ;;  %3200 = vmatprep.subr.bf16.mxu1 %v3133_v59  ;;  %v739_v50 = vmax.bf16 %v3398_v36, %v611_v45  ;;  %v4838_v59 = vld [vmem:[%s3526_s3 + $0x90] ss:$8 sps:$4 sm:$0xff]  }
 0x102   : > { %v3132_v56 = vcombine.high %v739_v50, %v743_v51  ;;  %v3131_v36 = vcombine.low %v739_v50, %v743_v51  ;;  %v825_v50 = vld [vmem:[%s6354_s2 + $0xc0] sm:$0xff] }
 0x103   : > { %2194 = vmatpush1.bf16.msra.mxu0 %v3075_v60  ;;  %3201 = vmatpush3.bf16.msra.mxu1 %v3077_v1  ;;  %v4841_v60 = vld [vmem:[%s3526_s3 + $0xa4] ss:$8 sps:$4 sm:$0xff]  }
 0x104   : > { %2195 = vmatprep.subr.bf16.mxu0 %v3181_v62  ;;  %v4851_v62 = vld [vmem:[%s3526_s3 + $0xb4] ss:$8 sps:$4 sm:$0xff]   ;;  %v4861_v1 = vld [vmem:[%s3526_s3 + $0xc4] ss:$8 sps:$4 sm:$0xff]  }
 0x105   : > { %1866 = vmatmul.mubr.bf16.gmra.mxu0 %v4764_v2  ;;  %2059 = vmatmul.mubr.bf16.gmra.mxu1 %v4764_v2 }
 0x106   : > { %1875 = vmatprep.mubr.bf16.mxu0 %v4769_v6  ;;  %2068 = vmatprep.mubr.bf16.mxu1 %v4769_v6 }
 0x107   : > { %2196 = vmatpush2.bf16.msra.mxu0 %v3180_v7  ;;  %v4878_v7 = vld [vmem:[%s3526_s3 + $0xd0] ss:$8 sps:$4 sm:$0xff]  }
 0x108   : > { %2197 = vmatprep.subr.bf16.mxu0 %v3174_v9  ;;  %v4881_v9 = vld [vmem:[%s3526_s3 + $0xe4] ss:$8 sps:$4 sm:$0xff]  }
 0x10b   : > { %2198 = vmatpush2.bf16.msra.mxu0 %v3173_v15  ;;  %v810_v15 = vld [vmem:[%s6354_s2 + $0x48] sm:$0xff] }
 0x10c   : > { %2199 = vmatprep.subr.bf16.mxu0 %v3167_v16 }
 0x10d   : > { %1876 = vmatmul.mubr.bf16.gmra.mxu0 %v4782_v19  ;;  %2069 = vmatmul.mubr.bf16.gmra.mxu1 %v4782_v19 }
 0x10e   : > { %1885 = vmatprep.mubr.bf16.mxu0 %v4787_v22  ;;  %2078 = vmatprep.mubr.bf16.mxu1 %v4787_v22 }
 0x10f   : > { %2200 = vmatpush2.bf16.msra.mxu0 %v3166_v23 }
 0x110   : > { %2201 = vmatprep.subr.bf16.mxu0 %v3160_v24  ;;  %v815_v24 = vld [vmem:[%s6354_s2 + $0x70] sm:$0xff] }
 0x113   : > { %2202 = vmatpush2.bf16.msra.mxu0 %v3159_v29 }
 0x114   : > { %2203 = vmatprep.subr.bf16.mxu0 %v3153_v30  ;;  %v816_v30 = vld [vmem:[%s6354_s2 + $0x78] sm:$0xff] }
 0x115   : > { %1886 = vmatmul.mubr.bf16.gmra.mxu0 %v4800_v34  ;;  %2079 = vmatmul.mubr.bf16.gmra.mxu1 %v4800_v34 }
 0x116   : > { %1895 = vmatprep.mubr.bf16.mxu0 %v4805_v39  ;;  %2088 = vmatprep.mubr.bf16.mxu1 %v4805_v39 }
 0x117   : > { %2204 = vmatpush2.bf16.msra.mxu0 %v3152_v40 }
 0x118   : > { %2205 = vmatprep.subr.bf16.mxu0 %v3146_v41 }
 0x11b   : > { %2206 = vmatpush2.bf16.msra.mxu0 %v3145_v47 }
 0x11c   : > { %2207 = vmatprep.subr.bf16.mxu0 %v3139_v49 }
 0x11d   : > { %1896 = vmatmul.mubr.bf16.gmra.mxu0 %v4818_v52  ;;  %2089 = vmatmul.mubr.bf16.gmra.mxu1 %v4818_v52 }
 0x11e   : > { %1905 = vmatprep.mubr.bf16.mxu0 %v4821_v53  ;;  %2098 = vmatprep.mubr.bf16.mxu1 %v4821_v53 }
 0x11f   : > { %2208 = vmatpush2.bf16.msra.mxu0 %v3138_v54 }
 0x120   : > { %2209 = vmatprep.subr.bf16.mxu0 %v3132_v56 }
 0x123   : > { %2210 = vmatpush2.bf16.msra.mxu0 %v3131_v36  ;;  %v831_v36 = vld [vmem:[%s6354_s2 + $0xf0] sm:$0xff] }
 0x125   : > { %1906 = vmatmul.mubr.bf16.gmra.mxu0 %v4828_v57  ;;  %2099 = vmatmul.mubr.bf16.gmra.mxu1 %v4828_v57 }
 0x126   : > { %1915 = vmatprep.mubr.bf16.mxu0 %v4831_v58  ;;  %2108 = vmatprep.mubr.bf16.mxu1 %v4831_v58 }
 0x12d   : > { %1916 = vmatmul.mubr.bf16.gmra.mxu0 %v4838_v59  ;;  %2109 = vmatmul.mubr.bf16.gmra.mxu1 %v4838_v59 }
 0x12e   : > { %1925 = vmatprep.mubr.bf16.mxu0 %v4841_v60  ;;  %2118 = vmatprep.mubr.bf16.mxu1 %v4841_v60 }
 0x135   : > { %1926 = vmatmul.mubr.bf16.gmra.mxu0 %v4848_v61  ;;  %2119 = vmatmul.mubr.bf16.gmra.mxu1 %v4848_v61 }
 0x136   : > { %1935 = vmatprep.mubr.bf16.mxu0 %v4851_v62  ;;  %2128 = vmatprep.mubr.bf16.mxu1 %v4851_v62 }
 0x13d   : > { %1936 = vmatmul.mubr.bf16.gmra.mxu0 %v4858_v63  ;;  %2129 = vmatmul.mubr.bf16.gmra.mxu1 %v4858_v63 }
 0x13e   : > { %1945 = vmatprep.mubr.bf16.mxu0 %v4861_v1  ;;  %2138 = vmatprep.mubr.bf16.mxu1 %v4861_v1 }
 0x145   : > { %1946 = vmatmul.mubr.bf16.gmra.mxu0 %v4868_v3  ;;  %2139 = vmatmul.mubr.bf16.gmra.mxu1 %v4868_v3 }
 0x146   : > { %1955 = vmatprep.mubr.bf16.mxu0 %v4871_v5  ;;  %2148 = vmatprep.mubr.bf16.mxu1 %v4871_v5 }
 0x14d   : > { %1956 = vmatmul.mubr.bf16.gmra.mxu0 %v4878_v7  ;;  %2149 = vmatmul.mubr.bf16.gmra.mxu1 %v4878_v7 }
 0x14e   : > { %1965 = vmatprep.mubr.bf16.mxu0 %v4881_v9  ;;  %2158 = vmatprep.mubr.bf16.mxu1 %v4881_v9 }
 0x155   : > { %1966 = vmatmul.mubr.bf16.gmra.mxu0 %v4888_v10  ;;  %2159 = vmatmul.mubr.bf16.gmra.mxu1 %v4888_v10 }
 0x156   : > { %1975 = vmatprep.mubr.bf16.mxu0 %v4891_v12  ;;  %2168 = vmatprep.mubr.bf16.mxu1 %v4891_v12 }
 0x15d   : > { %1976 = vmatmul.mubr.bf16.gmra.mxu0 %v4898_v13  ;;  %2169 = vmatmul.mubr.bf16.gmra.mxu1 %v4898_v13 }
 0x15e   : > { %2211 = vmatprep.mubr.bf16.mxu0 %v4520_v55  ;;  %2404 = vmatprep.mubr.bf16.mxu1 %v4520_v55  ;;  %v801_v55 = vld [vmem:[%s6354_s2] sm:$0xff] }
 0x165   : > { %2212 = vmatmul.mubr.bf16.vlgmr.msra.gmra.mxu0 %v4614_v0  ;;  %2405 = vmatmul.mubr.bf16.vlgmr.msra.gmra.mxu1 %v4614_v0  ;;  %v803_v0 = vld [vmem:[%s6354_s2 + $0x10] sm:$0xff] }
 0x166   : > { %2221 = vmatprep.mubr.bf16.mxu0 %v4622_v8  ;;  %2412 = vmatprep.mubr.bf16.mxu1 %v4622_v8 }
 0x16d   : > { %2222 = vmatmul.mubr.bf16.gmra.mxu0 %v4656_v32  ;;  %2413 = vmatmul.mubr.bf16.gmra.mxu1 %v4656_v32  ;;  %v802_v32 = vld [vmem:[%s6354_s2 + $0x8] sm:$0xff] }
 0x16e   : > { %2231 = vmatprep.mubr.bf16.mxu0 %v4663_v38  ;;  %2420 = vmatprep.mubr.bf16.mxu1 %v4663_v38 }
 0x175   : > { %2232 = vmatmul.mubr.bf16.gmra.mxu0 %v4704_v4  ;;  %2421 = vmatmul.mubr.bf16.gmra.mxu1 %v4704_v4 }
 0x176   : > { %2241 = vmatprep.mubr.bf16.mxu0 %v4711_v11  ;;  %2428 = vmatprep.mubr.bf16.mxu1 %v4711_v11  ;;  %v804_v11 = vld [vmem:[%s6354_s2 + $0x18] sm:$0xff] }
 0x17d   : > { %2242 = vmatmul.mubr.bf16.gmra.mxu0 %v4742_v42  ;;  %2429 = vmatmul.mubr.bf16.gmra.mxu1 %v4742_v42 }
 0x17e   : > { %2251 = vmatprep.mubr.bf16.mxu0 %v4749_v48  ;;  %2436 = vmatprep.mubr.bf16.mxu1 %v4749_v48 }
 0x185   : > { %2252 = vmatmul.mubr.bf16.gmra.mxu0 %v4764_v2  ;;  %2437 = vmatmul.mubr.bf16.gmra.mxu1 %v4764_v2  ;;  %v808_v2 = vld [vmem:[%s6354_s2 + $0x38] sm:$0xff] }
 0x186   : > { %2261 = vmatprep.mubr.bf16.mxu0 %v4769_v6  ;;  %2444 = vmatprep.mubr.bf16.mxu1 %v4769_v6 }
 0x18d   : > { %2262 = vmatmul.mubr.bf16.gmra.mxu0 %v4782_v19  ;;  %2445 = vmatmul.mubr.bf16.gmra.mxu1 %v4782_v19 }
 0x18e   : > { %2271 = vmatprep.mubr.bf16.mxu0 %v4787_v22  ;;  %2452 = vmatprep.mubr.bf16.mxu1 %v4787_v22 }
 0x195   : > { %2272 = vmatmul.mubr.bf16.gmra.mxu0 %v4800_v34  ;;  %2453 = vmatmul.mubr.bf16.gmra.mxu1 %v4800_v34  ;;  %v818_v34 = vld [vmem:[%s6354_s2 + $0x88] sm:$0xff] }
 0x196   : > { %2281 = vmatprep.mubr.bf16.mxu0 %v4805_v39  ;;  %2460 = vmatprep.mubr.bf16.mxu1 %v4805_v39  ;;  %v822_v39 = vld [vmem:[%s6354_s2 + $0xa8] sm:$0xff] }
 0x19d   : > { %2282 = vmatmul.mubr.bf16.gmra.mxu0 %v4818_v52  ;;  %2461 = vmatmul.mubr.bf16.gmra.mxu1 %v4818_v52 }
 0x19e   : > { %2291 = vmatprep.mubr.bf16.mxu0 %v4821_v53  ;;  %2468 = vmatprep.mubr.bf16.mxu1 %v4821_v53  ;;  %v829_v53 = vld [vmem:[%s6354_s2 + $0xe0] sm:$0xff] }
 0x1a5   : > { %v1827_v8 = vpop.f32.mrf.mxu0  ;;  %2292 = vmatmul.mubr.bf16.gmra.mxu0 %v4828_v57  ;;  %v2020_v4 = vpop.f32.mrf.mxu1  ;;  %2469 = vmatmul.mubr.bf16.gmra.mxu1 %v4828_v57 }
 0x1a6   : > { %v2533_v38 = vadd.f32 %v1827_v8, %v801_v55  ;;  %2301 = vmatprep.mubr.bf16.mxu0 %v4831_v58  ;;  %v2535_v42 = vadd.f32 %v2020_v4, %v803_v0  ;;  %2476 = vmatprep.mubr.bf16.mxu1 %v4831_v58  ;;  %v832_v0 = vld [vmem:[%s6354_s2 + $0xf8] sm:$0xff] }
 0x1a7   : > { %v1829_v48 = vpop.f32.mrf.mxu0  ;;  %v2022_v14 = vpop.f32.mrf.mxu1 }
 0x1a8   : > { %2757 = vst [vmem:[%s6354_s2] sm:$0xff] %v2533_v38  ;;  %v2534_v6 = vadd.f32 %v1829_v48, %v802_v32  ;;  %2759 = vst [vmem:[%s6354_s2 + $0x10] sm:$0xff] %v2535_v42  ;;  %v2536_v16 = vadd.f32 %v2022_v14, %v804_v11  ;;  %v836_v38 = vld [vmem:[%s6354_s2 + $0x118] sm:$0xff]  ;;  %v838_v11 = vld [vmem:[%s6354_s2 + $0x128] sm:$0xff] }
 0x1a9   : > { %v1831_v17 = vpop.f32.mrf.mxu0  ;;  %v2024_v20 = vpop.f32.mrf.mxu1  ;;  %v839_v14 = vld [vmem:[%s6354_s2 + $0x130] sm:$0xff] }
 0x1aa   : > { %2758 = vst [vmem:[%s6354_s2 + $0x8] sm:$0xff] %v2534_v6  ;;  %v2540_v19 = vadd.f32 %v1831_v17, %v808_v2  ;;  %2760 = vst [vmem:[%s6354_s2 + $0x18] sm:$0xff] %v2536_v16  ;;  %v2542_v22 = vadd.f32 %v2024_v20, %v810_v15  ;;  %v843_v17 = vld [vmem:[%s6354_s2 + $0x150] sm:$0xff]  ;;  %v845_v20 = vld [vmem:[%s6354_s2 + $0x160] sm:$0xff] }
 0x1ab   : > { %v1833_v23 = vpop.f32.mrf.mxu0  ;;  %v2026_v26 = vpop.f32.mrf.mxu1 }
 0x1ac   : > { %2765 = vst [vmem:[%s6354_s2 + $0x38] sm:$0xff] %v2540_v19  ;;  %v2541_v25 = vadd.f32 %v1833_v23, %v809_v18  ;;  %2767 = vst [vmem:[%s6354_s2 + $0x48] sm:$0xff] %v2542_v22  ;;  %v2543_v28 = vadd.f32 %v2026_v26, %v811_v21  ;;  %v844_v23 = vld [vmem:[%s6354_s2 + $0x158] sm:$0xff]  ;;  %v846_v26 = vld [vmem:[%s6354_s2 + $0x168] sm:$0xff] }
 0x1ad   : > { %v1837_v29 = vpop.f32.mrf.mxu0  ;;  %2302 = vmatmul.mubr.bf16.gmra.mxu0 %v4838_v59  ;;  %v2030_v33 = vpop.f32.mrf.mxu1  ;;  %2477 = vmatmul.mubr.bf16.gmra.mxu1 %v4838_v59  ;;  %v830_v59 = vld [vmem:[%s6354_s2 + $0xe8] sm:$0xff] }
 0x1ae   : > { %2766 = vst [vmem:[%s6354_s2 + $0x40] sm:$0xff] %v2541_v25  ;;  %v2547_v31 = vadd.f32 %v1837_v29, %v815_v24  ;;  %2311 = vmatprep.mubr.bf16.mxu0 %v4841_v60  ;;  %2768 = vst [vmem:[%s6354_s2 + $0x50] sm:$0xff] %v2543_v28  ;;  %v2549_v35 = vadd.f32 %v2030_v33, %v817_v27  ;;  %2484 = vmatprep.mubr.bf16.mxu1 %v4841_v60  ;;  %v850_v29 = vld [vmem:[%s6354_s2 + $0x188] sm:$0xff] }
 0x1af   : > { %v1839_v37 = vpop.f32.mrf.mxu0  ;;  %v2032_v41 = vpop.f32.mrf.mxu1 }
 0x1b0   : > { %2772 = vst [vmem:[%s6354_s2 + $0x70] sm:$0xff] %v2547_v31  ;;  %v2548_v40 = vadd.f32 %v1839_v37, %v816_v30  ;;  %2774 = vst [vmem:[%s6354_s2 + $0x80] sm:$0xff] %v2549_v35  ;;  %v2550_v44 = vadd.f32 %v2032_v41, %v818_v34  ;;  %v852_v31 = vld [vmem:[%s6354_s2 + $0x198] sm:$0xff] }
 0x1b1   : > { %v1841_v45 = vpop.f32.mrf.mxu0  ;;  %v2034_v49 = vpop.f32.mrf.mxu1 }
 0x1b2   : > { %2773 = vst [vmem:[%s6354_s2 + $0x78] sm:$0xff] %v2548_v40  ;;  %v2554_v47 = vadd.f32 %v1841_v45, %v822_v39  ;;  %2775 = vst [vmem:[%s6354_s2 + $0x88] sm:$0xff] %v2550_v44  ;;  %v2556_v51 = vadd.f32 %v2034_v49, %v824_v43  ;;  %v853_v39 = vld [vmem:[%s6354_s2 + $0x1a0] sm:$0xff] }
 0x1b3   : > { %v1843_v52 = vpop.f32.mrf.mxu0  ;;  %v2036_v56 = vpop.f32.mrf.mxu1  ;;  %v857_v43 = vld [vmem:[%s6354_s2 + $0x1c0] sm:$0xff] }
 0x1b4   : > { %2779 = vst [vmem:[%s6354_s2 + $0xa8] sm:$0xff] %v2554_v47  ;;  %v2555_v54 = vadd.f32 %v1843_v52, %v823_v46  ;;  %2781 = vst [vmem:[%s6354_s2 + $0xb8] sm:$0xff] %v2556_v51  ;;  %v2557_v57 = vadd.f32 %v2036_v56, %v825_v50  ;;  %v859_v46 = vld [vmem:[%s6354_s2 + $0x1d0] sm:$0xff]  ;;  %v858_v50 = vld [vmem:[%s6354_s2 + $0x1c8] sm:$0xff] }
 0x1b5   : > { %v1847_v58 = vpop.f32.mrf.mxu0  ;;  %2312 = vmatmul.mubr.bf16.gmra.mxu0 %v4848_v61  ;;  %v2040_v55 = vpop.f32.mrf.mxu1  ;;  %2485 = vmatmul.mubr.bf16.gmra.mxu1 %v4848_v61 }
 0x1b6   : > { %2780 = vst [vmem:[%s6354_s2 + $0xb0] sm:$0xff] %v2555_v54  ;;  %v2561_v60 = vadd.f32 %v1847_v58, %v829_v53  ;;  %2321 = vmatprep.mubr.bf16.mxu0 %v4851_v62  ;;  %2782 = vst [vmem:[%s6354_s2 + $0xc0] sm:$0xff] %v2557_v57  ;;  %v2563_v8 = vadd.f32 %v2040_v55, %v831_v36  ;;  %2492 = vmatprep.mubr.bf16.mxu1 %v4851_v62  ;;  %v837_v62 = vld [vmem:[%s6354_s2 + $0x120] sm:$0xff]  ;;  %v860_v53 = vld [vmem:[%s6354_s2 + $0x1d8] sm:$0xff] }
 0x1b7   : > { %v1849_v32 = vpop.f32.mrf.mxu0  ;;  %v2042_v4 = vpop.f32.mrf.mxu1  ;;  %v864_v36 = vld [vmem:[%s6354_s2 + $0x1f8] sm:$0xff]  ;;  %v866_v58 = vld [vmem:[%s6354_s2 + $0x208] sm:$0xff] }
 0x1b8   : > { %2786 = vst [vmem:[%s6354_s2 + $0xe0] sm:$0xff] %v2561_v60  ;;  %v2562_v61 = vadd.f32 %v1849_v32, %v830_v59  ;;  %2788 = vst [vmem:[%s6354_s2 + $0xf0] sm:$0xff] %v2563_v8  ;;  %v2564_v42 = vadd.f32 %v2042_v4, %v832_v0  ;;  %v867_v8 = vld [vmem:[%s6354_s2 + $0x210] sm:$0xff] }
 0x1b9   : > { %v1851_v48 = vpop.f32.mrf.mxu0  ;;  %v2044_v6 = vpop.f32.mrf.mxu1 }
 0x1ba   : > { %2787 = vst [vmem:[%s6354_s2 + $0xe8] sm:$0xff] %v2562_v61  ;;  %v2568_v2 = vadd.f32 %v1851_v48, %v836_v38  ;;  %2789 = vst [vmem:[%s6354_s2 + $0xf8] sm:$0xff] %v2564_v42  ;;  %v2570_v15 = vadd.f32 %v2044_v6, %v838_v11  ;;  %v871_v61 = vld [vmem:[%s6354_s2 + $0x230] sm:$0xff]  ;;  %v873_v42 = vld [vmem:[%s6354_s2 + $0x240] sm:$0xff] }
 0x1bb   : > { %v1853_v16 = vpop.f32.mrf.mxu0  ;;  %v2046_v19 = vpop.f32.mrf.mxu1 }
 0x1bc   : > { %2793 = vst [vmem:[%s6354_s2 + $0x118] sm:$0xff] %v2568_v2  ;;  %v2569_v18 = vadd.f32 %v1853_v16, %v837_v62  ;;  %2795 = vst [vmem:[%s6354_s2 + $0x128] sm:$0xff] %v2570_v15  ;;  %v2571_v21 = vadd.f32 %v2046_v19, %v839_v14  ;;  %v872_v2 = vld [vmem:[%s6354_s2 + $0x238] sm:$0xff]  ;;  %v874_v15 = vld [vmem:[%s6354_s2 + $0x248] sm:$0xff] }
 0x1bd   : > { %v1857_v22 = vpop.f32.mrf.mxu0  ;;  %2322 = vmatmul.mubr.bf16.gmra.mxu0 %v4858_v63  ;;  %v2050_v25 = vpop.f32.mrf.mxu1  ;;  %2493 = vmatmul.mubr.bf16.gmra.mxu1 %v4858_v63 }
 0x1be   : > { %2794 = vst [vmem:[%s6354_s2 + $0x120] sm:$0xff] %v2569_v18  ;;  %v2575_v24 = vadd.f32 %v1857_v22, %v843_v17  ;;  %2331 = vmatprep.mubr.bf16.mxu0 %v4861_v1  ;;  %2796 = vst [vmem:[%s6354_s2 + $0x130] sm:$0xff] %v2571_v21  ;;  %v2577_v27 = vadd.f32 %v2050_v25, %v845_v20  ;;  %2500 = vmatprep.mubr.bf16.mxu1 %v4861_v1  ;;  %v851_v1 = vld [vmem:[%s6354_s2 + $0x190] sm:$0xff]  ;;  %v878_v18 = vld [vmem:[%s6354_s2 + $0x268] sm:$0xff] }
 0x1bf   : > { %v1859_v28 = vpop.f32.mrf.mxu0  ;;  %v2052_v30 = vpop.f32.mrf.mxu1  ;;  %v880_v20 = vld [vmem:[%s6354_s2 + $0x278] sm:$0xff]  ;;  %v881_v25 = vld [vmem:[%s6354_s2 + $0x280] sm:$0xff] }
 0x1c0   : > { %2800 = vst [vmem:[%s6354_s2 + $0x150] sm:$0xff] %v2575_v24  ;;  %v2576_v63 = vadd.f32 %v1859_v28, %v844_v23  ;;  %2802 = vst [vmem:[%s6354_s2 + $0x160] sm:$0xff] %v2577_v27  ;;  %v2578_v33 = vadd.f32 %v2052_v30, %v846_v26  ;;  %v885_v28 = vld [vmem:[%s6354_s2 + $0x2a0] sm:$0xff]  ;;  %v887_v30 = vld [vmem:[%s6354_s2 + $0x2b0] sm:$0xff] }
 0x1c1   : > { %v1861_v34 = vpop.f32.mrf.mxu0  ;;  %v2054_v37 = vpop.f32.mrf.mxu1 }
 0x1c2   : > { %2801 = vst [vmem:[%s6354_s2 + $0x158] sm:$0xff] %v2576_v63  ;;  %v2582_v35 = vadd.f32 %v1861_v34, %v850_v29  ;;  %2803 = vst [vmem:[%s6354_s2 + $0x168] sm:$0xff] %v2578_v33  ;;  %v2584_v40 = vadd.f32 %v2054_v37, %v852_v31  ;;  %v886_v34 = vld [vmem:[%s6354_s2 + $0x2a8] sm:$0xff]  ;;  %v888_v37 = vld [vmem:[%s6354_s2 + $0x2b8] sm:$0xff] }
 0x1c3   : > { %v1863_v41 = vpop.f32.mrf.mxu0  ;;  %v2056_v45 = vpop.f32.mrf.mxu1 }
 0x1c4   : > { %2807 = vst [vmem:[%s6354_s2 + $0x188] sm:$0xff] %v2582_v35  ;;  %v2583_v44 = vadd.f32 %v1863_v41, %v851_v1  ;;  %2809 = vst [vmem:[%s6354_s2 + $0x198] sm:$0xff] %v2584_v40  ;;  %v2585_v47 = vadd.f32 %v2056_v45, %v853_v39  ;;  %v892_v41 = vld [vmem:[%s6354_s2 + $0x2d8] sm:$0xff] }
 0x1c5   : > { %v1867_v49 = vpop.f32.mrf.mxu0  ;;  %2332 = vmatmul.mubr.bf16.gmra.mxu0 %v4868_v3  ;;  %v2060_v52 = vpop.f32.mrf.mxu1  ;;  %2501 = vmatmul.mubr.bf16.gmra.mxu1 %v4868_v3 }
 0x1c6   : > { %2808 = vst [vmem:[%s6354_s2 + $0x190] sm:$0xff] %v2583_v44  ;;  %v2589_v51 = vadd.f32 %v1867_v49, %v857_v43  ;;  %2341 = vmatprep.mubr.bf16.mxu0 %v4871_v5  ;;  %2810 = vst [vmem:[%s6354_s2 + $0x1a0] sm:$0xff] %v2585_v47  ;;  %v2591_v54 = vadd.f32 %v2060_v52, %v859_v46  ;;  %2508 = vmatprep.mubr.bf16.mxu1 %v4871_v5  ;;  %v865_v5 = vld [vmem:[%s6354_s2 + $0x200] sm:$0xff]  ;;  %v894_v44 = vld [vmem:[%s6354_s2 + $0x2e8] sm:$0xff] }
 0x1c7   : > { %v1869_v56 = vpop.f32.mrf.mxu0  ;;  %v2062_v57 = vpop.f32.mrf.mxu1 }
 0x1c8   : > { %2814 = vst [vmem:[%s6354_s2 + $0x1c0] sm:$0xff] %v2589_v51  ;;  %v2590_v3 = vadd.f32 %v1869_v56, %v858_v50  ;;  %2816 = vst [vmem:[%s6354_s2 + $0x1d0] sm:$0xff] %v2591_v54  ;;  %v2592_v59 = vadd.f32 %v2062_v57, %v860_v53  ;;  %v895_v50 = vld [vmem:[%s6354_s2 + $0x2f0] sm:$0xff] }
 0x1c9   : > { %v1871_v60 = vpop.f32.mrf.mxu0  ;;  %v2064_v0 = vpop.f32.mrf.mxu1  ;;  %v899_v53 = vld [vmem:[%s6354_s2 + $0x310] sm:$0xff] }
 0x1ca   : > { %2815 = vst [vmem:[%s6354_s2 + $0x1c8] sm:$0xff] %v2590_v3  ;;  %v2596_v55 = vadd.f32 %v1871_v60, %v864_v36  ;;  %2817 = vst [vmem:[%s6354_s2 + $0x1d8] sm:$0xff] %v2592_v59  ;;  %v2598_v32 = vadd.f32 %v2064_v0, %v866_v58  ;;  %v901_v36 = vld [vmem:[%s6354_s2 + $0x320] sm:$0xff]  ;;  %v900_v58 = vld [vmem:[%s6354_s2 + $0x318] sm:$0xff] }
 0x1cb   : > { %v1873_v38 = vpop.f32.mrf.mxu0  ;;  %v2066_v11 = vpop.f32.mrf.mxu1 }
 0x1cc   : > { %2821 = vst [vmem:[%s6354_s2 + $0x1f8] sm:$0xff] %v2596_v55  ;;  %v2597_v4 = vadd.f32 %v1873_v38, %v865_v5  ;;  %2823 = vst [vmem:[%s6354_s2 + $0x208] sm:$0xff] %v2598_v32  ;;  %v2599_v48 = vadd.f32 %v2066_v11, %v867_v8  ;;  %v902_v5 = vld [vmem:[%s6354_s2 + $0x328] sm:$0xff]  ;;  %v908_v38 = vld [vmem:[%s6354_s2 + $0x358] sm:$0xff] }
 0x1cd   : > { %v1877_v62 = vpop.f32.mrf.mxu0  ;;  %2342 = vmatmul.mubr.bf16.gmra.mxu0 %v4878_v7  ;;  %v2070_v14 = vpop.f32.mrf.mxu1  ;;  %2509 = vmatmul.mubr.bf16.gmra.mxu1 %v4878_v7  ;;  %v906_v8 = vld [vmem:[%s6354_s2 + $0x348] sm:$0xff]  ;;  %v907_v11 = vld [vmem:[%s6354_s2 + $0x350] sm:$0xff] }
 0x1ce   : > { %2822 = vst [vmem:[%s6354_s2 + $0x200] sm:$0xff] %v2597_v4  ;;  %v2603_v6 = vadd.f32 %v1877_v62, %v871_v61  ;;  %2351 = vmatprep.mubr.bf16.mxu0 %v4881_v9  ;;  %2824 = vst [vmem:[%s6354_s2 + $0x210] sm:$0xff] %v2599_v48  ;;  %v2605_v16 = vadd.f32 %v2070_v14, %v873_v42  ;;  %2516 = vmatprep.mubr.bf16.mxu1 %v4881_v9  ;;  %v879_v9 = vld [vmem:[%s6354_s2 + $0x270] sm:$0xff]  ;;  %v909_v62 = vld [vmem:[%s6354_s2 + $0x360] sm:$0xff] }
 0x1cf   : > { %v1879_v17 = vpop.f32.mrf.mxu0  ;;  %v2072_v19 = vpop.f32.mrf.mxu1  ;;  %v913_v14 = vld [vmem:[%s6354_s2 + $0x380] sm:$0xff] }
 0x1d0   : > { %2828 = vst [vmem:[%s6354_s2 + $0x230] sm:$0xff] %v2603_v6  ;;  %v2604_v7 = vadd.f32 %v1879_v17, %v872_v2  ;;  %2830 = vst [vmem:[%s6354_s2 + $0x240] sm:$0xff] %v2605_v16  ;;  %v2606_v21 = vadd.f32 %v2072_v19, %v874_v15  ;;  %v915_v17 = vld [vmem:[%s6354_s2 + $0x390] sm:$0xff]  ;;  %v914_v19 = vld [vmem:[%s6354_s2 + $0x388] sm:$0xff] }
 0x1d1   : > { %v1881_v22 = vpop.f32.mrf.mxu0  ;;  %v2074_v24 = vpop.f32.mrf.mxu1 }
 0x1d2   : > { %2829 = vst [vmem:[%s6354_s2 + $0x238] sm:$0xff] %v2604_v7  ;;  %v2610_v23 = vadd.f32 %v1881_v22, %v878_v18  ;;  %2831 = vst [vmem:[%s6354_s2 + $0x248] sm:$0xff] %v2606_v21  ;;  %v2612_v26 = vadd.f32 %v2074_v24, %v880_v20  ;;  %v916_v22 = vld [vmem:[%s6354_s2 + $0x398] sm:$0xff] }
 0x1d3   : > { %v1883_v27 = vpop.f32.mrf.mxu0  ;;  %v2076_v63 = vpop.f32.mrf.mxu1  ;;  %v920_v24 = vld [vmem:[%s6354_s2 + $0x3b8] sm:$0xff] }
 0x1d4   : > { %2835 = vst [vmem:[%s6354_s2 + $0x268] sm:$0xff] %v2610_v23  ;;  %v2611_v29 = vadd.f32 %v1883_v27, %v879_v9  ;;  %2837 = vst [vmem:[%s6354_s2 + $0x278] sm:$0xff] %v2612_v26  ;;  %v2613_v31 = vadd.f32 %v2076_v63, %v881_v25  ;;  %v922_v27 = vld [vmem:[%s6354_s2 + $0x3c8] sm:$0xff]  ;;  %v921_v63 = vld [vmem:[%s6354_s2 + $0x3c0] sm:$0xff] }
 0x1d5   : > { %v1887_v33 = vpop.f32.mrf.mxu0  ;;  %2352 = vmatmul.mubr.bf16.gmra.mxu0 %v4888_v10  ;;  %v2080_v35 = vpop.f32.mrf.mxu1  ;;  %2517 = vmatmul.mubr.bf16.gmra.mxu1 %v4888_v10 }
 0x1d6   : > { %2836 = vst [vmem:[%s6354_s2 + $0x270] sm:$0xff] %v2611_v29  ;;  %v2617_v1 = vadd.f32 %v1887_v33, %v885_v28  ;;  %2361 = vmatprep.mubr.bf16.mxu0 %v4891_v12  ;;  %2838 = vst [vmem:[%s6354_s2 + $0x280] sm:$0xff] %v2613_v31  ;;  %v2619_v39 = vadd.f32 %v2080_v35, %v887_v30  ;;  %2524 = vmatprep.mubr.bf16.mxu1 %v4891_v12  ;;  %v893_v12 = vld [vmem:[%s6354_s2 + $0x2e0] sm:$0xff]  ;;  %v923_v33 = vld [vmem:[%s6354_s2 + $0x3d0] sm:$0xff] }
 0x1d7   : > { %v1889_v40 = vpop.f32.mrf.mxu0  ;;  %v2082_v43 = vpop.f32.mrf.mxu1  ;;  %v927_v35 = vld [vmem:[%s6354_s2 + $0x3f0] sm:$0xff] }
 0x1d8   : > { %2842 = vst [vmem:[%s6354_s2 + $0x2a0] sm:$0xff] %v2617_v1  ;;  %v2618_v10 = vadd.f32 %v1889_v40, %v886_v34  ;;  %2844 = vst [vmem:[%s6354_s2 + $0x2b0] sm:$0xff] %v2619_v39  ;;  %v2620_v45 = vadd.f32 %v2082_v43, %v888_v37  ;;  %v929_v40 = vld [vmem:[%s6354_s2 + $0x400] sm:$0xff]  ;;  %v928_v43 = vld [vmem:[%s6354_s2 + $0x3f8] sm:$0xff] }
 0x1d9   : > { %v1891_v46 = vpop.f32.mrf.mxu0  ;;  %v2084_v49 = vpop.f32.mrf.mxu1 }
 0x1da   : > { %2843 = vst [vmem:[%s6354_s2 + $0x2a8] sm:$0xff] %v2618_v10  ;;  %v2624_v47 = vadd.f32 %v1891_v46, %v892_v41  ;;  %2845 = vst [vmem:[%s6354_s2 + $0x2b8] sm:$0xff] %v2620_v45  ;;  %v2626_v51 = vadd.f32 %v2084_v49, %v894_v44  ;;  %v930_v46 = vld [vmem:[%s6354_s2 + $0x408] sm:$0xff] }
 0x1db   : > { %v1893_v52 = vpop.f32.mrf.mxu0  ;;  %v2086_v56 = vpop.f32.mrf.mxu1  ;;  %v934_v49 = vld [vmem:[%s6354_s2 + $0x428] sm:$0xff] }
 0x1dc   : > { %2849 = vst [vmem:[%s6354_s2 + $0x2d8] sm:$0xff] %v2624_v47  ;;  %v2625_v54 = vadd.f32 %v1893_v52, %v893_v12  ;;  %2851 = vst [vmem:[%s6354_s2 + $0x2e8] sm:$0xff] %v2626_v51  ;;  %v2627_v3 = vadd.f32 %v2086_v56, %v895_v50  ;;  %v936_v52 = vld [vmem:[%s6354_s2 + $0x438] sm:$0xff]  ;;  %v935_v56 = vld [vmem:[%s6354_s2 + $0x430] sm:$0xff] }
 0x1dd   : > { %v1897_v57 = vpop.f32.mrf.mxu0  ;;  %2362 = vmatmul.mubr.bf16.gmra.mxu0 %v4898_v13  ;;  %v2090_v60 = vpop.f32.mrf.mxu1  ;;  %2525 = vmatmul.mubr.bf16.gmra.mxu1 %v4898_v13 }
 0x1de   : > { %2850 = vst [vmem:[%s6354_s2 + $0x2e0] sm:$0xff] %v2625_v54  ;;  %v2631_v59 = vadd.f32 %v1897_v57, %v899_v53  ;;  %2852 = vst [vmem:[%s6354_s2 + $0x2f0] sm:$0xff] %v2627_v3  ;;  %v2633_v55 = vadd.f32 %v2090_v60, %v901_v36  ;;  %v937_v57 = vld [vmem:[%s6354_s2 + $0x440] sm:$0xff] }
 0x1df   : > { %v1899_v0 = vpop.f32.mrf.mxu0  ;;  %v2092_v13 = vpop.f32.mrf.mxu1  ;;  %v941_v60 = vld [vmem:[%s6354_s2 + $0x460] sm:$0xff] }
 0x1e0   : > { %2856 = vst [vmem:[%s6354_s2 + $0x310] sm:$0xff] %v2631_v59  ;;  %v2632_v32 = vadd.f32 %v1899_v0, %v900_v58  ;;  %2858 = vst [vmem:[%s6354_s2 + $0x320] sm:$0xff] %v2633_v55  ;;  %v2634_v61 = vadd.f32 %v2092_v13, %v902_v5  ;;  %v943_v0 = vld [vmem:[%s6354_s2 + $0x470] sm:$0xff]  ;;  %v942_v13 = vld [vmem:[%s6354_s2 + $0x468] sm:$0xff] }
 0x1e1   : > { %v1901_v4 = vpop.f32.mrf.mxu0  ;;  %v2094_v48 = vpop.f32.mrf.mxu1 }
 0x1e2   : > { %2857 = vst [vmem:[%s6354_s2 + $0x318] sm:$0xff] %v2632_v32  ;;  %v2638_v42 = vadd.f32 %v1901_v4, %v906_v8  ;;  %2859 = vst [vmem:[%s6354_s2 + $0x328] sm:$0xff] %v2634_v61  ;;  %v2640_v2 = vadd.f32 %v2094_v48, %v908_v38  ;;  %v944_v4 = vld [vmem:[%s6354_s2 + $0x478] sm:$0xff] }
 0x1e3   : > { %v1903_v6 = vpop.f32.mrf.mxu0  ;;  %v2096_v16 = vpop.f32.mrf.mxu1  ;;  %v948_v48 = vld [vmem:[%s6354_s2 + $0x498] sm:$0xff] }
 0x1e4   : > { %2863 = vst [vmem:[%s6354_s2 + $0x348] sm:$0xff] %v2638_v42  ;;  %v2639_v15 = vadd.f32 %v1903_v6, %v907_v11  ;;  %2865 = vst [vmem:[%s6354_s2 + $0x358] sm:$0xff] %v2640_v2  ;;  %v2641_v18 = vadd.f32 %v2096_v16, %v909_v62  ;;  %v950_v6 = vld [vmem:[%s6354_s2 + $0x4a8] sm:$0xff]  ;;  %v949_v16 = vld [vmem:[%s6354_s2 + $0x4a0] sm:$0xff] }
 0x1e5   : > { %v1907_v7 = vpop.f32.mrf.mxu0  ;;  %v2100_v21 = vpop.f32.mrf.mxu1 }
 0x1e6   : > { %2864 = vst [vmem:[%s6354_s2 + $0x350] sm:$0xff] %v2639_v15  ;;  %v2645_v20 = vadd.f32 %v1907_v7, %v913_v14  ;;  %2866 = vst [vmem:[%s6354_s2 + $0x360] sm:$0xff] %v2641_v18  ;;  %v2647_v9 = vadd.f32 %v2100_v21, %v915_v17  ;;  %v951_v7 = vld [vmem:[%s6354_s2 + $0x4b0] sm:$0xff] }
 0x1e7   : > { %v1909_v23 = vpop.f32.mrf.mxu0  ;;  %v2102_v26 = vpop.f32.mrf.mxu1  ;;  %v955_v21 = vld [vmem:[%s6354_s2 + $0x4d0] sm:$0xff] }
 0x1e8   : > { %2870 = vst [vmem:[%s6354_s2 + $0x380] sm:$0xff] %v2645_v20  ;;  %v2646_v25 = vadd.f32 %v1909_v23, %v914_v19  ;;  %2872 = vst [vmem:[%s6354_s2 + $0x390] sm:$0xff] %v2647_v9  ;;  %v2648_v28 = vadd.f32 %v2102_v26, %v916_v22  ;;  %v957_v23 = vld [vmem:[%s6354_s2 + $0x4e0] sm:$0xff]  ;;  %v956_v26 = vld [vmem:[%s6354_s2 + $0x4d8] sm:$0xff] }
 0x1e9   : > { %v1911_v29 = vpop.f32.mrf.mxu0  ;;  %v2104_v31 = vpop.f32.mrf.mxu1 }
 0x1ea   : > { %2871 = vst [vmem:[%s6354_s2 + $0x388] sm:$0xff] %v2646_v25  ;;  %v2652_v30 = vadd.f32 %v1911_v29, %v920_v24  ;;  %2873 = vst [vmem:[%s6354_s2 + $0x398] sm:$0xff] %v2648_v28  ;;  %v2654_v34 = vadd.f32 %v2104_v31, %v922_v27  ;;  %v958_v29 = vld [vmem:[%s6354_s2 + $0x4e8] sm:$0xff] }
 0x1eb   : > { %v1913_v1 = vpop.f32.mrf.mxu0  ;;  %v2106_v39 = vpop.f32.mrf.mxu1  ;;  %v962_v31 = vld [vmem:[%s6354_s2 + $0x508] sm:$0xff] }
 0x1ec   : > { %2877 = vst [vmem:[%s6354_s2 + $0x3b8] sm:$0xff] %v2652_v30  ;;  %v2653_v37 = vadd.f32 %v1913_v1, %v921_v63  ;;  %2879 = vst [vmem:[%s6354_s2 + $0x3c8] sm:$0xff] %v2654_v34  ;;  %v2655_v41 = vadd.f32 %v2106_v39, %v923_v33  ;;  %v964_v1 = vld [vmem:[%s6354_s2 + $0x518] sm:$0xff]  ;;  %v963_v39 = vld [vmem:[%s6354_s2 + $0x510] sm:$0xff] }
 0x1ed   : > { %v1917_v10 = vpop.f32.mrf.mxu0  ;;  %v2110_v45 = vpop.f32.mrf.mxu1 }
 0x1ee   : > { %2878 = vst [vmem:[%s6354_s2 + $0x3c0] sm:$0xff] %v2653_v37  ;;  %v2659_v44 = vadd.f32 %v1917_v10, %v927_v35  ;;  %2880 = vst [vmem:[%s6354_s2 + $0x3d0] sm:$0xff] %v2655_v41  ;;  %v2661_v12 = vadd.f32 %v2110_v45, %v929_v40  ;;  %v965_v10 = vld [vmem:[%s6354_s2 + $0x520] sm:$0xff] }
 0x1ef   : > { %v1919_v47 = vpop.f32.mrf.mxu0  ;;  %v2112_v51 = vpop.f32.mrf.mxu1  ;;  %v969_v45 = vld [vmem:[%s6354_s2 + $0x540] sm:$0xff] }
 0x1f0   : > { %2884 = vst [vmem:[%s6354_s2 + $0x3f0] sm:$0xff] %v2659_v44  ;;  %v2660_v50 = vadd.f32 %v1919_v47, %v928_v43  ;;  %2886 = vst [vmem:[%s6354_s2 + $0x400] sm:$0xff] %v2661_v12  ;;  %v2662_v53 = vadd.f32 %v2112_v51, %v930_v46  ;;  %v971_v47 = vld [vmem:[%s6354_s2 + $0x550] sm:$0xff]  ;;  %v970_v51 = vld [vmem:[%s6354_s2 + $0x548] sm:$0xff] }
 0x1f1   : > { %v1921_v54 = vpop.f32.mrf.mxu0  ;;  %v2114_v3 = vpop.f32.mrf.mxu1 }
 0x1f2   : > { %2885 = vst [vmem:[%s6354_s2 + $0x3f8] sm:$0xff] %v2660_v50  ;;  %v2666_v36 = vadd.f32 %v1921_v54, %v934_v49  ;;  %2887 = vst [vmem:[%s6354_s2 + $0x408] sm:$0xff] %v2662_v53  ;;  %v2668_v58 = vadd.f32 %v2114_v3, %v936_v52  ;;  %v972_v54 = vld [vmem:[%s6354_s2 + $0x558] sm:$0xff] }
 0x1f3   : > { %v1923_v59 = vpop.f32.mrf.mxu0  ;;  %v2116_v55 = vpop.f32.mrf.mxu1  ;;  %v976_v3 = vld [vmem:[%s6354_s2 + $0x578] sm:$0xff] }
 0x1f4   : > { %2891 = vst [vmem:[%s6354_s2 + $0x428] sm:$0xff] %v2666_v36  ;;  %v2667_v5 = vadd.f32 %v1923_v59, %v935_v56  ;;  %2893 = vst [vmem:[%s6354_s2 + $0x438] sm:$0xff] %v2668_v58  ;;  %v2669_v8 = vadd.f32 %v2116_v55, %v937_v57  ;;  %v978_v59 = vld [vmem:[%s6354_s2 + $0x588] sm:$0xff]  ;;  %v977_v55 = vld [vmem:[%s6354_s2 + $0x580] sm:$0xff] }
 0x1f5   : > { %v1927_v32 = vpop.f32.mrf.mxu0  ;;  %v2120_v61 = vpop.f32.mrf.mxu1 }
 0x1f6   : > { %2892 = vst [vmem:[%s6354_s2 + $0x430] sm:$0xff] %v2667_v5  ;;  %v2673_v38 = vadd.f32 %v1927_v32, %v941_v60  ;;  %2894 = vst [vmem:[%s6354_s2 + $0x440] sm:$0xff] %v2669_v8  ;;  %v2675_v11 = vadd.f32 %v2120_v61, %v943_v0  ;;  %v979_v32 = vld [vmem:[%s6354_s2 + $0x590] sm:$0xff] }
 0x1f7   : > { %v1929_v42 = vpop.f32.mrf.mxu0  ;;  %v2122_v2 = vpop.f32.mrf.mxu1  ;;  %v983_v61 = vld [vmem:[%s6354_s2 + $0x5b0] sm:$0xff] }
 0x1f8   : > { %2898 = vst [vmem:[%s6354_s2 + $0x460] sm:$0xff] %v2673_v38  ;;  %v2674_v62 = vadd.f32 %v1929_v42, %v942_v13  ;;  %2900 = vst [vmem:[%s6354_s2 + $0x470] sm:$0xff] %v2675_v11  ;;  %v2676_v14 = vadd.f32 %v2122_v2, %v944_v4  ;;  %v985_v42 = vld [vmem:[%s6354_s2 + $0x5c0] sm:$0xff]  ;;  %v984_v2 = vld [vmem:[%s6354_s2 + $0x5b8] sm:$0xff] }
 0x1f9   : > { %v1931_v15 = vpop.f32.mrf.mxu0  ;;  %v2124_v18 = vpop.f32.mrf.mxu1 }
 0x1fa   : > { %2899 = vst [vmem:[%s6354_s2 + $0x468] sm:$0xff] %v2674_v62  ;;  %v2680_v17 = vadd.f32 %v1931_v15, %v948_v48  ;;  %2901 = vst [vmem:[%s6354_s2 + $0x478] sm:$0xff] %v2676_v14  ;;  %v2682_v19 = vadd.f32 %v2124_v18, %v950_v6  ;;  %v986_v15 = vld [vmem:[%s6354_s2 + $0x5c8] sm:$0xff] }
 0x1fb   : > { %v1933_v20 = vpop.f32.mrf.mxu0  ;;  %v2126_v9 = vpop.f32.mrf.mxu1  ;;  %v990_v18 = vld [vmem:[%s6354_s2 + $0x5e8] sm:$0xff] }
 0x1fc   : > { %2905 = vst [vmem:[%s6354_s2 + $0x498] sm:$0xff] %v2680_v17  ;;  %v2681_v22 = vadd.f32 %v1933_v20, %v949_v16  ;;  %2907 = vst [vmem:[%s6354_s2 + $0x4a8] sm:$0xff] %v2682_v19  ;;  %v2683_v24 = vadd.f32 %v2126_v9, %v951_v7  ;;  %v992_v20 = vld [vmem:[%s6354_s2 + $0x5f8] sm:$0xff]  ;;  %v991_v9 = vld [vmem:[%s6354_s2 + $0x5f0] sm:$0xff] }
 0x1fd   : > { %v1937_v25 = vpop.f32.mrf.mxu0  ;;  %v2130_v28 = vpop.f32.mrf.mxu1 }
 0x1fe   : > { %2906 = vst [vmem:[%s6354_s2 + $0x4a0] sm:$0xff] %v2681_v22  ;;  %v2687_v27 = vadd.f32 %v1937_v25, %v955_v21  ;;  %2908 = vst [vmem:[%s6354_s2 + $0x4b0] sm:$0xff] %v2683_v24  ;;  %v2689_v63 = vadd.f32 %v2130_v28, %v957_v23  ;;  %v993_v25 = vld [vmem:[%s6354_s2 + $0x600] sm:$0xff] }
 0x1ff   : > { %v1939_v30 = vpop.f32.mrf.mxu0  ;;  %v2132_v34 = vpop.f32.mrf.mxu1  ;;  %v997_v28 = vld [vmem:[%s6354_s2 + $0x620] sm:$0xff] }
 0x200   : > { %2912 = vst [vmem:[%s6354_s2 + $0x4d0] sm:$0xff] %v2687_v27  ;;  %v2688_v33 = vadd.f32 %v1939_v30, %v956_v26  ;;  %2914 = vst [vmem:[%s6354_s2 + $0x4e0] sm:$0xff] %v2689_v63  ;;  %v2690_v35 = vadd.f32 %v2132_v34, %v958_v29  ;;  %v999_v30 = vld [vmem:[%s6354_s2 + $0x630] sm:$0xff]  ;;  %v998_v34 = vld [vmem:[%s6354_s2 + $0x628] sm:$0xff] }
 0x201   : > { %v1941_v37 = vpop.f32.mrf.mxu0  ;;  %v2134_v41 = vpop.f32.mrf.mxu1 }
 0x202   : > { %2913 = vst [vmem:[%s6354_s2 + $0x4d8] sm:$0xff] %v2688_v33  ;;  %v2694_v40 = vadd.f32 %v1941_v37, %v962_v31  ;;  %2915 = vst [vmem:[%s6354_s2 + $0x4e8] sm:$0xff] %v2690_v35  ;;  %v2696_v43 = vadd.f32 %v2134_v41, %v964_v1  ;;  %v1000_v37 = vld [vmem:[%s6354_s2 + $0x638] sm:$0xff] }
 0x203   : > { %v1943_v44 = vpop.f32.mrf.mxu0  ;;  %v2136_v12 = vpop.f32.mrf.mxu1  ;;  %v1004_v41 = vld [vmem:[%s6354_s2 + $0x658] sm:$0xff] }
 0x204   : > { %2919 = vst [vmem:[%s6354_s2 + $0x508] sm:$0xff] %v2694_v40  ;;  %v2695_v46 = vadd.f32 %v1943_v44, %v963_v39  ;;  %2921 = vst [vmem:[%s6354_s2 + $0x518] sm:$0xff] %v2696_v43  ;;  %v2697_v49 = vadd.f32 %v2136_v12, %v965_v10  ;;  %v1006_v44 = vld [vmem:[%s6354_s2 + $0x668] sm:$0xff]  ;;  %v1005_v12 = vld [vmem:[%s6354_s2 + $0x660] sm:$0xff] }
 0x205   : > { %v1947_v50 = vpop.f32.mrf.mxu0  ;;  %v2140_v53 = vpop.f32.mrf.mxu1 }
 0x206   : > { %2920 = vst [vmem:[%s6354_s2 + $0x510] sm:$0xff] %v2695_v46  ;;  %v2701_v52 = vadd.f32 %v1947_v50, %v969_v45  ;;  %2922 = vst [vmem:[%s6354_s2 + $0x520] sm:$0xff] %v2697_v49  ;;  %v2703_v56 = vadd.f32 %v2140_v53, %v971_v47  ;;  %v1007_v50 = vld [vmem:[%s6354_s2 + $0x670] sm:$0xff] }
 0x207   : > { %v1949_v36 = vpop.f32.mrf.mxu0  ;;  %v2142_v58 = vpop.f32.mrf.mxu1  ;;  %v1011_v53 = vld [vmem:[%s6354_s2 + $0x690] sm:$0xff] }
 0x208   : > { %2926 = vst [vmem:[%s6354_s2 + $0x540] sm:$0xff] %v2701_v52  ;;  %v2702_v57 = vadd.f32 %v1949_v36, %v970_v51  ;;  %2928 = vst [vmem:[%s6354_s2 + $0x550] sm:$0xff] %v2703_v56  ;;  %v2704_v60 = vadd.f32 %v2142_v58, %v972_v54  ;;  %v1013_v36 = vld [vmem:[%s6354_s2 + $0x6a0] sm:$0xff]  ;;  %v1012_v58 = vld [vmem:[%s6354_s2 + $0x698] sm:$0xff] }
 0x209   : > { %v1951_v5 = vpop.f32.mrf.mxu0  ;;  %v2144_v8 = vpop.f32.mrf.mxu1 }
 0x20a   : > { %2927 = vst [vmem:[%s6354_s2 + $0x548] sm:$0xff] %v2702_v57  ;;  %v2708_v0 = vadd.f32 %v1951_v5, %v976_v3  ;;  %2929 = vst [vmem:[%s6354_s2 + $0x558] sm:$0xff] %v2704_v60  ;;  %v2710_v13 = vadd.f32 %v2144_v8, %v978_v59  ;;  %v1014_v5 = vld [vmem:[%s6354_s2 + $0x6a8] sm:$0xff] }
 0x20b   : > { %v1953_v38 = vpop.f32.mrf.mxu0  ;;  %v2146_v11 = vpop.f32.mrf.mxu1  ;;  %v1018_v8 = vld [vmem:[%s6354_s2 + $0x6c8] sm:$0xff] }
 0x20c   : > { %2933 = vst [vmem:[%s6354_s2 + $0x578] sm:$0xff] %v2708_v0  ;;  %v2709_v4 = vadd.f32 %v1953_v38, %v977_v55  ;;  %2935 = vst [vmem:[%s6354_s2 + $0x588] sm:$0xff] %v2710_v13  ;;  %v2711_v48 = vadd.f32 %v2146_v11, %v979_v32  ;;  %v1020_v38 = vld [vmem:[%s6354_s2 + $0x6d8] sm:$0xff]  ;;  %v1019_v11 = vld [vmem:[%s6354_s2 + $0x6d0] sm:$0xff] }
 0x20d   : > { %v1957_v62 = vpop.f32.mrf.mxu0  ;;  %v2150_v14 = vpop.f32.mrf.mxu1 }
 0x20e   : > { %2934 = vst [vmem:[%s6354_s2 + $0x580] sm:$0xff] %v2709_v4  ;;  %v2715_v6 = vadd.f32 %v1957_v62, %v983_v61  ;;  %2936 = vst [vmem:[%s6354_s2 + $0x590] sm:$0xff] %v2711_v48  ;;  %v2717_v16 = vadd.f32 %v2150_v14, %v985_v42  ;;  %v1021_v62 = vld [vmem:[%s6354_s2 + $0x6e0] sm:$0xff] }
 0x20f   : > { %v1959_v17 = vpop.f32.mrf.mxu0  ;;  %v2152_v19 = vpop.f32.mrf.mxu1  ;;  %v805_v14 = vld [vmem:[%s6354_s2 + $0x20] sm:$0xff] }
 0x210   : > { %2940 = vst [vmem:[%s6354_s2 + $0x5b0] sm:$0xff] %v2715_v6  ;;  %v2716_v7 = vadd.f32 %v1959_v17, %v984_v2  ;;  %2942 = vst [vmem:[%s6354_s2 + $0x5c0] sm:$0xff] %v2717_v16  ;;  %v2718_v21 = vadd.f32 %v2152_v19, %v986_v15 }
 0x211   : > { %v1961_v22 = vpop.f32.mrf.mxu0  ;;  %v2154_v24 = vpop.f32.mrf.mxu1 }
 0x212   : > { %2941 = vst [vmem:[%s6354_s2 + $0x5b8] sm:$0xff] %v2716_v7  ;;  %v2722_v23 = vadd.f32 %v1961_v22, %v990_v18  ;;  %2943 = vst [vmem:[%s6354_s2 + $0x5c8] sm:$0xff] %v2718_v21  ;;  %v2724_v26 = vadd.f32 %v2154_v24, %v992_v20  ;;  %v806_v7 = vld [vmem:[%s6354_s2 + $0x28] sm:$0xff]  ;;  %v812_v22 = vld [vmem:[%s6354_s2 + $0x58] sm:$0xff] }
 0x213   : > { %v1963_v27 = vpop.f32.mrf.mxu0  ;;  %v2156_v63 = vpop.f32.mrf.mxu1 }
 0x214   : > { %2947 = vst [vmem:[%s6354_s2 + $0x5e8] sm:$0xff] %v2722_v23  ;;  %v2723_v29 = vadd.f32 %v1963_v27, %v991_v9  ;;  %2949 = vst [vmem:[%s6354_s2 + $0x5f8] sm:$0xff] %v2724_v26  ;;  %v2725_v31 = vadd.f32 %v2156_v63, %v993_v25  ;;  %v807_v23 = vld [vmem:[%s6354_s2 + $0x30] sm:$0xff]  ;;  %v813_v27 = vld [vmem:[%s6354_s2 + $0x60] sm:$0xff] }
 0x215   : > { %v1967_v33 = vpop.f32.mrf.mxu0  ;;  %v2160_v35 = vpop.f32.mrf.mxu1 }
 0x216   : > { %2948 = vst [vmem:[%s6354_s2 + $0x5f0] sm:$0xff] %v2723_v29  ;;  %v2729_v1 = vadd.f32 %v1967_v33, %v997_v28  ;;  %2950 = vst [vmem:[%s6354_s2 + $0x600] sm:$0xff] %v2725_v31  ;;  %v2731_v39 = vadd.f32 %v2160_v35, %v999_v30  ;;  %v819_v31 = vld [vmem:[%s6354_s2 + $0x90] sm:$0xff] }
 0x217   : > { %v1969_v40 = vpop.f32.mrf.mxu0  ;;  %v2162_v43 = vpop.f32.mrf.mxu1 }
 0x218   : > { %2954 = vst [vmem:[%s6354_s2 + $0x620] sm:$0xff] %v2729_v1  ;;  %v2730_v10 = vadd.f32 %v1969_v40, %v998_v34  ;;  %2956 = vst [vmem:[%s6354_s2 + $0x630] sm:$0xff] %v2731_v39  ;;  %v2732_v45 = vadd.f32 %v2162_v43, %v1000_v37  ;;  %v814_v34 = vld [vmem:[%s6354_s2 + $0x68] sm:$0xff]  ;;  %v820_v39 = vld [vmem:[%s6354_s2 + $0x98] sm:$0xff] }
 0x219   : > { %v1971_v46 = vpop.f32.mrf.mxu0  ;;  %v2164_v49 = vpop.f32.mrf.mxu1 }
 0x21a   : > { %2955 = vst [vmem:[%s6354_s2 + $0x628] sm:$0xff] %v2730_v10  ;;  %v2736_v47 = vadd.f32 %v1971_v46, %v1004_v41  ;;  %2957 = vst [vmem:[%s6354_s2 + $0x638] sm:$0xff] %v2732_v45  ;;  %v2738_v51 = vadd.f32 %v2164_v49, %v1006_v44  ;;  %v826_v44 = vld [vmem:[%s6354_s2 + $0xc8] sm:$0xff]  ;;  %v821_v46 = vld [vmem:[%s6354_s2 + $0xa0] sm:$0xff] }
 0x21b   : > { %v1973_v52 = vpop.f32.mrf.mxu0  ;;  %v2166_v56 = vpop.f32.mrf.mxu1 }
 0x21c   : > { %2961 = vst [vmem:[%s6354_s2 + $0x658] sm:$0xff] %v2736_v47  ;;  %v2737_v54 = vadd.f32 %v1973_v52, %v1005_v12  ;;  %2963 = vst [vmem:[%s6354_s2 + $0x668] sm:$0xff] %v2738_v51  ;;  %v2739_v3 = vadd.f32 %v2166_v56, %v1007_v50  ;;  %v827_v50 = vld [vmem:[%s6354_s2 + $0xd0] sm:$0xff]  ;;  %v833_v56 = vld [vmem:[%s6354_s2 + $0x100] sm:$0xff] }
 0x21d   : > { %v1977_v57 = vpop.f32.mrf.mxu0  ;;  %v2170_v60 = vpop.f32.mrf.mxu1 }
 0x21e   : > { %2962 = vst [vmem:[%s6354_s2 + $0x660] sm:$0xff] %v2737_v54  ;;  %v2743_v59 = vadd.f32 %v1977_v57, %v1011_v53  ;;  %2964 = vst [vmem:[%s6354_s2 + $0x670] sm:$0xff] %v2739_v3  ;;  %v2745_v55 = vadd.f32 %v2170_v60, %v1013_v36  ;;  %v828_v3 = vld [vmem:[%s6354_s2 + $0xd8] sm:$0xff]  ;;  %v834_v60 = vld [vmem:[%s6354_s2 + $0x108] sm:$0xff] }
 0x21f   : > { %v1979_v0 = vpop.f32.mrf.mxu0  ;;  %v2172_v13 = vpop.f32.mrf.mxu1 }
 0x220   : > { %2968 = vst [vmem:[%s6354_s2 + $0x690] sm:$0xff] %v2743_v59  ;;  %v2744_v32 = vadd.f32 %v1979_v0, %v1012_v58  ;;  %2970 = vst [vmem:[%s6354_s2 + $0x6a0] sm:$0xff] %v2745_v55  ;;  %v2746_v61 = vadd.f32 %v2172_v13, %v1014_v5 }
 0x221   : > { %v1981_v4 = vpop.f32.mrf.mxu0  ;;  %v2174_v48 = vpop.f32.mrf.mxu1 }
 0x222   : > { %2969 = vst [vmem:[%s6354_s2 + $0x698] sm:$0xff] %v2744_v32  ;;  %v2750_v42 = vadd.f32 %v1981_v4, %v1018_v8  ;;  %2971 = vst [vmem:[%s6354_s2 + $0x6a8] sm:$0xff] %v2746_v61  ;;  %v2752_v2 = vadd.f32 %v2174_v48, %v1020_v38  ;;  %v840_v32 = vld [vmem:[%s6354_s2 + $0x138] sm:$0xff]  ;;  %v835_v38 = vld [vmem:[%s6354_s2 + $0x110] sm:$0xff] }
 0x223   : > { %v1983_v6 = vpop.f32.mrf.mxu0  ;;  %v2176_v16 = vpop.f32.mrf.mxu1 }
 0x224   : > { %2975 = vst [vmem:[%s6354_s2 + $0x6c8] sm:$0xff] %v2750_v42  ;;  %v2751_v15 = vadd.f32 %v1983_v6, %v1019_v11  ;;  %2977 = vst [vmem:[%s6354_s2 + $0x6d8] sm:$0xff] %v2752_v2  ;;  %v2753_v17 = vadd.f32 %v2176_v16, %v1021_v62  ;;  %v841_v42 = vld [vmem:[%s6354_s2 + $0x140] sm:$0xff]  ;;  %v842_v16 = vld [vmem:[%s6354_s2 + $0x148] sm:$0xff] }
 0x225   : > { %v2213_v18 = vpop.f32.mrf.mxu0  ;;  %v3202_v20 = vpop.f32.mrf.mxu1 }
 0x226   : > { %2976 = vst [vmem:[%s6354_s2 + $0x6d0] sm:$0xff] %v2751_v15  ;;  %v2537_v19 = vadd.f32 %v2213_v18, %v805_v14  ;;  %2978 = vst [vmem:[%s6354_s2 + $0x6e0] sm:$0xff] %v2753_v17  ;;  %v847_v14 = vld [vmem:[%s6354_s2 + $0x170] sm:$0xff] }
 0x227   : > { %v2215_v21 = vpop.f32.mrf.mxu0  ;;  %v3203_v24 = vpop.f32.mrf.mxu1 }
 0x228   : > { %2761 = vst [vmem:[%s6354_s2 + $0x20] sm:$0xff] %v2537_v19  ;;  %v2538_v9 = vadd.f32 %v2215_v21, %v806_v7  ;;  %v3204_v25 = vadd.f32 %v3203_v24, %v3202_v20  ;;  %v848_v19 = vld [vmem:[%s6354_s2 + $0x178] sm:$0xff] }
 0x229   : > { %v2217_v26 = vpop.f32.mrf.mxu0  ;;  %v3205_v29 = vpop.f32.mrf.mxu1 }
 0x22a   : > { %2762 = vst [vmem:[%s6354_s2 + $0x28] sm:$0xff] %v2538_v9  ;;  %v2544_v28 = vadd.f32 %v2217_v26, %v812_v22  ;;  %v2539_v63 = vadd.f32 %v3204_v25, %v807_v23  ;;  %v854_v23 = vld [vmem:[%s6354_s2 + $0x1a8] sm:$0xff]  ;;  %v849_v25 = vld [vmem:[%s6354_s2 + $0x180] sm:$0xff] }
 0x22b   : > { %v2219_v30 = vpop.f32.mrf.mxu0  ;;  %v3206_v1 = vpop.f32.mrf.mxu1 }
 0x22c   : > { %2769 = vst [vmem:[%s6354_s2 + $0x58] sm:$0xff] %v2544_v28  ;;  %v2545_v33 = vadd.f32 %v2219_v30, %v813_v27  ;;  %2764 = vst.msk [vmem:[%s6354_s2 + $0x30] sm:$0xff] %vm2763_vm1, %v2539_v63  ;;  %v3207_v35 = vadd.f32 %v3206_v1, %v3205_v29  ;;  %v855_v29 = vld [vmem:[%s6354_s2 + $0x1b0] sm:$0xff] }
 0x22d   : > { %v2223_v37 = vpop.f32.mrf.mxu0  ;;  %v3208_v41 = vpop.f32.mrf.mxu1 }
 0x22e   : > { %2770 = vst [vmem:[%s6354_s2 + $0x60] sm:$0xff] %v2545_v33  ;;  %v2551_v40 = vadd.f32 %v2223_v37, %v819_v31  ;;  %v2546_v10 = vadd.f32 %v3207_v35, %v814_v34  ;;  %v861_v34 = vld [vmem:[%s6354_s2 + $0x1e0] sm:$0xff]  ;;  %v856_v35 = vld [vmem:[%s6354_s2 + $0x1b8] sm:$0xff] }
 0x22f   : > { %v2225_v43 = vpop.f32.mrf.mxu0  ;;  %v3209_v12 = vpop.f32.mrf.mxu1 }
 0x230   : > { %2776 = vst [vmem:[%s6354_s2 + $0x90] sm:$0xff] %v2551_v40  ;;  %v2552_v45 = vadd.f32 %v2225_v43, %v820_v39  ;;  %2771 = vst.msk [vmem:[%s6354_s2 + $0x68] sm:$0xff] %vm2763_vm1, %v2546_v10  ;;  %v3210_v47 = vadd.f32 %v3209_v12, %v3208_v41  ;;  %v862_v41 = vld [vmem:[%s6354_s2 + $0x1e8] sm:$0xff] }
 0x231   : > { %v2227_v49 = vpop.f32.mrf.mxu0  ;;  %v3211_v52 = vpop.f32.mrf.mxu1 }
 0x232   : > { %2777 = vst [vmem:[%s6354_s2 + $0x98] sm:$0xff] %v2552_v45  ;;  %v2558_v51 = vadd.f32 %v2227_v49, %v826_v44  ;;  %v2553_v53 = vadd.f32 %v3210_v47, %v821_v46  ;;  %v868_v46 = vld [vmem:[%s6354_s2 + $0x218] sm:$0xff]  ;;  %v863_v47 = vld [vmem:[%s6354_s2 + $0x1f0] sm:$0xff] }
 0x233   : > { %v2229_v54 = vpop.f32.mrf.mxu0  ;;  %v3212_v57 = vpop.f32.mrf.mxu1 }
 0x234   : > { %2783 = vst [vmem:[%s6354_s2 + $0xc8] sm:$0xff] %v2558_v51  ;;  %v2559_v36 = vadd.f32 %v2229_v54, %v827_v50  ;;  %2778 = vst.msk [vmem:[%s6354_s2 + $0xa0] sm:$0xff] %vm2763_vm1, %v2553_v53  ;;  %v3213_v58 = vadd.f32 %v3212_v57, %v3211_v52  ;;  %v869_v52 = vld [vmem:[%s6354_s2 + $0x220] sm:$0xff] }
 0x235   : > { %v2233_v59 = vpop.f32.mrf.mxu0  ;;  %v3214_v55 = vpop.f32.mrf.mxu1 }
 0x236   : > { %2784 = vst [vmem:[%s6354_s2 + $0xd0] sm:$0xff] %v2559_v36  ;;  %v2565_v5 = vadd.f32 %v2233_v59, %v833_v56  ;;  %v2560_v0 = vadd.f32 %v3213_v58, %v828_v3  ;;  %v875_v3 = vld [vmem:[%s6354_s2 + $0x250] sm:$0xff]  ;;  %v870_v58 = vld [vmem:[%s6354_s2 + $0x228] sm:$0xff] }
 0x237   : > { %v2235_v8 = vpop.f32.mrf.mxu0  ;;  %v3215_v61 = vpop.f32.mrf.mxu1 }
 0x238   : > { %2790 = vst [vmem:[%s6354_s2 + $0x100] sm:$0xff] %v2565_v5  ;;  %v2566_v13 = vadd.f32 %v2235_v8, %v834_v60  ;;  %2785 = vst.msk [vmem:[%s6354_s2 + $0xd8] sm:$0xff] %vm2763_vm1, %v2560_v0  ;;  %v3216_v4 = vadd.f32 %v3215_v61, %v3214_v55  ;;  %v876_v55 = vld [vmem:[%s6354_s2 + $0x258] sm:$0xff] }
 0x239   : > { %v2237_v11 = vpop.f32.mrf.mxu0  ;;  %v3217_v62 = vpop.f32.mrf.mxu1 }
 0x23a   : > { %2791 = vst [vmem:[%s6354_s2 + $0x108] sm:$0xff] %v2566_v13  ;;  %v2572_v48 = vadd.f32 %v2237_v11, %v840_v32  ;;  %v2567_v2 = vadd.f32 %v3216_v4, %v835_v38  ;;  %v882_v38 = vld [vmem:[%s6354_s2 + $0x288] sm:$0xff]  ;;  %v877_v4 = vld [vmem:[%s6354_s2 + $0x260] sm:$0xff] }
 0x23b   : > { %v2239_v6 = vpop.f32.mrf.mxu0  ;;  %v3218_v17 = vpop.f32.mrf.mxu1 }
 0x23c   : > { %2797 = vst [vmem:[%s6354_s2 + $0x138] sm:$0xff] %v2572_v48  ;;  %v2573_v15 = vadd.f32 %v2239_v6, %v841_v42  ;;  %2792 = vst.msk [vmem:[%s6354_s2 + $0x110] sm:$0xff] %vm2763_vm1, %v2567_v2  ;;  %v3219_v18 = vadd.f32 %v3218_v17, %v3217_v62  ;;  %v883_v62 = vld [vmem:[%s6354_s2 + $0x290] sm:$0xff] }
 0x23d   : > { %v2243_v7 = vpop.f32.mrf.mxu0  ;;  %v3220_v21 = vpop.f32.mrf.mxu1 }
 0x23e   : > { %2798 = vst [vmem:[%s6354_s2 + $0x140] sm:$0xff] %v2573_v15  ;;  %v2579_v20 = vadd.f32 %v2243_v7, %v847_v14  ;;  %v2574_v22 = vadd.f32 %v3219_v18, %v842_v16  ;;  %v889_v16 = vld [vmem:[%s6354_s2 + $0x2c0] sm:$0xff]  ;;  %v884_v18 = vld [vmem:[%s6354_s2 + $0x298] sm:$0xff] }
 0x23f   : > { %v2245_v9 = vpop.f32.mrf.mxu0  ;;  %v3221_v26 = vpop.f32.mrf.mxu1 }
 0x240   : > { %2804 = vst [vmem:[%s6354_s2 + $0x170] sm:$0xff] %v2579_v20  ;;  %v2580_v24 = vadd.f32 %v2245_v9, %v848_v19  ;;  %2799 = vst.msk [vmem:[%s6354_s2 + $0x148] sm:$0xff] %vm2763_vm1, %v2574_v22  ;;  %v3222_v27 = vadd.f32 %v3221_v26, %v3220_v21  ;;  %v890_v21 = vld [vmem:[%s6354_s2 + $0x2c8] sm:$0xff] }
 0x241   : > { %v2247_v28 = vpop.f32.mrf.mxu0  ;;  %v3223_v30 = vpop.f32.mrf.mxu1 }
 0x242   : > { %2805 = vst [vmem:[%s6354_s2 + $0x178] sm:$0xff] %v2580_v24  ;;  %v2586_v63 = vadd.f32 %v2247_v28, %v854_v23  ;;  %v2581_v31 = vadd.f32 %v3222_v27, %v849_v25  ;;  %v896_v25 = vld [vmem:[%s6354_s2 + $0x2f8] sm:$0xff]  ;;  %v891_v27 = vld [vmem:[%s6354_s2 + $0x2d0] sm:$0xff] }
 0x243   : > { %v2249_v33 = vpop.f32.mrf.mxu0  ;;  %v3224_v37 = vpop.f32.mrf.mxu1 }
 0x244   : > { %2811 = vst [vmem:[%s6354_s2 + $0x1a8] sm:$0xff] %v2586_v63  ;;  %v2587_v1 = vadd.f32 %v2249_v33, %v855_v29  ;;  %2806 = vst.msk [vmem:[%s6354_s2 + $0x180] sm:$0xff] %vm2763_vm1, %v2581_v31  ;;  %v3225_v39 = vadd.f32 %v3224_v37, %v3223_v30  ;;  %v897_v30 = vld [vmem:[%s6354_s2 + $0x300] sm:$0xff] }
 0x245   : > { %v2253_v40 = vpop.f32.mrf.mxu0  ;;  %v3226_v43 = vpop.f32.mrf.mxu1 }
 0x246   : > { %2812 = vst [vmem:[%s6354_s2 + $0x1b0] sm:$0xff] %v2587_v1  ;;  %v2593_v10 = vadd.f32 %v2253_v40, %v861_v34  ;;  %v2588_v44 = vadd.f32 %v3225_v39, %v856_v35  ;;  %v903_v35 = vld [vmem:[%s6354_s2 + $0x330] sm:$0xff]  ;;  %v898_v39 = vld [vmem:[%s6354_s2 + $0x308] sm:$0xff] }
 0x247   : > { %v2255_v45 = vpop.f32.mrf.mxu0  ;;  %v3227_v49 = vpop.f32.mrf.mxu1 }
 0x248   : > { %2818 = vst [vmem:[%s6354_s2 + $0x1e0] sm:$0xff] %v2593_v10  ;;  %v2594_v12 = vadd.f32 %v2255_v45, %v862_v41  ;;  %2813 = vst.msk [vmem:[%s6354_s2 + $0x1b8] sm:$0xff] %vm2763_vm1, %v2588_v44  ;;  %v3228_v50 = vadd.f32 %v3227_v49, %v3226_v43  ;;  %v904_v43 = vld [vmem:[%s6354_s2 + $0x338] sm:$0xff] }
 0x249   : > { %v2257_v51 = vpop.f32.mrf.mxu0  ;;  %v3229_v54 = vpop.f32.mrf.mxu1 }
 0x24a   : > { %2819 = vst [vmem:[%s6354_s2 + $0x1e8] sm:$0xff] %v2594_v12  ;;  %v2600_v53 = vadd.f32 %v2257_v51, %v868_v46  ;;  %v2595_v56 = vadd.f32 %v3228_v50, %v863_v47  ;;  %v910_v47 = vld [vmem:[%s6354_s2 + $0x368] sm:$0xff]  ;;  %v905_v50 = vld [vmem:[%s6354_s2 + $0x340] sm:$0xff] }
 0x24b   : > { %v2259_v36 = vpop.f32.mrf.mxu0  ;;  %v3230_v59 = vpop.f32.mrf.mxu1 }
 0x24c   : > { %2825 = vst [vmem:[%s6354_s2 + $0x218] sm:$0xff] %v2600_v53  ;;  %v2601_v57 = vadd.f32 %v2259_v36, %v869_v52  ;;  %2820 = vst.msk [vmem:[%s6354_s2 + $0x1f0] sm:$0xff] %vm2763_vm1, %v2595_v56  ;;  %v3231_v60 = vadd.f32 %v3230_v59, %v3229_v54  ;;  %v911_v54 = vld [vmem:[%s6354_s2 + $0x370] sm:$0xff] }
 0x24d   : > { %v2263_v5 = vpop.f32.mrf.mxu0  ;;  %v3232_v8 = vpop.f32.mrf.mxu1 }
 0x24e   : > { %2826 = vst [vmem:[%s6354_s2 + $0x220] sm:$0xff] %v2601_v57  ;;  %v2607_v0 = vadd.f32 %v2263_v5, %v875_v3  ;;  %v2602_v32 = vadd.f32 %v3231_v60, %v870_v58  ;;  %v917_v58 = vld [vmem:[%s6354_s2 + $0x3a0] sm:$0xff]  ;;  %v912_v60 = vld [vmem:[%s6354_s2 + $0x378] sm:$0xff] }
 0x24f   : > { %v2265_v13 = vpop.f32.mrf.mxu0  ;;  %v3233_v11 = vpop.f32.mrf.mxu1 }
 0x250   : > { %2832 = vst [vmem:[%s6354_s2 + $0x250] sm:$0xff] %v2607_v0  ;;  %v2608_v61 = vadd.f32 %v2265_v13, %v876_v55  ;;  %2827 = vst.msk [vmem:[%s6354_s2 + $0x228] sm:$0xff] %vm2763_vm1, %v2602_v32  ;;  %v3234_v42 = vadd.f32 %v3233_v11, %v3232_v8  ;;  %v918_v8 = vld [vmem:[%s6354_s2 + $0x3a8] sm:$0xff] }
 0x251   : > { %v2267_v48 = vpop.f32.mrf.mxu0  ;;  %v3235_v6 = vpop.f32.mrf.mxu1 }
 0x252   : > { %2833 = vst [vmem:[%s6354_s2 + $0x258] sm:$0xff] %v2608_v61  ;;  %v2614_v2 = vadd.f32 %v2267_v48, %v882_v38  ;;  %v2609_v14 = vadd.f32 %v3234_v42, %v877_v4  ;;  %v924_v4 = vld [vmem:[%s6354_s2 + $0x3d8] sm:$0xff]  ;;  %v919_v42 = vld [vmem:[%s6354_s2 + $0x3b0] sm:$0xff] }
 0x253   : > { %v2269_v15 = vpop.f32.mrf.mxu0  ;;  %v3236_v7 = vpop.f32.mrf.mxu1 }
 0x254   : > { %2839 = vst [vmem:[%s6354_s2 + $0x288] sm:$0xff] %v2614_v2  ;;  %v2615_v17 = vadd.f32 %v2269_v15, %v883_v62  ;;  %2834 = vst.msk [vmem:[%s6354_s2 + $0x260] sm:$0xff] %vm2763_vm1, %v2609_v14  ;;  %v3237_v19 = vadd.f32 %v3236_v7, %v3235_v6  ;;  %v925_v6 = vld [vmem:[%s6354_s2 + $0x3e0] sm:$0xff] }
 0x255   : > { %v2273_v20 = vpop.f32.mrf.mxu0  ;;  %v3238_v9 = vpop.f32.mrf.mxu1 }
 0x256   : > { %2840 = vst [vmem:[%s6354_s2 + $0x290] sm:$0xff] %v2615_v17  ;;  %v2621_v22 = vadd.f32 %v2273_v20, %v889_v16  ;;  %v2616_v23 = vadd.f32 %v3237_v19, %v884_v18  ;;  %v931_v18 = vld [vmem:[%s6354_s2 + $0x410] sm:$0xff]  ;;  %v926_v19 = vld [vmem:[%s6354_s2 + $0x3e8] sm:$0xff] }
 0x257   : > { %v2275_v24 = vpop.f32.mrf.mxu0  ;;  %v3239_v28 = vpop.f32.mrf.mxu1 }
 0x258   : > { %2846 = vst [vmem:[%s6354_s2 + $0x2c0] sm:$0xff] %v2621_v22  ;;  %v2622_v26 = vadd.f32 %v2275_v24, %v890_v21  ;;  %2841 = vst.msk [vmem:[%s6354_s2 + $0x298] sm:$0xff] %vm2763_vm1, %v2616_v23  ;;  %v3240_v29 = vadd.f32 %v3239_v28, %v3238_v9  ;;  %v932_v9 = vld [vmem:[%s6354_s2 + $0x418] sm:$0xff] }
 0x259   : > { %v2277_v63 = vpop.f32.mrf.mxu0  ;;  %v3241_v33 = vpop.f32.mrf.mxu1 }
 0x25a   : > { %2847 = vst [vmem:[%s6354_s2 + $0x2c8] sm:$0xff] %v2622_v26  ;;  %v2628_v31 = vadd.f32 %v2277_v63, %v896_v25  ;;  %v2623_v34 = vadd.f32 %v3240_v29, %v891_v27  ;;  %v938_v27 = vld [vmem:[%s6354_s2 + $0x448] sm:$0xff]  ;;  %v933_v29 = vld [vmem:[%s6354_s2 + $0x420] sm:$0xff] }
 0x25b   : > { %v2279_v1 = vpop.f32.mrf.mxu0  ;;  %v3242_v40 = vpop.f32.mrf.mxu1 }
 0x25c   : > { %2853 = vst [vmem:[%s6354_s2 + $0x2f8] sm:$0xff] %v2628_v31  ;;  %v2629_v37 = vadd.f32 %v2279_v1, %v897_v30  ;;  %2848 = vst.msk [vmem:[%s6354_s2 + $0x2d0] sm:$0xff] %vm2763_vm1, %v2623_v34  ;;  %v3243_v41 = vadd.f32 %v3242_v40, %v3241_v33  ;;  %v939_v33 = vld [vmem:[%s6354_s2 + $0x450] sm:$0xff] }
 0x25d   : > { %v2283_v10 = vpop.f32.mrf.mxu0  ;;  %v3244_v45 = vpop.f32.mrf.mxu1 }
 0x25e   : > { %2854 = vst [vmem:[%s6354_s2 + $0x300] sm:$0xff] %v2629_v37  ;;  %v2635_v44 = vadd.f32 %v2283_v10, %v903_v35  ;;  %v2630_v46 = vadd.f32 %v3243_v41, %v898_v39  ;;  %v945_v39 = vld [vmem:[%s6354_s2 + $0x480] sm:$0xff]  ;;  %v940_v41 = vld [vmem:[%s6354_s2 + $0x458] sm:$0xff] }
 0x25f   : > { %v2285_v12 = vpop.f32.mrf.mxu0  ;;  %v3245_v51 = vpop.f32.mrf.mxu1 }
 0x260   : > { %2860 = vst [vmem:[%s6354_s2 + $0x330] sm:$0xff] %v2635_v44  ;;  %v2636_v49 = vadd.f32 %v2285_v12, %v904_v43  ;;  %2855 = vst.msk [vmem:[%s6354_s2 + $0x308] sm:$0xff] %vm2763_vm1, %v2630_v46  ;;  %v3246_v52 = vadd.f32 %v3245_v51, %v3244_v45  ;;  %v946_v45 = vld [vmem:[%s6354_s2 + $0x488] sm:$0xff] }
 0x261   : > { %v2287_v53 = vpop.f32.mrf.mxu0  ;;  %v3247_v36 = vpop.f32.mrf.mxu1 }
 0x262   : > { %2861 = vst [vmem:[%s6354_s2 + $0x338] sm:$0xff] %v2636_v49  ;;  %v2642_v56 = vadd.f32 %v2287_v53, %v910_v47  ;;  %v2637_v3 = vadd.f32 %v3246_v52, %v905_v50  ;;  %v952_v50 = vld [vmem:[%s6354_s2 + $0x4b8] sm:$0xff]  ;;  %v947_v52 = vld [vmem:[%s6354_s2 + $0x490] sm:$0xff] }
 0x263   : > { %v2289_v57 = vpop.f32.mrf.mxu0  ;;  %v3248_v5 = vpop.f32.mrf.mxu1 }
 0x264   : > { %2867 = vst [vmem:[%s6354_s2 + $0x368] sm:$0xff] %v2642_v56  ;;  %v2643_v59 = vadd.f32 %v2289_v57, %v911_v54  ;;  %2862 = vst.msk [vmem:[%s6354_s2 + $0x340] sm:$0xff] %vm2763_vm1, %v2637_v3  ;;  %v3249_v55 = vadd.f32 %v3248_v5, %v3247_v36  ;;  %v953_v36 = vld [vmem:[%s6354_s2 + $0x4c0] sm:$0xff] }
 0x265   : > { %v2293_v0 = vpop.f32.mrf.mxu0  ;;  %v3250_v13 = vpop.f32.mrf.mxu1 }
 0x266   : > { %2868 = vst [vmem:[%s6354_s2 + $0x370] sm:$0xff] %v2643_v59  ;;  %v2649_v32 = vadd.f32 %v2293_v0, %v917_v58  ;;  %v2644_v38 = vadd.f32 %v3249_v55, %v912_v60  ;;  %v959_v60 = vld [vmem:[%s6354_s2 + $0x4f0] sm:$0xff]  ;;  %v954_v55 = vld [vmem:[%s6354_s2 + $0x4c8] sm:$0xff] }
 0x267   : > { %v2295_v61 = vpop.f32.mrf.mxu0  ;;  %v3251_v48 = vpop.f32.mrf.mxu1 }
 0x268   : > { %2874 = vst [vmem:[%s6354_s2 + $0x3a0] sm:$0xff] %v2649_v32  ;;  %v2650_v11 = vadd.f32 %v2295_v61, %v918_v8  ;;  %2869 = vst.msk [vmem:[%s6354_s2 + $0x378] sm:$0xff] %vm2763_vm1, %v2644_v38  ;;  %v3252_v62 = vadd.f32 %v3251_v48, %v3250_v13  ;;  %v960_v13 = vld [vmem:[%s6354_s2 + $0x4f8] sm:$0xff] }
 0x269   : > { %v2297_v2 = vpop.f32.mrf.mxu0  ;;  %v3253_v15 = vpop.f32.mrf.mxu1 }
 0x26a   : > { %2875 = vst [vmem:[%s6354_s2 + $0x3a8] sm:$0xff] %v2650_v11  ;;  %v2656_v14 = vadd.f32 %v2297_v2, %v924_v4  ;;  %v2651_v16 = vadd.f32 %v3252_v62, %v919_v42  ;;  %v966_v42 = vld [vmem:[%s6354_s2 + $0x528] sm:$0xff]  ;;  %v961_v62 = vld [vmem:[%s6354_s2 + $0x500] sm:$0xff] }
 0x26b   : > { %v2299_v17 = vpop.f32.mrf.mxu0  ;;  %v3254_v20 = vpop.f32.mrf.mxu1 }
 0x26c   : > { %2881 = vst [vmem:[%s6354_s2 + $0x3d8] sm:$0xff] %v2656_v14  ;;  %v2657_v7 = vadd.f32 %v2299_v17, %v925_v6  ;;  %2876 = vst.msk [vmem:[%s6354_s2 + $0x3b0] sm:$0xff] %vm2763_vm1, %v2651_v16  ;;  %v3255_v21 = vadd.f32 %v3254_v20, %v3253_v15  ;;  %v967_v15 = vld [vmem:[%s6354_s2 + $0x530] sm:$0xff] }
 0x26d   : > { %v2303_v22 = vpop.f32.mrf.mxu0  ;;  %v3256_v24 = vpop.f32.mrf.mxu1 }
 0x26e   : > { %2882 = vst [vmem:[%s6354_s2 + $0x3e0] sm:$0xff] %v2657_v7  ;;  %v2663_v23 = vadd.f32 %v2303_v22, %v931_v18  ;;  %v2658_v25 = vadd.f32 %v3255_v21, %v926_v19  ;;  %v973_v19 = vld [vmem:[%s6354_s2 + $0x560] sm:$0xff]  ;;  %v968_v21 = vld [vmem:[%s6354_s2 + $0x538] sm:$0xff] }
 0x26f   : > { %v2305_v26 = vpop.f32.mrf.mxu0  ;;  %v3257_v63 = vpop.f32.mrf.mxu1 }
 0x270   : > { %2888 = vst [vmem:[%s6354_s2 + $0x410] sm:$0xff] %v2663_v23  ;;  %v2664_v28 = vadd.f32 %v2305_v26, %v932_v9  ;;  %2883 = vst.msk [vmem:[%s6354_s2 + $0x3e8] sm:$0xff] %vm2763_vm1, %v2658_v25  ;;  %v3258_v30 = vadd.f32 %v3257_v63, %v3256_v24  ;;  %v974_v24 = vld [vmem:[%s6354_s2 + $0x568] sm:$0xff] }
 0x271   : > { %v2307_v31 = vpop.f32.mrf.mxu0  ;;  %v3259_v1 = vpop.f32.mrf.mxu1 }
 0x272   : > { %2889 = vst [vmem:[%s6354_s2 + $0x418] sm:$0xff] %v2664_v28  ;;  %v2670_v34 = vadd.f32 %v2307_v31, %v938_v27  ;;  %v2665_v35 = vadd.f32 %v3258_v30, %v933_v29  ;;  %v980_v29 = vld [vmem:[%s6354_s2 + $0x598] sm:$0xff]  ;;  %v975_v30 = vld [vmem:[%s6354_s2 + $0x570] sm:$0xff] }
 0x273   : > { %v2309_v37 = vpop.f32.mrf.mxu0  ;;  %v3260_v10 = vpop.f32.mrf.mxu1 }
 0x274   : > { %2895 = vst [vmem:[%s6354_s2 + $0x448] sm:$0xff] %v2670_v34  ;;  %v2671_v40 = vadd.f32 %v2309_v37, %v939_v33  ;;  %2890 = vst.msk [vmem:[%s6354_s2 + $0x420] sm:$0xff] %vm2763_vm1, %v2665_v35  ;;  %v3261_v43 = vadd.f32 %v3260_v10, %v3259_v1  ;;  %v981_v1 = vld [vmem:[%s6354_s2 + $0x5a0] sm:$0xff] }
 0x275   : > { %v2313_v44 = vpop.f32.mrf.mxu0  ;;  %v3262_v12 = vpop.f32.mrf.mxu1 }
 0x276   : > { %2896 = vst [vmem:[%s6354_s2 + $0x450] sm:$0xff] %v2671_v40  ;;  %v2677_v46 = vadd.f32 %v2313_v44, %v945_v39  ;;  %v2672_v47 = vadd.f32 %v3261_v43, %v940_v41  ;;  %v987_v41 = vld [vmem:[%s6354_s2 + $0x5d0] sm:$0xff]  ;;  %v982_v43 = vld [vmem:[%s6354_s2 + $0x5a8] sm:$0xff] }
 0x277   : > { %v2315_v49 = vpop.f32.mrf.mxu0  ;;  %v3263_v53 = vpop.f32.mrf.mxu1 }
 0x278   : > { %2902 = vst [vmem:[%s6354_s2 + $0x480] sm:$0xff] %v2677_v46  ;;  %v2678_v51 = vadd.f32 %v2315_v49, %v946_v45  ;;  %2897 = vst.msk [vmem:[%s6354_s2 + $0x458] sm:$0xff] %vm2763_vm1, %v2672_v47  ;;  %v3264_v54 = vadd.f32 %v3263_v53, %v3262_v12  ;;  %v988_v12 = vld [vmem:[%s6354_s2 + $0x5d8] sm:$0xff] }
 0x279   : > { %v2317_v56 = vpop.f32.mrf.mxu0  ;;  %v3265_v57 = vpop.f32.mrf.mxu1 }
 0x27a   : > { %2903 = vst [vmem:[%s6354_s2 + $0x488] sm:$0xff] %v2678_v51  ;;  %v2684_v3 = vadd.f32 %v2317_v56, %v952_v50  ;;  %v2679_v58 = vadd.f32 %v3264_v54, %v947_v52  ;;  %v994_v52 = vld [vmem:[%s6354_s2 + $0x608] sm:$0xff]  ;;  %v989_v54 = vld [vmem:[%s6354_s2 + $0x5e0] sm:$0xff] }
 0x27b   : > { %v2319_v59 = vpop.f32.mrf.mxu0  ;;  %v3266_v0 = vpop.f32.mrf.mxu1 }
 0x27c   : > { %2909 = vst [vmem:[%s6354_s2 + $0x4b8] sm:$0xff] %v2684_v3  ;;  %v2685_v5 = vadd.f32 %v2319_v59, %v953_v36  ;;  %2904 = vst.msk [vmem:[%s6354_s2 + $0x490] sm:$0xff] %vm2763_vm1, %v2679_v58  ;;  %v3267_v8 = vadd.f32 %v3266_v0, %v3265_v57  ;;  %v995_v57 = vld [vmem:[%s6354_s2 + $0x610] sm:$0xff] }
 0x27d   : > { %v2323_v32 = vpop.f32.mrf.mxu0  ;;  %v3268_v61 = vpop.f32.mrf.mxu1 }
 0x27e   : > { %2910 = vst [vmem:[%s6354_s2 + $0x4c0] sm:$0xff] %v2685_v5  ;;  %v2691_v38 = vadd.f32 %v2323_v32, %v959_v60  ;;  %v2686_v4 = vadd.f32 %v3267_v8, %v954_v55  ;;  %v1001_v55 = vld [vmem:[%s6354_s2 + $0x640] sm:$0xff]  ;;  %v996_v8 = vld [vmem:[%s6354_s2 + $0x618] sm:$0xff] }
 0x27f   : > { %v2325_v11 = vpop.f32.mrf.mxu0  ;;  %v3269_v2 = vpop.f32.mrf.mxu1 }
 0x280   : > { %2916 = vst [vmem:[%s6354_s2 + $0x4f0] sm:$0xff] %v2691_v38  ;;  %v2692_v48 = vadd.f32 %v2325_v11, %v960_v13  ;;  %2911 = vst.msk [vmem:[%s6354_s2 + $0x4c8] sm:$0xff] %vm2763_vm1, %v2686_v4  ;;  %v3270_v6 = vadd.f32 %v3269_v2, %v3268_v61  ;;  %v1002_v61 = vld [vmem:[%s6354_s2 + $0x648] sm:$0xff] }
 0x281   : > { %v2327_v14 = vpop.f32.mrf.mxu0  ;;  %v3271_v17 = vpop.f32.mrf.mxu1 }
 0x282   : > { %2917 = vst [vmem:[%s6354_s2 + $0x4f8] sm:$0xff] %v2692_v48  ;;  %v2698_v16 = vadd.f32 %v2327_v14, %v966_v42  ;;  %v2693_v18 = vadd.f32 %v3270_v6, %v961_v62  ;;  %v1008_v62 = vld [vmem:[%s6354_s2 + $0x678] sm:$0xff]  ;;  %v1003_v6 = vld [vmem:[%s6354_s2 + $0x650] sm:$0xff] }
 0x283   : > { %v2329_v7 = vpop.f32.mrf.mxu0  ;;  %v3272_v22 = vpop.f32.mrf.mxu1 }
 0x284   : > { %2923 = vst [vmem:[%s6354_s2 + $0x528] sm:$0xff] %v2698_v16  ;;  %v2699_v20 = vadd.f32 %v2329_v7, %v967_v15  ;;  %2918 = vst.msk [vmem:[%s6354_s2 + $0x500] sm:$0xff] %vm2763_vm1, %v2693_v18  ;;  %v3273_v9 = vadd.f32 %v3272_v22, %v3271_v17  ;;  %v1009_v17 = vld [vmem:[%s6354_s2 + $0x680] sm:$0xff] }
 0x285   : > { %v2333_v23 = vpop.f32.mrf.mxu0  ;;  %v3274_v26 = vpop.f32.mrf.mxu1 }
 0x286   : > { %2924 = vst [vmem:[%s6354_s2 + $0x530] sm:$0xff] %v2699_v20  ;;  %v2705_v25 = vadd.f32 %v2333_v23, %v973_v19  ;;  %v2700_v27 = vadd.f32 %v3273_v9, %v968_v21  ;;  %v1015_v21 = vld [vmem:[%s6354_s2 + $0x6b0] sm:$0xff]  ;;  %v1010_v9 = vld [vmem:[%s6354_s2 + $0x688] sm:$0xff] }
 0x287   : > { %v2335_v28 = vpop.f32.mrf.mxu0  ;;  %v3275_v31 = vpop.f32.mrf.mxu1 }
 0x288   : > { %2930 = vst [vmem:[%s6354_s2 + $0x560] sm:$0xff] %v2705_v25  ;;  %v2706_v63 = vadd.f32 %v2335_v28, %v974_v24  ;;  %2925 = vst.msk [vmem:[%s6354_s2 + $0x538] sm:$0xff] %vm2763_vm1, %v2700_v27  ;;  %v3276_v33 = vadd.f32 %v3275_v31, %v3274_v26  ;;  %v1016_v26 = vld [vmem:[%s6354_s2 + $0x6b8] sm:$0xff] }
 0x289   : > { %v2337_v34 = vpop.f32.mrf.mxu0  ;;  %v3277_v37 = vpop.f32.mrf.mxu1 }
 0x28a   : > { %2931 = vst [vmem:[%s6354_s2 + $0x568] sm:$0xff] %v2706_v63  ;;  %v2712_v35 = vadd.f32 %v2337_v34, %v980_v29  ;;  %v2707_v39 = vadd.f32 %v3276_v33, %v975_v30  ;;  %v1022_v30 = vld [vmem:[%s6354_s2 + $0x6e8] sm:$0xff]  ;;  %v1017_v33 = vld [vmem:[%s6354_s2 + $0x6c0] sm:$0xff] }
 0x28b   : > { %v2339_v40 = vpop.f32.mrf.mxu0  ;;  %v3278_v44 = vpop.f32.mrf.mxu1 }
 0x28c   : > { %2937 = vst [vmem:[%s6354_s2 + $0x598] sm:$0xff] %v2712_v35  ;;  %v2713_v10 = vadd.f32 %v2339_v40, %v981_v1  ;;  %2932 = vst.msk [vmem:[%s6354_s2 + $0x570] sm:$0xff] %vm2763_vm1, %v2707_v39  ;;  %v3279_v45 = vadd.f32 %v3278_v44, %v3277_v37  ;;  %v1023_v37 = vld [vmem:[%s6354_s2 + $0x6f0] sm:$0xff]  ;;  %v1024_v44 = vld [vmem:[%s6354_s2 + $0x6f8] sm:$0xff] }
 0x28d   : > { %v2343_v46 = vpop.f32.mrf.mxu0  ;;  %v3280_v49 = vpop.f32.mrf.mxu1 }
 0x28e   : > { %2938 = vst [vmem:[%s6354_s2 + $0x5a0] sm:$0xff] %v2713_v10  ;;  %v2719_v47 = vadd.f32 %v2343_v46, %v987_v41  ;;  %v2714_v50 = vadd.f32 %v3279_v45, %v982_v43 }
 0x28f   : > { %v2345_v51 = vpop.f32.mrf.mxu0  ;;  %v3281_v56 = vpop.f32.mrf.mxu1 }
 0x290   : > { %2944 = vst [vmem:[%s6354_s2 + $0x5d0] sm:$0xff] %v2719_v47  ;;  %v2720_v53 = vadd.f32 %v2345_v51, %v988_v12  ;;  %2939 = vst.msk [vmem:[%s6354_s2 + $0x5a8] sm:$0xff] %vm2763_vm1, %v2714_v50  ;;  %v3282_v36 = vadd.f32 %v3281_v56, %v3280_v49 }
 0x291   : > { %v2347_v3 = vpop.f32.mrf.mxu0  ;;  %v3283_v59 = vpop.f32.mrf.mxu1 }
 0x292   : > { %2945 = vst [vmem:[%s6354_s2 + $0x5d8] sm:$0xff] %v2720_v53  ;;  %v2726_v58 = vadd.f32 %v2347_v3, %v994_v52  ;;  %v2721_v60 = vadd.f32 %v3282_v36, %v989_v54 }
 0x293   : > { %v2349_v5 = vpop.f32.mrf.mxu0  ;;  %v3284_v32 = vpop.f32.mrf.mxu1 }
 0x294   : > { %2951 = vst [vmem:[%s6354_s2 + $0x608] sm:$0xff] %v2726_v58  ;;  %v2727_v0 = vadd.f32 %v2349_v5, %v995_v57  ;;  %2946 = vst.msk [vmem:[%s6354_s2 + $0x5e0] sm:$0xff] %vm2763_vm1, %v2721_v60  ;;  %v3285_v13 = vadd.f32 %v3284_v32, %v3283_v59 }
 0x295   : > { %v2353_v38 = vpop.f32.mrf.mxu0  ;;  %v3286_v11 = vpop.f32.mrf.mxu1 }
 0x296   : > { %2952 = vst [vmem:[%s6354_s2 + $0x610] sm:$0xff] %v2727_v0  ;;  %v2733_v4 = vadd.f32 %v2353_v38, %v1001_v55  ;;  %v2728_v42 = vadd.f32 %v3285_v13, %v996_v8 }
 0x297   : > { %v2355_v48 = vpop.f32.mrf.mxu0  ;;  %v3287_v14 = vpop.f32.mrf.mxu1 }
 0x298   : > { %2958 = vst [vmem:[%s6354_s2 + $0x640] sm:$0xff] %v2733_v4  ;;  %v2734_v2 = vadd.f32 %v2355_v48, %v1002_v61  ;;  %2953 = vst.msk [vmem:[%s6354_s2 + $0x618] sm:$0xff] %vm2763_vm1, %v2728_v42  ;;  %v3288_v15 = vadd.f32 %v3287_v14, %v3286_v11 }
 0x299   : > { %v2357_v16 = vpop.f32.mrf.mxu0  ;;  %v3289_v7 = vpop.f32.mrf.mxu1 }
 0x29a   : > { %2959 = vst [vmem:[%s6354_s2 + $0x648] sm:$0xff] %v2734_v2  ;;  %v2740_v18 = vadd.f32 %v2357_v16, %v1008_v62  ;;  %v2735_v19 = vadd.f32 %v3288_v15, %v1003_v6 }
 0x29b   : > { %v2359_v20 = vpop.f32.mrf.mxu0  ;;  %v3290_v23 = vpop.f32.mrf.mxu1 }
 0x29c   : > { %2965 = vst [vmem:[%s6354_s2 + $0x678] sm:$0xff] %v2740_v18  ;;  %v2741_v22 = vadd.f32 %v2359_v20, %v1009_v17  ;;  %2960 = vst.msk [vmem:[%s6354_s2 + $0x650] sm:$0xff] %vm2763_vm1, %v2735_v19  ;;  %v3291_v24 = vadd.f32 %v3290_v23, %v3289_v7 }
 0x29d   : > { %v2363_v25 = vpop.f32.mrf.mxu0  ;;  %v3292_v28 = vpop.f32.mrf.mxu1 }
 0x29e   : > { %2966 = vst [vmem:[%s6354_s2 + $0x680] sm:$0xff] %v2741_v22  ;;  %v2747_v27 = vadd.f32 %v2363_v25, %v1015_v21  ;;  %v2742_v29 = vadd.f32 %v3291_v24, %v1010_v9 }
 0x29f   : > { %v2365_v63 = vpop.f32.mrf.mxu0  ;;  %v3293_v34 = vpop.f32.mrf.mxu1 }
 0x2a0   : > { %2972 = vst [vmem:[%s6354_s2 + $0x6b0] sm:$0xff] %v2747_v27  ;;  %v2748_v31 = vadd.f32 %v2365_v63, %v1016_v26  ;;  %2967 = vst.msk [vmem:[%s6354_s2 + $0x688] sm:$0xff] %vm2763_vm1, %v2742_v29  ;;  %v3294_v1 = vadd.f32 %v3293_v34, %v3292_v28 }
 0x2a1   : > { %v2367_v35 = vpop.f32.mrf.mxu0  ;;  %v3295_v40 = vpop.f32.mrf.mxu1 }
 0x2a2   : > { %2973 = vst [vmem:[%s6354_s2 + $0x6b8] sm:$0xff] %v2748_v31  ;;  %v2754_v39 = vadd.f32 %v2367_v35, %v1022_v30  ;;  %v2749_v41 = vadd.f32 %v3294_v1, %v1017_v33 }
 0x2a3   : > { %v2369_v10 = vpop.f32.mrf.mxu0  ;;  %v3296_v45 = vpop.f32.mrf.mxu1 }
 0x2a4   : > { %2979 = vst [vmem:[%s6354_s2 + $0x6e8] sm:$0xff] %v2754_v39  ;;  %v2755_v43 = vadd.f32 %v2369_v10, %v1023_v37  ;;  %2974 = vst.msk [vmem:[%s6354_s2 + $0x6c0] sm:$0xff] %vm2763_vm1, %v2749_v41  ;;  %v3297_v46 = vadd.f32 %v3296_v45, %v3295_v40 }
 0x2a6   : > { %2980 = vst [vmem:[%s6354_s2 + $0x6f0] sm:$0xff] %v2755_v43  ;;  %v2756_v12 = vadd.f32 %v3297_v46, %v1024_v44 }
 0x2a8   : > { %2981 = vst.msk [vmem:[%s6354_s2 + $0x6f8] sm:$0xff] %vm2763_vm1, %v2756_v12 }
 0x2a9 PF: > { %p9_p10 = scmp.ge.s32.totalorder %s3431_s13, 4   ;;  %s6355_s9 = smov %s3391_s10 }
 0x2aa   : > { %s6356_s10 = smov %s3440_s16  ;;  %s6357_s11 = smov %s3431_s13 }
 0x2ab   :  { %11 = sbr.rel (!%p9_p10) target bundleno = 2 (0x2), region = 104 }

</bundles_post_ra>
